<compile_context>
chip_gen: v5e
topology: v5e:2x2
jax: 0.10.0
libtpu: 0.0.40
codegen_flags: <defaults>
</compile_context>

<pallas_src>
import functools

import jax
import jax.numpy as jnp
from jax.experimental import pallas as pl
from jax.experimental.pallas import tpu as pltpu

EPS = 1e-5
_VMEM_BUDGET = 12 << 20   # per-block live-data budget; safe on v7x's 64 MiB VMEM


def _same_group_proj(c, num_groups):
    """(C, C) float matrix with 1.0 where two channels share a GroupNorm group."""
    g = jnp.arange(c) // (c // num_groups)
    return (g[:, None] == g[None, :]).astype(jnp.float32)


def _tap_masks(H, W):
    """(9, H*W) {0,1} validity mask per 3x3 tap, (dy, dx) row-major order."""
    pos = jnp.arange(H * W)
    r, c = pos // W, pos % W
    rows = []
    for dy in (-1, 0, 1):
        for dx in (-1, 0, 1):
            ok = jnp.ones((H * W,), bool)
            if dy == -1:
                ok = ok & (r >= 1)
            if dy == 1:
                ok = ok & (r <= H - 2)
            if dx == -1:
                ok = ok & (c >= 1)
            if dx == 1:
                ok = ok & (c <= W - 2)
            rows.append(ok)
    return jnp.stack(rows, axis=0).astype(jnp.float32)


def _per_sample_vmem_bytes(cin, cmid, n, mxu_bytes):
    """Rough upper bound on per-sample live VMEM inside one grid block."""
    f32 = 4
    io = 3 * cin * n * f32 * 2                        # z, x, out (double-buffered)
    taps = 9 * (cin + cmid) * n * (f32 + mxu_bytes)   # im2col build + MXU-dtype copy
    inter = (3 * cmid + 5 * cin) * n * f32            # a1, y, a2, inner, GN temps
    return io + taps + inter


def resnet_layer_kernel(z_ref, x_ref, w1_ref, w2_ref, gb_ref, mask_ref,
                        projm_ref, proji_ref, o_ref, *,
                        H, W, Bt, cin, cmid, gsize_in, gsize_mid, mxu_dtype):
    N = H * W
    L = Bt * N

    z = z_ref[...].astype(jnp.float32)        # (Cin, L)  lane-packed batch
    x = x_ref[...].astype(jnp.float32)        # (Cin, L)
    masks = mask_ref[...]                     # (9, L)    precomputed {0,1} tap masks
    gb = gb_ref[...]                          # (Cmax, 8) packed gamma/beta
    g1, b1 = gb[:cmid, 0:1], gb[:cmid, 1:2]
    g2, b2 = gb[:cin, 2:3], gb[:cin, 3:4]
    g3, b3 = gb[:cin, 4:5], gb[:cin, 5:6]
    projm = projm_ref[...] if gsize_mid > 1 else None
    proji = proji_ref[...] if gsize_in > 1 else None

    def im2col(t):
        """t: (C, L) -> (9*C, L) stacked taps via XLU roll + hoisted masks."""
        taps = []
        for dy in (-1, 0, 1):
            for dx in (-1, 0, 1):
                s = dy * W + dx
                tap = t if s == 0 else pltpu.roll(t, shift=(-s) % L, axis=1)
                if s != 0:
                    k = (dy + 1) * 3 + (dx + 1)
                    tap = tap * masks[k:k + 1, :]     # zero wrapped / OOB reads
                taps.append(tap)
        return jnp.concatenate(taps, axis=0).astype(mxu_dtype)

    def group_norm(t, gamma, beta, proj, gsize):
        """GroupNorm over (C, Bt*N) with strictly per-sample statistics."""
        inv_cnt = jnp.float32(1.0 / (gsize * N))
        # Pass 1: per-sample per-channel lane sums, batched into one (C, Bt).
        sums = [jnp.sum(t[:, b * N:(b + 1) * N], axis=1, keepdims=True)
                for b in range(Bt)]
        S = sums[0] if Bt == 1 else jnp.concatenate(sums, axis=1)
        if gsize > 1:                      # group size 1 -> identity, no matmul
            S = jnp.dot(proj, S, preferred_element_type=jnp.float32)
        mean = S * inv_cnt                                     # (C, Bt)
        # Pass 2: centered variance (robust two-pass), still per sample.
        ds, s2s = [], []
        for b in range(Bt):
            d = t[:, b * N:(b + 1) * N] - mean[:, b:b + 1]
            ds.append(d)
            s2s.append(jnp.sum(d * d, axis=1, keepdims=True))
        S2 = s2s[0] if Bt == 1 else jnp.concatenate(s2s, axis=1)
        if gsize > 1:
            S2 = jnp.dot(proj, S2, preferred_element_type=jnp.float32)
        scale = jax.lax.rsqrt(S2 * inv_cnt + EPS) * gamma      # (C, Bt)
        outs = [ds[b] * scale[:, b:b + 1] + beta for b in range(Bt)]
        return outs[0] if Bt == 1 else jnp.concatenate(outs, axis=1)

    # conv1(z): one (Cmid, 9*Cin) x (9*Cin, Bt*N) MXU matmul, f32 accumulation.
    a1 = jnp.dot(w1_ref[...], im2col(z), preferred_element_type=jnp.float32)
    y = group_norm(jnp.maximum(a1, 0.0), g1, b1, projm, gsize_mid)

    # conv2(y): one (Cin, 9*Cmid) x (9*Cmid, Bt*N) MXU matmul.
    a2 = jnp.dot(w2_ref[...], im2col(y), preferred_element_type=jnp.float32)
    inner = group_norm(x + a2, g2, b2, proji, gsize_in)
    out = group_norm(jnp.maximum(z + inner, 0.0), g3, b3, proji, gsize_in)
    o_ref[...] = out.astype(o_ref.dtype)       # lane-dense (Cin, Bt*N) store


def resnet_layer(z, x, w1, w2, g1, b1, g2, b2, g3, b3, *, num_groups=8,
                 mxu_dtype=jnp.bfloat16, samples_per_block=None):
    """z, x: (B, C, H, W) NCHW.  w1: (Cmid, C, 3, 3), w2: (C, Cmid, 3, 3) OIHW."""
    B, Cin, H, W = z.shape
    Cmid = w1.shape[0]
    N = H * W
    assert N % 128 == 0, "H*W must be a multiple of 128 (lane tiling)"
    assert Cin % num_groups == 0 and Cmid % num_groups == 0
    gsize_in = Cin // num_groups
    gsize_mid = Cmid // num_groups

    # ---- choose samples per grid block (Bt) --------------------------------
    if samples_per_block is None:
        per_sample = _per_sample_vmem_bytes(Cin, Cmid, N,
                                            jnp.dtype(mxu_dtype).itemsize)
        bt_cap = max(1, _VMEM_BUDGET // per_sample)      # v7x-safe VMEM budget
        # >= 2 parallel blocks so both v7x TensorCores get work; the one extra
        # serial step on v5e/v6e costs only ~0.35 us.
        target = -(-B // 2) if B > 1 else 1
        bt = max(1, min(bt_cap, target))
        while B % bt:                                    # keep every block full
            bt -= 1
    else:
        bt = int(samples_per_block)
        assert 1 <= bt <= B and B % bt == 0
    L = bt * N
    grid = (B // bt,)

    # ---- host-side layout plumbing (lane-packed batch, flattened weights) --
    zf = jnp.transpose(z.reshape(B, Cin, N), (1, 0, 2)).reshape(Cin, B * N)
    xf = jnp.transpose(x.reshape(B, Cin, N), (1, 0, 2)).reshape(Cin, B * N)
    # (Cout, Cin, 3, 3) -> (Cout, 9*Cin), tap order (dy, dx, ci) matching im2col.
    w1f = jnp.transpose(w1, (0, 2, 3, 1)).reshape(Cmid, 9 * Cin).astype(mxu_dtype)
    w2f = jnp.transpose(w2, (0, 2, 3, 1)).reshape(Cin, 9 * Cmid).astype(mxu_dtype)

    # Packed GroupNorm affine params: one tiny (Cmax, 8) input instead of six.
    Cmax = max(Cin, Cmid)
    pad = lambda v, c: jnp.pad(v.astype(jnp.float32), (0, Cmax - c))
    zeros = jnp.zeros((Cmax,), jnp.float32)
    gb = jnp.stack([pad(g1, Cmid), pad(b1, Cmid), pad(g2, Cin), pad(b2, Cin),
                    pad(g3, Cin), pad(b3, Cin), zeros, zeros], axis=1)

    # Hoisted constants: tap validity masks (tiled across the packed batch) and
    # the GroupNorm group-projection matrices.
    tapmask = jnp.tile(_tap_masks(H, W), (1, B))          # (9, B*N)
    projm = _same_group_proj(Cmid, num_groups)            # (Cmid, Cmid)
    proji = _same_group_proj(Cin, num_groups)             # (Cin, Cin)  (unused if gsize 1)

    kernel = functools.partial(
        resnet_layer_kernel, H=H, W=W, Bt=bt, cin=Cin, cmid=Cmid,
        gsize_in=gsize_in, gsize_mid=gsize_mid, mxu_dtype=mxu_dtype)

    out = pl.pallas_call(
        kernel,
        out_shape=jax.ShapeDtypeStruct((Cin, B * N), z.dtype),
        grid_spec=pltpu.PrefetchScalarGridSpec(
            num_scalar_prefetch=0,
            grid=grid,
            in_specs=[
                pl.BlockSpec((Cin, L), lambda b: (0, b)),          # z (lane-packed)
                pl.BlockSpec((Cin, L), lambda b: (0, b)),          # x
                pl.BlockSpec((Cmid, 9 * Cin), lambda b: (0, 0)),   # w1 (flat, MXU dtype)
                pl.BlockSpec((Cin, 9 * Cmid), lambda b: (0, 0)),   # w2
                pl.BlockSpec((Cmax, 8), lambda b: (0, 0)),         # packed gamma/beta
                pl.BlockSpec((9, L), lambda b: (0, b)),            # tap masks
                pl.BlockSpec((Cmid, Cmid), lambda b: (0, 0)),      # GN1 group proj
                pl.BlockSpec((Cin, Cin), lambda b: (0, 0)),        # GN2/3 proj (identity here)
            ],
            out_specs=pl.BlockSpec((Cin, L), lambda b: (0, b)),
        ),
        compiler_params=pltpu.CompilerParams(
            dimension_semantics=("parallel",)),     # blocks split across v7x's 2 TCs
    )(zf, xf, w1f, w2f, gb, tapmask, projm, proji)
    return jnp.transpose(out.reshape(Cin, B, N), (1, 0, 2)).reshape(B, Cin, H, W)


if __name__ == "__main__":
    B, C, H, W = 8, 8, 16, 16       # n_channels=8
    Cmid = 16                       # n_inner_channels=16
    G = 8                           # num_groups=8

    key = jax.random.PRNGKey(0)
    k1, k2, k3, k4 = jax.random.split(key, 4)
    z = jax.random.normal(k1, (B, C, H, W), jnp.float32)    # NCHW like PyTorch
    x = jax.random.normal(k2, (B, C, H, W), jnp.float32)
    # Conv weights ~ N(0, 0.01), matching conv.weight.data.normal_(0, 0.01); OIHW.
    w1 = jax.random.normal(k3, (Cmid, C, 3, 3), jnp.float32) * 0.01
    w2 = jax.random.normal(k4, (C, Cmid, 3, 3), jnp.float32) * 0.01
    # GroupNorm affine params at default init (weight=1, bias=0).
    g1, b1 = jnp.ones((Cmid,), jnp.float32), jnp.zeros((Cmid,), jnp.float32)
    g2, b2 = jnp.ones((C,), jnp.float32), jnp.zeros((C,), jnp.float32)
    g3, b3 = jnp.ones((C,), jnp.float32), jnp.zeros((C,), jnp.float32)

    # Pure-JAX reference (NCHW, matches the PyTorch module).
    def gn_ref(t, g, b):
        Bn, Cn, Hn, Wn = t.shape
        tg = t.reshape(Bn, G, Cn // G, Hn, Wn)
        mean = tg.mean(axis=(2, 3, 4), keepdims=True)
        var = ((tg - mean) ** 2).mean(axis=(2, 3, 4), keepdims=True)
        tn = (tg - mean) / jnp.sqrt(var + EPS)
        return (tn.reshape(Bn, Cn, Hn, Wn) * g.reshape(1, Cn, 1, 1)
                + b.reshape(1, Cn, 1, 1))

    def conv_ref(t, w):
        return jax.lax.conv_general_dilated(
            t, w, (1, 1), "SAME", dimension_numbers=("NCHW", "OIHW", "NCHW"))

    y_ref = gn_ref(jax.nn.relu(conv_ref(z, w1)), g1, b1)
    ref = gn_ref(jax.nn.relu(z + gn_ref(x + conv_ref(y_ref, w2), g2, b2)), g3, b3)

    # f32 MXU operands: tight check (all generations).
    out_f32 = jax.block_until_ready(
        resnet_layer(z, x, w1, w2, g1, b1, g2, b2, g3, b3,
                     num_groups=G, mxu_dtype=jnp.float32))
    err_f32 = float(jnp.max(jnp.abs(out_f32 - ref)))
    assert jnp.allclose(out_f32, ref, atol=2e-3, rtol=2e-3), \
        f"f32 path max abs err {err_f32}"

    # bf16 MXU operands (v6e/v7x fast path, f32 accumulation): per the review,
    # max-abs error grows toward the few-1e-3 level, so use a looser tolerance.
    out_bf16 = jax.block_until_ready(
        resnet_layer(z, x, w1, w2, g1, b1, g2, b2, g3, b3,
                     num_groups=G, mxu_dtype=jnp.bfloat16))
    err_bf16 = float(jnp.max(jnp.abs(out_bf16 - ref)))
    assert jnp.allclose(out_bf16, ref, atol=1e-2, rtol=1e-2), \
        f"bf16 path max abs err {err_bf16}"

    print("KERNEL_OK")
</pallas_src>

<mosaic_0001>
module attributes {stable_mosaic.version = 11 : i64} {
  func.func @resnet_layer_kernel(%arg0: i32, %arg1: memref<8x1024xf32, #tpu.memory_space<vmem>>, %arg2: memref<8x1024xf32, #tpu.memory_space<vmem>>, %arg3: memref<16x72xf32, #tpu.memory_space<vmem>>, %arg4: memref<8x144xf32, #tpu.memory_space<vmem>>, %arg5: memref<16x8xf32, #tpu.memory_space<vmem>>, %arg6: memref<9x1024xf32, #tpu.memory_space<vmem>>, %arg7: memref<16x16xf32, #tpu.memory_space<vmem>>, %arg8: memref<8x8xf32, #tpu.memory_space<vmem>>, %arg9: memref<8x1024xf32, #tpu.memory_space<vmem>>) attributes {dimension_semantics = [#tpu.dimension_semantics<parallel>], iteration_bounds = array<i64: 2>, scalar_prefetch = 0 : i64, scratch_operands = 0 : i64, tpu.core_type = #tpu.core_type<tc>, window_params = [{transform_indices = @transform_0, window_bounds = array<i64: 8, 1024>}, {transform_indices = @transform_1, window_bounds = array<i64: 8, 1024>}, {pipeline_mode = #tpu.pipeline_mode<synchronous>, transform_indices = @transform_2, window_bounds = array<i64: 16, 72>}, {pipeline_mode = #tpu.pipeline_mode<synchronous>, transform_indices = @transform_3, window_bounds = array<i64: 8, 144>}, {pipeline_mode = #tpu.pipeline_mode<synchronous>, transform_indices = @transform_4, window_bounds = array<i64: 16, 8>}, {transform_indices = @transform_5, window_bounds = array<i64: 9, 1024>}, {pipeline_mode = #tpu.pipeline_mode<synchronous>, transform_indices = @transform_6, window_bounds = array<i64: 16, 16>}, {pipeline_mode = #tpu.pipeline_mode<synchronous>, transform_indices = @transform_7, window_bounds = array<i64: 8, 8>}, {transform_indices = @transform_8, window_bounds = array<i64: 8, 1024>}]} {
    %c0 = arith.constant 0 : index
    %c0_0 = arith.constant 0 : index
    %0 = vector.load %arg1[%c0, %c0_0] : memref<8x1024xf32, #tpu.memory_space<vmem>>, vector<8x1024xf32>
    %c0_1 = arith.constant 0 : index
    %c0_2 = arith.constant 0 : index
    %1 = vector.load %arg2[%c0_1, %c0_2] : memref<8x1024xf32, #tpu.memory_space<vmem>>, vector<8x1024xf32>
    %c0_3 = arith.constant 0 : index
    %c0_4 = arith.constant 0 : index
    %2 = vector.load %arg6[%c0_3, %c0_4] : memref<9x1024xf32, #tpu.memory_space<vmem>>, vector<9x1024xf32>
    %c0_5 = arith.constant 0 : index
    %c0_6 = arith.constant 0 : index
    %3 = vector.load %arg5[%c0_5, %c0_6] : memref<16x8xf32, #tpu.memory_space<vmem>>, vector<16x8xf32>
    %4 = vector.extract_strided_slice %3 {offsets = [0, 0], sizes = [16, 1], strides = [1, 1]} : vector<16x8xf32> to vector<16x1xf32>
    %5 = vector.extract_strided_slice %3 {offsets = [0, 1], sizes = [16, 1], strides = [1, 1]} : vector<16x8xf32> to vector<16x1xf32>
    %6 = vector.extract_strided_slice %3 {offsets = [0, 2], sizes = [8, 1], strides = [1, 1]} : vector<16x8xf32> to vector<8x1xf32>
    %7 = vector.extract_strided_slice %3 {offsets = [0, 3], sizes = [8, 1], strides = [1, 1]} : vector<16x8xf32> to vector<8x1xf32>
    %8 = vector.extract_strided_slice %3 {offsets = [0, 4], sizes = [8, 1], strides = [1, 1]} : vector<16x8xf32> to vector<8x1xf32>
    %9 = vector.extract_strided_slice %3 {offsets = [0, 5], sizes = [8, 1], strides = [1, 1]} : vector<16x8xf32> to vector<8x1xf32>
    %c0_7 = arith.constant 0 : index
    %c0_8 = arith.constant 0 : index
    %10 = vector.load %arg7[%c0_7, %c0_8] : memref<16x16xf32, #tpu.memory_space<vmem>>, vector<16x16xf32>
    %c0_9 = arith.constant 0 : index
    %c0_10 = arith.constant 0 : index
    %11 = vector.load %arg3[%c0_9, %c0_10] : memref<16x72xf32, #tpu.memory_space<vmem>>, vector<16x72xf32>
    %c17_i32 = arith.constant 17 : i32
    %12 = tpu.dynamic_rotate %0 by %c17_i32 dim 1 : vector<8x1024xf32>, i32 -> vector<8x1024xf32>
    %13 = vector.extract_strided_slice %2 {offsets = [0, 0], sizes = [1, 1024], strides = [1, 1]} : vector<9x1024xf32> to vector<1x1024xf32>
    %14 = vector.broadcast %13 : vector<1x1024xf32> to vector<8x1024xf32>
    %15 = arith.mulf %12, %14 : vector<8x1024xf32>
    %c16_i32 = arith.constant 16 : i32
    %16 = tpu.dynamic_rotate %0 by %c16_i32 dim 1 : vector<8x1024xf32>, i32 -> vector<8x1024xf32>
    %17 = vector.extract_strided_slice %2 {offsets = [1, 0], sizes = [1, 1024], strides = [1, 1]} : vector<9x1024xf32> to vector<1x1024xf32>
    %18 = vector.broadcast %17 : vector<1x1024xf32> to vector<8x1024xf32>
    %19 = arith.mulf %16, %18 : vector<8x1024xf32>
    %c15_i32 = arith.constant 15 : i32
    %20 = tpu.dynamic_rotate %0 by %c15_i32 dim 1 : vector<8x1024xf32>, i32 -> vector<8x1024xf32>
    %21 = vector.extract_strided_slice %2 {offsets = [2, 0], sizes = [1, 1024], strides = [1, 1]} : vector<9x1024xf32> to vector<1x1024xf32>
    %22 = vector.broadcast %21 : vector<1x1024xf32> to vector<8x1024xf32>
    %23 = arith.mulf %20, %22 : vector<8x1024xf32>
    %c1_i32 = arith.constant 1 : i32
    %24 = tpu.dynamic_rotate %0 by %c1_i32 dim 1 : vector<8x1024xf32>, i32 -> vector<8x1024xf32>
    %25 = vector.extract_strided_slice %2 {offsets = [3, 0], sizes = [1, 1024], strides = [1, 1]} : vector<9x1024xf32> to vector<1x1024xf32>
    %26 = vector.broadcast %25 : vector<1x1024xf32> to vector<8x1024xf32>
    %27 = arith.mulf %24, %26 : vector<8x1024xf32>
    %c1023_i32 = arith.constant 1023 : i32
    %28 = tpu.dynamic_rotate %0 by %c1023_i32 dim 1 : vector<8x1024xf32>, i32 -> vector<8x1024xf32>
    %29 = vector.extract_strided_slice %2 {offsets = [5, 0], sizes = [1, 1024], strides = [1, 1]} : vector<9x1024xf32> to vector<1x1024xf32>
    %30 = vector.broadcast %29 : vector<1x1024xf32> to vector<8x1024xf32>
    %31 = arith.mulf %28, %30 : vector<8x1024xf32>
    %c1009_i32 = arith.constant 1009 : i32
    %32 = tpu.dynamic_rotate %0 by %c1009_i32 dim 1 : vector<8x1024xf32>, i32 -> vector<8x1024xf32>
    %33 = vector.extract_strided_slice %2 {offsets = [6, 0], sizes = [1, 1024], strides = [1, 1]} : vector<9x1024xf32> to vector<1x1024xf32>
    %34 = vector.broadcast %33 : vector<1x1024xf32> to vector<8x1024xf32>
    %35 = arith.mulf %32, %34 : vector<8x1024xf32>
    %c1008_i32 = arith.constant 1008 : i32
    %36 = tpu.dynamic_rotate %0 by %c1008_i32 dim 1 : vector<8x1024xf32>, i32 -> vector<8x1024xf32>
    %37 = vector.extract_strided_slice %2 {offsets = [7, 0], sizes = [1, 1024], strides = [1, 1]} : vector<9x1024xf32> to vector<1x1024xf32>
    %38 = vector.broadcast %37 : vector<1x1024xf32> to vector<8x1024xf32>
    %39 = arith.mulf %36, %38 : vector<8x1024xf32>
    %c1007_i32 = arith.constant 1007 : i32
    %40 = tpu.dynamic_rotate %0 by %c1007_i32 dim 1 : vector<8x1024xf32>, i32 -> vector<8x1024xf32>
    %41 = vector.extract_strided_slice %2 {offsets = [8, 0], sizes = [1, 1024], strides = [1, 1]} : vector<9x1024xf32> to vector<1x1024xf32>
    %42 = vector.broadcast %41 : vector<1x1024xf32> to vector<8x1024xf32>
    %43 = arith.mulf %40, %42 : vector<8x1024xf32>
    %44 = tpu.concatenate %15, %19, %23, %27, %0, %31, %35, %39, %43 in 0 : vector<8x1024xf32>, vector<8x1024xf32>, vector<8x1024xf32>, vector<8x1024xf32>, vector<8x1024xf32>, vector<8x1024xf32>, vector<8x1024xf32>, vector<8x1024xf32>, vector<8x1024xf32> -> vector<72x1024xf32>
    %cst = arith.constant dense<0.000000e+00> : vector<16x1024xf32>
    %45 = tpu.matmul %11, %44, %cst {dimension_numbers = #tpu.dot_dimension_numbers<[1], [0], [0], [1], [0, 0, 1, 1], [], []>} : vector<16x72xf32>, vector<72x1024xf32>, vector<16x1024xf32> -> vector<16x1024xf32>
    %cst_11 = arith.constant 0.000000e+00 : f32
    %46 = vector.broadcast %cst_11 : f32 to vector<16x1024xf32>
    %47 = arith.maximumf %45, %46 : vector<16x1024xf32>
    %48 = vector.extract_strided_slice %47 {offsets = [0, 0], sizes = [16, 256], strides = [1, 1]} : vector<16x1024xf32> to vector<16x256xf32>
    %cst_12 = arith.constant dense<0.000000e+00> : vector<16xf32>
    %49 = vector.multi_reduction <add>, %48, %cst_12 [1] : vector<16x256xf32> to vector<16xf32>
    %50 = vector.shape_cast %49 : vector<16xf32> to vector<16x1xf32>
    %51 = vector.extract_strided_slice %47 {offsets = [0, 256], sizes = [16, 256], strides = [1, 1]} : vector<16x1024xf32> to vector<16x256xf32>
    %cst_13 = arith.constant dense<0.000000e+00> : vector<16xf32>
    %52 = vector.multi_reduction <add>, %51, %cst_13 [1] : vector<16x256xf32> to vector<16xf32>
    %53 = vector.shape_cast %52 : vector<16xf32> to vector<16x1xf32>
    %54 = vector.extract_strided_slice %47 {offsets = [0, 512], sizes = [16, 256], strides = [1, 1]} : vector<16x1024xf32> to vector<16x256xf32>
    %cst_14 = arith.constant dense<0.000000e+00> : vector<16xf32>
    %55 = vector.multi_reduction <add>, %54, %cst_14 [1] : vector<16x256xf32> to vector<16xf32>
    %56 = vector.shape_cast %55 : vector<16xf32> to vector<16x1xf32>
    %57 = vector.extract_strided_slice %47 {offsets = [0, 768], sizes = [16, 256], strides = [1, 1]} : vector<16x1024xf32> to vector<16x256xf32>
    %cst_15 = arith.constant dense<0.000000e+00> : vector<16xf32>
    %58 = vector.multi_reduction <add>, %57, %cst_15 [1] : vector<16x256xf32> to vector<16xf32>
    %59 = vector.shape_cast %58 : vector<16xf32> to vector<16x1xf32>
    %60 = tpu.concatenate %50, %53, %56, %59 in 1 : vector<16x1xf32>, vector<16x1xf32>, vector<16x1xf32>, vector<16x1xf32> -> vector<16x4xf32>
    %cst_16 = arith.constant dense<0.000000e+00> : vector<16x4xf32>
    %61 = tpu.matmul %10, %60, %cst_16 {dimension_numbers = #tpu.dot_dimension_numbers<[1], [0], [0], [1], [0, 0, 1, 1], [], []>} : vector<16x16xf32>, vector<16x4xf32>, vector<16x4xf32> -> vector<16x4xf32>
    %cst_17 = arith.constant 0.001953125 : f32
    %62 = vector.broadcast %cst_17 : f32 to vector<16x4xf32>
    %63 = arith.mulf %61, %62 : vector<16x4xf32>
    %64 = vector.extract_strided_slice %47 {offsets = [0, 0], sizes = [16, 256], strides = [1, 1]} : vector<16x1024xf32> to vector<16x256xf32>
    %65 = vector.extract_strided_slice %63 {offsets = [0, 0], sizes = [16, 1], strides = [1, 1]} : vector<16x4xf32> to vector<16x1xf32>
    %66 = vector.broadcast %65 : vector<16x1xf32> to vector<16x256xf32>
    %67 = arith.subf %64, %66 : vector<16x256xf32>
    %68 = arith.mulf %67, %67 : vector<16x256xf32>
    %cst_18 = arith.constant dense<0.000000e+00> : vector<16xf32>
    %69 = vector.multi_reduction <add>, %68, %cst_18 [1] : vector<16x256xf32> to vector<16xf32>
    %70 = vector.shape_cast %69 : vector<16xf32> to vector<16x1xf32>
    %71 = vector.extract_strided_slice %47 {offsets = [0, 256], sizes = [16, 256], strides = [1, 1]} : vector<16x1024xf32> to vector<16x256xf32>
    %72 = vector.extract_strided_slice %63 {offsets = [0, 1], sizes = [16, 1], strides = [1, 1]} : vector<16x4xf32> to vector<16x1xf32>
    %73 = vector.broadcast %72 : vector<16x1xf32> to vector<16x256xf32>
    %74 = arith.subf %71, %73 : vector<16x256xf32>
    %75 = arith.mulf %74, %74 : vector<16x256xf32>
    %cst_19 = arith.constant dense<0.000000e+00> : vector<16xf32>
    %76 = vector.multi_reduction <add>, %75, %cst_19 [1] : vector<16x256xf32> to vector<16xf32>
    %77 = vector.shape_cast %76 : vector<16xf32> to vector<16x1xf32>
    %78 = vector.extract_strided_slice %47 {offsets = [0, 512], sizes = [16, 256], strides = [1, 1]} : vector<16x1024xf32> to vector<16x256xf32>
    %79 = vector.extract_strided_slice %63 {offsets = [0, 2], sizes = [16, 1], strides = [1, 1]} : vector<16x4xf32> to vector<16x1xf32>
    %80 = vector.broadcast %79 : vector<16x1xf32> to vector<16x256xf32>
    %81 = arith.subf %78, %80 : vector<16x256xf32>
    %82 = arith.mulf %81, %81 : vector<16x256xf32>
    %cst_20 = arith.constant dense<0.000000e+00> : vector<16xf32>
    %83 = vector.multi_reduction <add>, %82, %cst_20 [1] : vector<16x256xf32> to vector<16xf32>
    %84 = vector.shape_cast %83 : vector<16xf32> to vector<16x1xf32>
    %85 = vector.extract_strided_slice %47 {offsets = [0, 768], sizes = [16, 256], strides = [1, 1]} : vector<16x1024xf32> to vector<16x256xf32>
    %86 = vector.extract_strided_slice %63 {offsets = [0, 3], sizes = [16, 1], strides = [1, 1]} : vector<16x4xf32> to vector<16x1xf32>
    %87 = vector.broadcast %86 : vector<16x1xf32> to vector<16x256xf32>
    %88 = arith.subf %85, %87 : vector<16x256xf32>
    %89 = arith.mulf %88, %88 : vector<16x256xf32>
    %cst_21 = arith.constant dense<0.000000e+00> : vector<16xf32>
    %90 = vector.multi_reduction <add>, %89, %cst_21 [1] : vector<16x256xf32> to vector<16xf32>
    %91 = vector.shape_cast %90 : vector<16xf32> to vector<16x1xf32>
    %92 = tpu.concatenate %70, %77, %84, %91 in 1 : vector<16x1xf32>, vector<16x1xf32>, vector<16x1xf32>, vector<16x1xf32> -> vector<16x4xf32>
    %cst_22 = arith.constant dense<0.000000e+00> : vector<16x4xf32>
    %93 = tpu.matmul %10, %92, %cst_22 {dimension_numbers = #tpu.dot_dimension_numbers<[1], [0], [0], [1], [0, 0, 1, 1], [], []>} : vector<16x16xf32>, vector<16x4xf32>, vector<16x4xf32> -> vector<16x4xf32>
    %cst_23 = arith.constant 0.001953125 : f32
    %94 = vector.broadcast %cst_23 : f32 to vector<16x4xf32>
    %95 = arith.mulf %93, %94 : vector<16x4xf32>
    %cst_24 = arith.constant 9.99999974E-6 : f32
    %96 = vector.broadcast %cst_24 : f32 to vector<16x4xf32>
    %97 = arith.addf %95, %96 : vector<16x4xf32>
    %98 = math.rsqrt %97 : vector<16x4xf32>
    %99 = vector.broadcast %4 : vector<16x1xf32> to vector<16x4xf32>
    %100 = arith.mulf %98, %99 : vector<16x4xf32>
    %101 = vector.extract_strided_slice %100 {offsets = [0, 0], sizes = [16, 1], strides = [1, 1]} : vector<16x4xf32> to vector<16x1xf32>
    %102 = vector.broadcast %101 : vector<16x1xf32> to vector<16x256xf32>
    %103 = arith.mulf %67, %102 : vector<16x256xf32>
    %104 = vector.broadcast %5 : vector<16x1xf32> to vector<16x256xf32>
    %105 = arith.addf %103, %104 : vector<16x256xf32>
    %106 = vector.extract_strided_slice %100 {offsets = [0, 1], sizes = [16, 1], strides = [1, 1]} : vector<16x4xf32> to vector<16x1xf32>
    %107 = vector.broadcast %106 : vector<16x1xf32> to vector<16x256xf32>
    %108 = arith.mulf %74, %107 : vector<16x256xf32>
    %109 = vector.broadcast %5 : vector<16x1xf32> to vector<16x256xf32>
    %110 = arith.addf %108, %109 : vector<16x256xf32>
    %111 = vector.extract_strided_slice %100 {offsets = [0, 2], sizes = [16, 1], strides = [1, 1]} : vector<16x4xf32> to vector<16x1xf32>
    %112 = vector.broadcast %111 : vector<16x1xf32> to vector<16x256xf32>
    %113 = arith.mulf %81, %112 : vector<16x256xf32>
    %114 = vector.broadcast %5 : vector<16x1xf32> to vector<16x256xf32>
    %115 = arith.addf %113, %114 : vector<16x256xf32>
    %116 = vector.extract_strided_slice %100 {offsets = [0, 3], sizes = [16, 1], strides = [1, 1]} : vector<16x4xf32> to vector<16x1xf32>
    %117 = vector.broadcast %116 : vector<16x1xf32> to vector<16x256xf32>
    %118 = arith.mulf %88, %117 : vector<16x256xf32>
    %119 = vector.broadcast %5 : vector<16x1xf32> to vector<16x256xf32>
    %120 = arith.addf %118, %119 : vector<16x256xf32>
    %121 = tpu.concatenate %105, %110, %115, %120 in 1 : vector<16x256xf32>, vector<16x256xf32>, vector<16x256xf32>, vector<16x256xf32> -> vector<16x1024xf32>
    %c0_25 = arith.constant 0 : index
    %c0_26 = arith.constant 0 : index
    %122 = vector.load %arg4[%c0_25, %c0_26] : memref<8x144xf32, #tpu.memory_space<vmem>>, vector<8x144xf32>
    %c17_i32_27 = arith.constant 17 : i32
    %123 = tpu.dynamic_rotate %121 by %c17_i32_27 dim 1 : vector<16x1024xf32>, i32 -> vector<16x1024xf32>
    %124 = vector.extract_strided_slice %2 {offsets = [0, 0], sizes = [1, 1024], strides = [1, 1]} : vector<9x1024xf32> to vector<1x1024xf32>
    %125 = vector.broadcast %124 : vector<1x1024xf32> to vector<16x1024xf32>
    %126 = arith.mulf %123, %125 : vector<16x1024xf32>
    %c16_i32_28 = arith.constant 16 : i32
    %127 = tpu.dynamic_rotate %121 by %c16_i32_28 dim 1 : vector<16x1024xf32>, i32 -> vector<16x1024xf32>
    %128 = vector.extract_strided_slice %2 {offsets = [1, 0], sizes = [1, 1024], strides = [1, 1]} : vector<9x1024xf32> to vector<1x1024xf32>
    %129 = vector.broadcast %128 : vector<1x1024xf32> to vector<16x1024xf32>
    %130 = arith.mulf %127, %129 : vector<16x1024xf32>
    %c15_i32_29 = arith.constant 15 : i32
    %131 = tpu.dynamic_rotate %121 by %c15_i32_29 dim 1 : vector<16x1024xf32>, i32 -> vector<16x1024xf32>
    %132 = vector.extract_strided_slice %2 {offsets = [2, 0], sizes = [1, 1024], strides = [1, 1]} : vector<9x1024xf32> to vector<1x1024xf32>
    %133 = vector.broadcast %132 : vector<1x1024xf32> to vector<16x1024xf32>
    %134 = arith.mulf %131, %133 : vector<16x1024xf32>
    %c1_i32_30 = arith.constant 1 : i32
    %135 = tpu.dynamic_rotate %121 by %c1_i32_30 dim 1 : vector<16x1024xf32>, i32 -> vector<16x1024xf32>
    %136 = vector.extract_strided_slice %2 {offsets = [3, 0], sizes = [1, 1024], strides = [1, 1]} : vector<9x1024xf32> to vector<1x1024xf32>
    %137 = vector.broadcast %136 : vector<1x1024xf32> to vector<16x1024xf32>
    %138 = arith.mulf %135, %137 : vector<16x1024xf32>
    %c1023_i32_31 = arith.constant 1023 : i32
    %139 = tpu.dynamic_rotate %121 by %c1023_i32_31 dim 1 : vector<16x1024xf32>, i32 -> vector<16x1024xf32>
    %140 = vector.extract_strided_slice %2 {offsets = [5, 0], sizes = [1, 1024], strides = [1, 1]} : vector<9x1024xf32> to vector<1x1024xf32>
    %141 = vector.broadcast %140 : vector<1x1024xf32> to vector<16x1024xf32>
    %142 = arith.mulf %139, %141 : vector<16x1024xf32>
    %c1009_i32_32 = arith.constant 1009 : i32
    %143 = tpu.dynamic_rotate %121 by %c1009_i32_32 dim 1 : vector<16x1024xf32>, i32 -> vector<16x1024xf32>
    %144 = vector.extract_strided_slice %2 {offsets = [6, 0], sizes = [1, 1024], strides = [1, 1]} : vector<9x1024xf32> to vector<1x1024xf32>
    %145 = vector.broadcast %144 : vector<1x1024xf32> to vector<16x1024xf32>
    %146 = arith.mulf %143, %145 : vector<16x1024xf32>
    %c1008_i32_33 = arith.constant 1008 : i32
    %147 = tpu.dynamic_rotate %121 by %c1008_i32_33 dim 1 : vector<16x1024xf32>, i32 -> vector<16x1024xf32>
    %148 = vector.extract_strided_slice %2 {offsets = [7, 0], sizes = [1, 1024], strides = [1, 1]} : vector<9x1024xf32> to vector<1x1024xf32>
    %149 = vector.broadcast %148 : vector<1x1024xf32> to vector<16x1024xf32>
    %150 = arith.mulf %147, %149 : vector<16x1024xf32>
    %c1007_i32_34 = arith.constant 1007 : i32
    %151 = tpu.dynamic_rotate %121 by %c1007_i32_34 dim 1 : vector<16x1024xf32>, i32 -> vector<16x1024xf32>
    %152 = vector.extract_strided_slice %2 {offsets = [8, 0], sizes = [1, 1024], strides = [1, 1]} : vector<9x1024xf32> to vector<1x1024xf32>
    %153 = vector.broadcast %152 : vector<1x1024xf32> to vector<16x1024xf32>
    %154 = arith.mulf %151, %153 : vector<16x1024xf32>
    %155 = tpu.concatenate %126, %130, %134, %138, %121, %142, %146, %150, %154 in 0 : vector<16x1024xf32>, vector<16x1024xf32>, vector<16x1024xf32>, vector<16x1024xf32>, vector<16x1024xf32>, vector<16x1024xf32>, vector<16x1024xf32>, vector<16x1024xf32>, vector<16x1024xf32> -> vector<144x1024xf32>
    %cst_35 = arith.constant dense<0.000000e+00> : vector<8x1024xf32>
    %156 = tpu.matmul %122, %155, %cst_35 {dimension_numbers = #tpu.dot_dimension_numbers<[1], [0], [0], [1], [0, 0, 1, 1], [], []>} : vector<8x144xf32>, vector<144x1024xf32>, vector<8x1024xf32> -> vector<8x1024xf32>
    %157 = arith.addf %1, %156 : vector<8x1024xf32>
    %158 = vector.extract_strided_slice %157 {offsets = [0, 0], sizes = [8, 256], strides = [1, 1]} : vector<8x1024xf32> to vector<8x256xf32>
    %cst_36 = arith.constant dense<0.000000e+00> : vector<8xf32>
    %159 = vector.multi_reduction <add>, %158, %cst_36 [1] : vector<8x256xf32> to vector<8xf32>
    %160 = vector.shape_cast %159 : vector<8xf32> to vector<8x1xf32>
    %161 = vector.extract_strided_slice %157 {offsets = [0, 256], sizes = [8, 256], strides = [1, 1]} : vector<8x1024xf32> to vector<8x256xf32>
    %cst_37 = arith.constant dense<0.000000e+00> : vector<8xf32>
    %162 = vector.multi_reduction <add>, %161, %cst_37 [1] : vector<8x256xf32> to vector<8xf32>
    %163 = vector.shape_cast %162 : vector<8xf32> to vector<8x1xf32>
    %164 = vector.extract_strided_slice %157 {offsets = [0, 512], sizes = [8, 256], strides = [1, 1]} : vector<8x1024xf32> to vector<8x256xf32>
    %cst_38 = arith.constant dense<0.000000e+00> : vector<8xf32>
    %165 = vector.multi_reduction <add>, %164, %cst_38 [1] : vector<8x256xf32> to vector<8xf32>
    %166 = vector.shape_cast %165 : vector<8xf32> to vector<8x1xf32>
    %167 = vector.extract_strided_slice %157 {offsets = [0, 768], sizes = [8, 256], strides = [1, 1]} : vector<8x1024xf32> to vector<8x256xf32>
    %cst_39 = arith.constant dense<0.000000e+00> : vector<8xf32>
    %168 = vector.multi_reduction <add>, %167, %cst_39 [1] : vector<8x256xf32> to vector<8xf32>
    %169 = vector.shape_cast %168 : vector<8xf32> to vector<8x1xf32>
    %170 = tpu.concatenate %160, %163, %166, %169 in 1 : vector<8x1xf32>, vector<8x1xf32>, vector<8x1xf32>, vector<8x1xf32> -> vector<8x4xf32>
    %cst_40 = arith.constant 3.906250e-03 : f32
    %171 = vector.broadcast %cst_40 : f32 to vector<8x4xf32>
    %172 = arith.mulf %170, %171 : vector<8x4xf32>
    %173 = vector.extract_strided_slice %157 {offsets = [0, 0], sizes = [8, 256], strides = [1, 1]} : vector<8x1024xf32> to vector<8x256xf32>
    %174 = vector.extract_strided_slice %172 {offsets = [0, 0], sizes = [8, 1], strides = [1, 1]} : vector<8x4xf32> to vector<8x1xf32>
    %175 = vector.broadcast %174 : vector<8x1xf32> to vector<8x256xf32>
    %176 = arith.subf %173, %175 : vector<8x256xf32>
    %177 = arith.mulf %176, %176 : vector<8x256xf32>
    %cst_41 = arith.constant dense<0.000000e+00> : vector<8xf32>
    %178 = vector.multi_reduction <add>, %177, %cst_41 [1] : vector<8x256xf32> to vector<8xf32>
    %179 = vector.shape_cast %178 : vector<8xf32> to vector<8x1xf32>
    %180 = vector.extract_strided_slice %157 {offsets = [0, 256], sizes = [8, 256], strides = [1, 1]} : vector<8x1024xf32> to vector<8x256xf32>
    %181 = vector.extract_strided_slice %172 {offsets = [0, 1], sizes = [8, 1], strides = [1, 1]} : vector<8x4xf32> to vector<8x1xf32>
    %182 = vector.broadcast %181 : vector<8x1xf32> to vector<8x256xf32>
    %183 = arith.subf %180, %182 : vector<8x256xf32>
    %184 = arith.mulf %183, %183 : vector<8x256xf32>
    %cst_42 = arith.constant dense<0.000000e+00> : vector<8xf32>
    %185 = vector.multi_reduction <add>, %184, %cst_42 [1] : vector<8x256xf32> to vector<8xf32>
    %186 = vector.shape_cast %185 : vector<8xf32> to vector<8x1xf32>
    %187 = vector.extract_strided_slice %157 {offsets = [0, 512], sizes = [8, 256], strides = [1, 1]} : vector<8x1024xf32> to vector<8x256xf32>
    %188 = vector.extract_strided_slice %172 {offsets = [0, 2], sizes = [8, 1], strides = [1, 1]} : vector<8x4xf32> to vector<8x1xf32>
    %189 = vector.broadcast %188 : vector<8x1xf32> to vector<8x256xf32>
    %190 = arith.subf %187, %189 : vector<8x256xf32>
    %191 = arith.mulf %190, %190 : vector<8x256xf32>
    %cst_43 = arith.constant dense<0.000000e+00> : vector<8xf32>
    %192 = vector.multi_reduction <add>, %191, %cst_43 [1] : vector<8x256xf32> to vector<8xf32>
    %193 = vector.shape_cast %192 : vector<8xf32> to vector<8x1xf32>
    %194 = vector.extract_strided_slice %157 {offsets = [0, 768], sizes = [8, 256], strides = [1, 1]} : vector<8x1024xf32> to vector<8x256xf32>
    %195 = vector.extract_strided_slice %172 {offsets = [0, 3], sizes = [8, 1], strides = [1, 1]} : vector<8x4xf32> to vector<8x1xf32>
    %196 = vector.broadcast %195 : vector<8x1xf32> to vector<8x256xf32>
    %197 = arith.subf %194, %196 : vector<8x256xf32>
    %198 = arith.mulf %197, %197 : vector<8x256xf32>
    %cst_44 = arith.constant dense<0.000000e+00> : vector<8xf32>
    %199 = vector.multi_reduction <add>, %198, %cst_44 [1] : vector<8x256xf32> to vector<8xf32>
    %200 = vector.shape_cast %199 : vector<8xf32> to vector<8x1xf32>
    %201 = tpu.concatenate %179, %186, %193, %200 in 1 : vector<8x1xf32>, vector<8x1xf32>, vector<8x1xf32>, vector<8x1xf32> -> vector<8x4xf32>
    %cst_45 = arith.constant 3.906250e-03 : f32
    %202 = vector.broadcast %cst_45 : f32 to vector<8x4xf32>
    %203 = arith.mulf %201, %202 : vector<8x4xf32>
    %cst_46 = arith.constant 9.99999974E-6 : f32
    %204 = vector.broadcast %cst_46 : f32 to vector<8x4xf32>
    %205 = arith.addf %203, %204 : vector<8x4xf32>
    %206 = math.rsqrt %205 : vector<8x4xf32>
    %207 = vector.broadcast %6 : vector<8x1xf32> to vector<8x4xf32>
    %208 = arith.mulf %206, %207 : vector<8x4xf32>
    %209 = vector.extract_strided_slice %208 {offsets = [0, 0], sizes = [8, 1], strides = [1, 1]} : vector<8x4xf32> to vector<8x1xf32>
    %210 = vector.broadcast %209 : vector<8x1xf32> to vector<8x256xf32>
    %211 = arith.mulf %176, %210 : vector<8x256xf32>
    %212 = vector.broadcast %7 : vector<8x1xf32> to vector<8x256xf32>
    %213 = arith.addf %211, %212 : vector<8x256xf32>
    %214 = vector.extract_strided_slice %208 {offsets = [0, 1], sizes = [8, 1], strides = [1, 1]} : vector<8x4xf32> to vector<8x1xf32>
    %215 = vector.broadcast %214 : vector<8x1xf32> to vector<8x256xf32>
    %216 = arith.mulf %183, %215 : vector<8x256xf32>
    %217 = vector.broadcast %7 : vector<8x1xf32> to vector<8x256xf32>
    %218 = arith.addf %216, %217 : vector<8x256xf32>
    %219 = vector.extract_strided_slice %208 {offsets = [0, 2], sizes = [8, 1], strides = [1, 1]} : vector<8x4xf32> to vector<8x1xf32>
    %220 = vector.broadcast %219 : vector<8x1xf32> to vector<8x256xf32>
    %221 = arith.mulf %190, %220 : vector<8x256xf32>
    %222 = vector.broadcast %7 : vector<8x1xf32> to vector<8x256xf32>
    %223 = arith.addf %221, %222 : vector<8x256xf32>
    %224 = vector.extract_strided_slice %208 {offsets = [0, 3], sizes = [8, 1], strides = [1, 1]} : vector<8x4xf32> to vector<8x1xf32>
    %225 = vector.broadcast %224 : vector<8x1xf32> to vector<8x256xf32>
    %226 = arith.mulf %197, %225 : vector<8x256xf32>
    %227 = vector.broadcast %7 : vector<8x1xf32> to vector<8x256xf32>
    %228 = arith.addf %226, %227 : vector<8x256xf32>
    %229 = tpu.concatenate %213, %218, %223, %228 in 1 : vector<8x256xf32>, vector<8x256xf32>, vector<8x256xf32>, vector<8x256xf32> -> vector<8x1024xf32>
    %230 = arith.addf %0, %229 : vector<8x1024xf32>
    %cst_47 = arith.constant 0.000000e+00 : f32
    %231 = vector.broadcast %cst_47 : f32 to vector<8x1024xf32>
    %232 = arith.maximumf %230, %231 : vector<8x1024xf32>
    %233 = vector.extract_strided_slice %232 {offsets = [0, 0], sizes = [8, 256], strides = [1, 1]} : vector<8x1024xf32> to vector<8x256xf32>
    %cst_48 = arith.constant dense<0.000000e+00> : vector<8xf32>
    %234 = vector.multi_reduction <add>, %233, %cst_48 [1] : vector<8x256xf32> to vector<8xf32>
    %235 = vector.shape_cast %234 : vector<8xf32> to vector<8x1xf32>
    %236 = vector.extract_strided_slice %232 {offsets = [0, 256], sizes = [8, 256], strides = [1, 1]} : vector<8x1024xf32> to vector<8x256xf32>
    %cst_49 = arith.constant dense<0.000000e+00> : vector<8xf32>
    %237 = vector.multi_reduction <add>, %236, %cst_49 [1] : vector<8x256xf32> to vector<8xf32>
    %238 = vector.shape_cast %237 : vector<8xf32> to vector<8x1xf32>
    %239 = vector.extract_strided_slice %232 {offsets = [0, 512], sizes = [8, 256], strides = [1, 1]} : vector<8x1024xf32> to vector<8x256xf32>
    %cst_50 = arith.constant dense<0.000000e+00> : vector<8xf32>
    %240 = vector.multi_reduction <add>, %239, %cst_50 [1] : vector<8x256xf32> to vector<8xf32>
    %241 = vector.shape_cast %240 : vector<8xf32> to vector<8x1xf32>
    %242 = vector.extract_strided_slice %232 {offsets = [0, 768], sizes = [8, 256], strides = [1, 1]} : vector<8x1024xf32> to vector<8x256xf32>
    %cst_51 = arith.constant dense<0.000000e+00> : vector<8xf32>
    %243 = vector.multi_reduction <add>, %242, %cst_51 [1] : vector<8x256xf32> to vector<8xf32>
    %244 = vector.shape_cast %243 : vector<8xf32> to vector<8x1xf32>
    %245 = tpu.concatenate %235, %238, %241, %244 in 1 : vector<8x1xf32>, vector<8x1xf32>, vector<8x1xf32>, vector<8x1xf32> -> vector<8x4xf32>
    %cst_52 = arith.constant 3.906250e-03 : f32
    %246 = vector.broadcast %cst_52 : f32 to vector<8x4xf32>
    %247 = arith.mulf %245, %246 : vector<8x4xf32>
    %248 = vector.extract_strided_slice %232 {offsets = [0, 0], sizes = [8, 256], strides = [1, 1]} : vector<8x1024xf32> to vector<8x256xf32>
    %249 = vector.extract_strided_slice %247 {offsets = [0, 0], sizes = [8, 1], strides = [1, 1]} : vector<8x4xf32> to vector<8x1xf32>
    %250 = vector.broadcast %249 : vector<8x1xf32> to vector<8x256xf32>
    %251 = arith.subf %248, %250 : vector<8x256xf32>
    %252 = arith.mulf %251, %251 : vector<8x256xf32>
    %cst_53 = arith.constant dense<0.000000e+00> : vector<8xf32>
    %253 = vector.multi_reduction <add>, %252, %cst_53 [1] : vector<8x256xf32> to vector<8xf32>
    %254 = vector.shape_cast %253 : vector<8xf32> to vector<8x1xf32>
    %255 = vector.extract_strided_slice %232 {offsets = [0, 256], sizes = [8, 256], strides = [1, 1]} : vector<8x1024xf32> to vector<8x256xf32>
    %256 = vector.extract_strided_slice %247 {offsets = [0, 1], sizes = [8, 1], strides = [1, 1]} : vector<8x4xf32> to vector<8x1xf32>
    %257 = vector.broadcast %256 : vector<8x1xf32> to vector<8x256xf32>
    %258 = arith.subf %255, %257 : vector<8x256xf32>
    %259 = arith.mulf %258, %258 : vector<8x256xf32>
    %cst_54 = arith.constant dense<0.000000e+00> : vector<8xf32>
    %260 = vector.multi_reduction <add>, %259, %cst_54 [1] : vector<8x256xf32> to vector<8xf32>
    %261 = vector.shape_cast %260 : vector<8xf32> to vector<8x1xf32>
    %262 = vector.extract_strided_slice %232 {offsets = [0, 512], sizes = [8, 256], strides = [1, 1]} : vector<8x1024xf32> to vector<8x256xf32>
    %263 = vector.extract_strided_slice %247 {offsets = [0, 2], sizes = [8, 1], strides = [1, 1]} : vector<8x4xf32> to vector<8x1xf32>
    %264 = vector.broadcast %263 : vector<8x1xf32> to vector<8x256xf32>
    %265 = arith.subf %262, %264 : vector<8x256xf32>
    %266 = arith.mulf %265, %265 : vector<8x256xf32>
    %cst_55 = arith.constant dense<0.000000e+00> : vector<8xf32>
    %267 = vector.multi_reduction <add>, %266, %cst_55 [1] : vector<8x256xf32> to vector<8xf32>
    %268 = vector.shape_cast %267 : vector<8xf32> to vector<8x1xf32>
    %269 = vector.extract_strided_slice %232 {offsets = [0, 768], sizes = [8, 256], strides = [1, 1]} : vector<8x1024xf32> to vector<8x256xf32>
    %270 = vector.extract_strided_slice %247 {offsets = [0, 3], sizes = [8, 1], strides = [1, 1]} : vector<8x4xf32> to vector<8x1xf32>
    %271 = vector.broadcast %270 : vector<8x1xf32> to vector<8x256xf32>
    %272 = arith.subf %269, %271 : vector<8x256xf32>
    %273 = arith.mulf %272, %272 : vector<8x256xf32>
    %cst_56 = arith.constant dense<0.000000e+00> : vector<8xf32>
    %274 = vector.multi_reduction <add>, %273, %cst_56 [1] : vector<8x256xf32> to vector<8xf32>
    %275 = vector.shape_cast %274 : vector<8xf32> to vector<8x1xf32>
    %276 = tpu.concatenate %254, %261, %268, %275 in 1 : vector<8x1xf32>, vector<8x1xf32>, vector<8x1xf32>, vector<8x1xf32> -> vector<8x4xf32>
    %cst_57 = arith.constant 3.906250e-03 : f32
    %277 = vector.broadcast %cst_57 : f32 to vector<8x4xf32>
    %278 = arith.mulf %276, %277 : vector<8x4xf32>
    %cst_58 = arith.constant 9.99999974E-6 : f32
    %279 = vector.broadcast %cst_58 : f32 to vector<8x4xf32>
    %280 = arith.addf %278, %279 : vector<8x4xf32>
    %281 = math.rsqrt %280 : vector<8x4xf32>
    %282 = vector.broadcast %8 : vector<8x1xf32> to vector<8x4xf32>
    %283 = arith.mulf %281, %282 : vector<8x4xf32>
    %284 = vector.extract_strided_slice %283 {offsets = [0, 0], sizes = [8, 1], strides = [1, 1]} : vector<8x4xf32> to vector<8x1xf32>
    %285 = vector.broadcast %284 : vector<8x1xf32> to vector<8x256xf32>
    %286 = arith.mulf %251, %285 : vector<8x256xf32>
    %287 = vector.broadcast %9 : vector<8x1xf32> to vector<8x256xf32>
    %288 = arith.addf %286, %287 : vector<8x256xf32>
    %289 = vector.extract_strided_slice %283 {offsets = [0, 1], sizes = [8, 1], strides = [1, 1]} : vector<8x4xf32> to vector<8x1xf32>
    %290 = vector.broadcast %289 : vector<8x1xf32> to vector<8x256xf32>
    %291 = arith.mulf %258, %290 : vector<8x256xf32>
    %292 = vector.broadcast %9 : vector<8x1xf32> to vector<8x256xf32>
    %293 = arith.addf %291, %292 : vector<8x256xf32>
    %294 = vector.extract_strided_slice %283 {offsets = [0, 2], sizes = [8, 1], strides = [1, 1]} : vector<8x4xf32> to vector<8x1xf32>
    %295 = vector.broadcast %294 : vector<8x1xf32> to vector<8x256xf32>
    %296 = arith.mulf %265, %295 : vector<8x256xf32>
    %297 = vector.broadcast %9 : vector<8x1xf32> to vector<8x256xf32>
    %298 = arith.addf %296, %297 : vector<8x256xf32>
    %299 = vector.extract_strided_slice %283 {offsets = [0, 3], sizes = [8, 1], strides = [1, 1]} : vector<8x4xf32> to vector<8x1xf32>
    %300 = vector.broadcast %299 : vector<8x1xf32> to vector<8x256xf32>
    %301 = arith.mulf %272, %300 : vector<8x256xf32>
    %302 = vector.broadcast %9 : vector<8x1xf32> to vector<8x256xf32>
    %303 = arith.addf %301, %302 : vector<8x256xf32>
    %304 = tpu.concatenate %288, %293, %298, %303 in 1 : vector<8x256xf32>, vector<8x256xf32>, vector<8x256xf32>, vector<8x256xf32> -> vector<8x1024xf32>
    %c0_59 = arith.constant 0 : index
    %c0_60 = arith.constant 0 : index
    %305 = vector.load %arg9[%c0_59, %c0_60] : memref<8x1024xf32, #tpu.memory_space<vmem>>, vector<8x1024xf32>
    tpu.vector_store %arg9[%c0_59, %c0_60], %304 {strides = array<i32>} : memref<8x1024xf32, #tpu.memory_space<vmem>>, vector<8x1024xf32>,
    return
  }
  func.func @transform_0(%arg0: i32) -> (i32, i32) {
    %c0_i32 = arith.constant 0 : i32
    %c0_i32_0 = arith.constant 0 : i32
    return %c0_i32, %arg0 : i32, i32
  }
  func.func @transform_1(%arg0: i32) -> (i32, i32) {
    %c0_i32 = arith.constant 0 : i32
    %c0_i32_0 = arith.constant 0 : i32
    return %c0_i32, %arg0 : i32, i32
  }
  func.func @transform_2(%arg0: i32) -> (i32, i32) {
    %c0_i32 = arith.constant 0 : i32
    %c0_i32_0 = arith.constant 0 : i32
    %c0_i32_1 = arith.constant 0 : i32
    return %c0_i32, %c0_i32_0 : i32, i32
  }
  func.func @transform_3(%arg0: i32) -> (i32, i32) {
    %c0_i32 = arith.constant 0 : i32
    %c0_i32_0 = arith.constant 0 : i32
    %c0_i32_1 = arith.constant 0 : i32
    return %c0_i32, %c0_i32_0 : i32, i32
  }
  func.func @transform_4(%arg0: i32) -> (i32, i32) {
    %c0_i32 = arith.constant 0 : i32
    %c0_i32_0 = arith.constant 0 : i32
    %c0_i32_1 = arith.constant 0 : i32
    return %c0_i32, %c0_i32_0 : i32, i32
  }
  func.func @transform_5(%arg0: i32) -> (i32, i32) {
    %c0_i32 = arith.constant 0 : i32
    %c0_i32_0 = arith.constant 0 : i32
    return %c0_i32, %arg0 : i32, i32
  }
  func.func @transform_6(%arg0: i32) -> (i32, i32) {
    %c0_i32 = arith.constant 0 : i32
    %c0_i32_0 = arith.constant 0 : i32
    %c0_i32_1 = arith.constant 0 : i32
    return %c0_i32, %c0_i32_0 : i32, i32
  }
  func.func @transform_7(%arg0: i32) -> (i32, i32) {
    %c0_i32 = arith.constant 0 : i32
    %c0_i32_0 = arith.constant 0 : i32
    %c0_i32_1 = arith.constant 0 : i32
    return %c0_i32, %c0_i32_0 : i32, i32
  }
  func.func @transform_8(%arg0: i32) -> (i32, i32) {
    %c0_i32 = arith.constant 0 : i32
    %c0_i32_0 = arith.constant 0 : i32
    return %c0_i32, %arg0 : i32, i32
  }
}

</mosaic_0001>

<bundles_post_ra>
// kernel: tpu_custom_call.1
= control target key start
LH: loop header
LB: loop body
LE: loop exit
PB: predicated region body
PF: predicated region fallthrough
CT: control target
= control target key end

     0   :  { %s5604_s0 = inlined_call_operand.hbm [shape: f32[8,2048], index: 0, kind: input, shape index: {}]   ;;  %s5605_s1 = inlined_call_operand.hbm [shape: f32[8,2048], index: 1, kind: input, shape index: {}]   ;;  %s5606_s2 = inlined_call_operand.vmem [shape: f32[16,72], index: 2, kind: input, shape index: {}]   ;;  %s5607_s3 = inlined_call_operand.hbm [shape: f32[8,144], index: 3, kind: input, shape index: {}]   ;;  %s5608_s4 = inlined_call_operand.vmem [shape: f32[16,8], index: 4, kind: input, shape index: {}]   ;;  %s5609_s5 = inlined_call_operand.hbm [shape: f32[9,2048], index: 5, kind: input, shape index: {}]   ;;  %s5610_s6 = inlined_call_operand.hbm [shape: f32[16,16], index: 6, kind: input, shape index: {}]   ;;  %s5611_s7 = inlined_call_operand.vmem [shape: f32[8,8], index: 7, kind: input, shape index: {}]   ;;  %s5612_s8 = inlined_call_operand.hbm [shape: f32[8,2048], index: 8, kind: output, shape index: {}]  }
   0x1   :  { %5801 = sst [smem:[#allocation146_spill]] %s5604_s0 }
   0x2   :  { %5802 = sst [smem:[#allocation147_spill]] %s5607_s3 }
   0x3   :  { %5803 = sst [smem:[#allocation148_spill]] %s5610_s6 }
   0x4   :  { %13 = vsyncpa [#allocation3], 0 }
   0x5   :  { %15 = vsyncpa [#allocation3 + $0x1], 0 }
   0x6   :  { %16 = vsyncpa [#allocation6], 0 }
   0x7   :  { %18 = vsyncpa [#allocation6 + $0x1], 0 }
   0x8   :  { %19 = vsyncpa [#allocation9], 0 }
   0x9   :  { %21 = vsyncpa [#allocation9 + $0x1], 0 }
   0xa   :  { %22 = vsyncpa [#allocation4], 0 }
   0xb   :  { %24 = vsyncpa [#allocation4 + $0x1], 0  ;;  %s3091_s27 = smov 0   ;;  %s3093_s28 = smov 0  }
   0xc   :  { %s3095_s29 = smov 0   ;;  %s3097_s30 = smov 0  }
   0xd LB: > { %5804 = sst [smem:[#allocation18_spill]] %s3019_s29  ;;  %s3112_s7 = sadd.s32 4294967295, %s3023_s30   ;;  %s3023_s30 = sphi %s3097_s30, %s6103_s30   ;;  %s3019_s29 = sphi %s3095_s29, %s6105_s29   ;;  %s3015_s28 = sphi %s3093_s28, %s6107_s28   ;;  %s3011_s27 = sphi %s3091_s27, %s6106_s27  }
   0xe   : > { %s2565_s9 = sadd.s32 4294967294, %s3023_s30   ;;  %p50_p0 = scmp.ne.s32.totalorder %s3015_s28, %s3011_s27 }
   0xf   : > { %p5617_p1 = scmp.eq.s32.totalorder %s3112_s7, 0  ;;  %p231_p2 = scmp.eq.s32.totalorder %s3112_s7, 1 }
  0x10   : > { %p237_p3 = scmp.eq.s32.totalorder %s2565_s9, 1  ;;  %p2566_p5 = scmp.ge.s32.totalorder %s3023_s30, 1 }
  0x11   : > { %p3121_p4 = por %p5617_p1, %p50_p0  ;;  %p244_p7 = scmp.lt.s32.totalorder %s3023_s30, 3 }
  0x12   : > { %p3126_p6 = por %p237_p3, %p50_p0  ;;  %s5807_s3 = sld [smem:[#allocation147_spill]] }
  0x13   : > { %p3134_p8 = pnand %p2566_p5, %p244_p7  ;;  %s3025_s16 = smov [#allocation7]  }
  0x14   : > { %s261_s17 = sshll.u32 %s3025_s16, 4  ;;  %s5809_s6 = sld [smem:[#allocation148_spill]]  ;;  %s262_s17 = int_to_ptr.vmem [resolvable:$true] %s261_s17 }
  0x15   : > { %p2639_p10 = pneg %p3134_p8  ;;  %s3026_s21 = smov [#allocation10]  }
  0x16   : > { %s275_s22 = sshll.u32 %s3026_s21, 4  ;;  %s3027_s23 = smov 128   ;;  %s276_s22 = int_to_ptr.vmem [resolvable:$true] %s275_s22 }
  0x17   : > { %p2640_p11 = pnand %p2639_p10, %p5617_p1  ;;  %s3028_s24 = smov 8  }
  0x18   : > { %s259_s14 = sshll.u32 %s5807_s3, 4  ;;  %s3147_s25 = sadd.s32 1, %s3023_s30   ;;  %s260_s14 = int_to_ptr.hbm [resolvable:$true] %s259_s14 }
  0x19   : > { %2642 = dma.hbm_to_vmem [thread:$0]  (!%p2640_p11), %s260_s14, 256, %s262_s17, [#allocation6]  }
  0x1a   : > { %s273_s20 = sshll.u32 %s5809_s6, 4  ;;  %5810 = sst [smem:[#allocation19_spill]] %s3147_s25  ;;  %s274_s20 = int_to_ptr.hbm [resolvable:$true] %s273_s20 }
  0x1b   : > { %2645 = dma.hbm_to_vmem [thread:$0]  (!%p2640_p11), %s274_s20, 256, %s276_s22, [#allocation9], %s3027_s23, %s3027_s23, %s3028_s24  }
  0x1c   : > { %s34_s26 = ssub.s32 %s3023_s30, %s3147_s25  ;;  %s37_s9 = sadd.s32 1, %s3019_s29 }
  0x1d   : > { %p35_p12 = scmp.eq.s32.totalorder %s34_s26, 0  ;;  %p44_p13 = scmp.ne.s32.totalorder %s3019_s29, %s3015_s28 }
  0x1e   : > { %p45_p0 = scmp.eq.s32.totalorder %s3023_s30, 0  ;;  %p2662_p7 = scmp.lt.s32.totalorder %s3023_s30, 2 }
  0x1f   : > { %s3156_s12 = scalar_select %p35_p12, %s3019_s29, %s37_s9  }
  0x20   : > { %p46_p3 = por %p45_p0, %p44_p13  ;;  %p3160_p5 = por %p231_p2, %p44_p13 }
  0x21   : > { %5811 = sst [smem:[#allocation20_spill]] %s3156_s12  ;;  %s3166_s14 = sand.u32 1, %s3019_s29  }
  0x22   : > { %s5613_s16 = sshll.u32 %s3166_s14, 6  ;;  %s3170_s17 = sshll.u32 %s3023_s30, 6 }
  0x23   : > { %s5813_s0 = sld [smem:[#allocation146_spill]]  ;;  %s296_s21 = scalar_lea.vmem [#allocation2], %s5613_s16 }
  0x24   : > { %s305_s22 = sshll.u32 %s296_s21, 4  ;;  %p3178_p2 = pnand %p2662_p7, %p46_p3  ;;  %s306_s22 = int_to_ptr.vmem [resolvable:$true] %s305_s22 }
  0x25   : > { %s2576_s26 = sshll.u32 %s3166_s14, 7  ;;  %s293_s9 = scalar_lea.sflag [#allocation3], %s3166_s14 }
  0x26   : > { %p2855_p11 = pneg %p3178_p2 }
  0x29   : > { %s301_s20 = scalar_lea.hbm %s5813_s0, %s3170_s17 }
  0x2a   : > { %s303_s23 = sshll.u32 %s301_s20, 4  ;;  %s2858_s20 = scalar_lea.hbm %s5813_s0, 128  ;;  %s304_s23 = int_to_ptr.hbm [resolvable:$true] %s303_s23 }
  0x2b   : > { %s2851_s3 = sshra.s32 %s304_s23, 4  ;;  %s2852_s3 = int_to_ptr.hbm [resolvable:$true] %s2851_s3 }
  0x2c   : > { %s2853_s6 = scalar_lea.hbm %s2852_s3, 64  ;;  %p2859_p0 = scmp.lt.s32.totalorder %s2852_s3, %s5813_s0 }
  0x2d   : > { %p2854_p10 = scmp.ne.s32.totalorder %s2852_s3, %s2853_s6  ;;  %p2860_p3 = scmp.lt.s32.totalorder %s2858_s20, %s2853_s6 }
  0x2f   : > { %p2856_p12 = pnand %p2855_p11, %p2854_p10  ;;  %p2861_p7 = por %p2860_p3, %p2859_p0 }
  0x31   : > { %p2857_p13 = pneg %p2856_p12 }
  0x33   : > { %p2862_p9 = pnand %p2861_p7, %p2857_p13 }
  0x35   : > { %2865 = shalt.err (!%p2862_p9)
}
  0x36   : > { %2649 = dma.hbm_to_vmem [thread:$0]  (!%p3178_p2), %s304_s23, 1024, %s306_s22, %s293_s9  }
  0x37   : > { %s341_s18 = scalar_lea.hbm %s5609_s5, %s3170_s17  ;;  %s336_s19 = scalar_lea.vmem [#allocation8], %s2576_s26 }
  0x38   : > { %s344_s25 = sshll.u32 %s336_s19, 4  ;;  %s3201_s16 = sshll.u32 %s341_s18, 4  ;;  %s3203_s25 = int_to_ptr.vmem [resolvable:$true] %s344_s25  ;;  %s343_s16 = int_to_ptr.hbm [resolvable:$true] %s3201_s16 }
  0x39   : > { %s312_s3 = sand.u32 1, %s3023_s30   ;;  %s321_s21 = scalar_lea.hbm %s5605_s1, %s3170_s17 }
  0x3a   : > { %s323_s0 = sshll.u32 %s321_s21, 4  ;;  %s5815_s22 = sshll.u32 %s3166_s14, 6  ;;  %s324_s0 = int_to_ptr.hbm [resolvable:$true] %s323_s0 }
  0x3b   : > { %s316_s23 = scalar_lea.vmem [#allocation5], %s5815_s22  ;;  %s313_s29 = scalar_lea.sflag [#allocation6], %s312_s3 }
  0x3c   : > { %s325_s9 = sshll.u32 %s316_s23, 4  ;;  %s2881_s12 = sshra.s32 %s324_s0, 4  ;;  %s326_s9 = int_to_ptr.vmem [resolvable:$true] %s325_s9  ;;  %s2882_s12 = int_to_ptr.hbm [resolvable:$true] %s2881_s12 }
  0x3d   : > { %s2883_s26 = scalar_lea.hbm %s2882_s12, 64  ;;  %s2888_s6 = scalar_lea.hbm %s5605_s1, 128 }
  0x3e   : > { %p2884_p9 = scmp.ne.s32.totalorder %s2882_s12, %s2883_s26  ;;  %p2889_p13 = scmp.lt.s32.totalorder %s2882_s12, %s5605_s1 }
  0x3f   : > { %p2890_p0 = scmp.lt.s32.totalorder %s2888_s6, %s2883_s26 }
  0x40   : > { %p2886_p10 = pnand %p2884_p9, %p2855_p11 }
  0x41   : > { %p2891_p3 = por %p2890_p0, %p2889_p13 }
  0x42   : > { %p2887_p12 = pneg %p2886_p10 }
  0x44   : > { %p2892_p7 = pnand %p2891_p3, %p2887_p12 }
  0x46   : > { %2895 = shalt.err (!%p2892_p7)
}
  0x47   : > { %2652 = dma.hbm_to_vmem [thread:$0]  (!%p3178_p2), %s324_s0, 1024, %s326_s9, %s313_s29  }
  0x48   : > { %s333_s14 = scalar_lea.sflag [#allocation9], %s312_s3  ;;  %s2911_s21 = sshra.s32 %s343_s16, 4  ;;  %s2912_s21 = int_to_ptr.hbm [resolvable:$true] %s2911_s21 }
  0x49   : > { %s2913_s22 = scalar_lea.hbm %s2912_s21, 128  ;;  %s2918_s26 = scalar_lea.hbm %s5609_s5, 256 }
  0x4a   : > { %p2914_p9 = scmp.ne.s32.totalorder %s2912_s21, %s2913_s22  ;;  %p2919_p12 = scmp.lt.s32.totalorder %s2912_s21, %s5609_s5 }
  0x4b   : > { %p2920_p13 = scmp.lt.s32.totalorder %s2918_s26, %s2913_s22 }
  0x4c   : > { %p2916_p10 = pnand %p2914_p9, %p2855_p11 }
  0x4d   : > { %p2921_p0 = por %p2920_p13, %p2919_p12 }
  0x4e   : > { %p2917_p1 = pneg %p2916_p10 }
  0x50   : > { %p2922_p3 = pnand %p2921_p0, %p2917_p1 }
  0x52   : > { %2925 = shalt.err (!%p2922_p3)
}
  0x53   : > { %s3029_s0 = smov 2048   ;;  %s3030_s3 = smov 1024  }
  0x54   : > { %s3031_s9 = smov 64   ;;  %356 = sbr.rel (%p3134_p8) target bundleno = 3124 (0xc34), region = 52 }
  0x55   : > { %2655 = dma.hbm_to_vmem [thread:$0]  (!%p3178_p2), %s343_s16, 2048, %s3203_s25, %s333_s14, %s3029_s0, %s3030_s3, %s3031_s9  }
  0x59   : > { %s3243_s29 = sand.u32 1, %s3015_s28  }
  0x5a   : > { %s3246_s6 = sshll.u32 %s3243_s29, 6  ;;  %s359_s17 = scalar_lea.sflag [#allocation3], %s3243_s29 }
  0x5b   : > { %s3250_s20 = scalar_lea.vmem [#allocation2], %s3246_s6 }
  0x5c   : > { %2986 = dma.done.wait (%p3121_p4), %s359_s17, 1024  }
  0x5d   : > { %2988 = vsyncadd (%p3121_p4), %s359_s17, 4294966272  ;;  %s368_s15 = sand.u32 1, %s3112_s7   ;;  %s3258_s24 = scalar_lea.vmem [#allocation5], %s3246_s6 }
  0x5e   : > { %s369_s25 = scalar_lea.sflag [#allocation6], %s368_s15 }
  0x5f   : > { %2990 = dma.done.wait (%p3121_p4), %s369_s25, 1024  }
  0x60   : > { %2992 = vsyncadd (%p3121_p4), %s369_s25, 4294966272  ;;  %p5816_p1 = scmp.eq.s32.totalorder %s3112_s7, 0 }
  0x62   : > { %2994 = dma.done.wait (%p5816_p1), [#allocation6], 256   ;;  %p5817_p8 = pmov %p5816_p1 }
  0x63   : > { %s2583_s16 = sshll.u32 %s3243_s29, 7  ;;  %s384_s14 = scalar_lea.sflag [#allocation9], %s368_s15 }
  0x64   : > { %2996 = vsyncadd (%p5817_p8), [#allocation6], 4294967040  ;;  %s3269_s21 = scalar_lea.vmem [#allocation8], %s2583_s16 }
  0x65   : > { %2998 = dma.done.wait (%p3121_p4), %s384_s14, 2048  }
  0x66   : > { %3000 = vsyncadd (%p3121_p4), %s384_s14, 4294965248  ;;  %p5818_p2 = pmov %p5816_p1 }
  0x67   : > { %p5819_p11 = pmov %p5816_p1 }
  0x68   : > { %3002 = dma.done.wait (%p5818_p2), [#allocation9], 256  }
  0x69   : > { %3004 = vsyncadd (%p5819_p11), [#allocation9], 4294967040  ;;  %v3280_v0 = vld [vmem:[%s3250_s20 + $0x20] sm:$0xff]  ;;  %v3283_v1 = vld [vmem:[%s3250_s20 + $0x18] sm:$0xff]  ;;  %s3032_s22 = smov 111   ;;  %s3033_s10 = smov 112   ;;  %v494_v10 = vlaneseq }
  0x6a   : > { %v3286_v2 = vld [vmem:[%s3250_s20 + $0x10] sm:$0xff]  ;;  %775 = vrot.lane.b32.xlu1 %v3280_v0, %s3032_s22  ;;  %732 = vrot.lane.b32.xlu2 %v3283_v1, %s3033_s10  ;;  %s3034_s23 = smov 113   ;;  %v3307_v3 = vld [vmem:[%s3250_s20 + $0x8] sm:$0xff]  ;;  %s3035_s12 = smov 127   ;;  %vm808_vm8 = vcmask 588800   ;;  %vm5709_vm9 = vcmask 15360  }
  0x6b   : > { %771 = vrot.lane.b32.xlu0 %v3286_v2, %s3032_s22  ;;  %v3310_v4 = vld [vmem:[%s3250_s20] sm:$0xff]  ;;  %s3036_s26 = smov 1   ;;  %s3037_s18 = smov 15   ;;  %v3355_v5 = vld [vmem:[%s3250_s20 + $0x38] sm:$0xff]  ;;  %v3364_v6 = vld [vmem:[%s3250_s20 + $0x30] sm:$0xff]  ;;  %v3401_v15 = vand.u32 127, %v494_v10 }
  0x6c   : > { %s3038_s19 = smov 16   ;;  %s3039_s0 = smov 17   ;;  %v3399_v14 = vld [vmem:[%s3250_s20 + $0x28] sm:$0xff]  ;;  %v3408_v16 = vld [vmem:[%s3269_s21 + $0x10] sm:$0xff]  ;;  %v2761_v42 = vld [vmem:[%s3269_s21 + $0x48] ss:$0 sm:$0xff] }
  0x6d   : > { %v3411_v17 = vld [vmem:[%s3269_s21 + $0x18] sm:$0xff]  ;;  %vm783_vm0 = vcmp.lt.s32.totalorder %v3401_v15, 111  ;;  %v2758_v18 = vld [vmem:[%s3269_s21 + $0x50] ss:$0 sm:$0xff]  ;;  %vm742_vm1 = vcmp.lt.s32.totalorder %v3401_v15, 112  ;;  %v3424_v23 = vperm.slane %v3408_v16, 7 }
  0x6e   : > { %v2759_v19 = vld [vmem:[%s3269_s21 + $0x58] ss:$0 sm:$0xff]  ;;  %v3427_v24 = vperm.slane %v3411_v17, 7  ;;  %v3447_v33 = vperm.slane %v3411_v17, 6  ;;  %vm701_vm2 = vcmp.lt.s32.totalorder %v3401_v15, 113  ;;  %v3451_v34 = vperm.slane %v3408_v16, 6 }
  0x6f   : > { %v2760_v43 = vld [vmem:[%s3269_s21 + $0x40] ss:$0 sm:$0xff]  ;;  %vm660_vm3 = vcmp.lt.s32.totalorder %v3401_v15, 127  ;;  %v3485_v51 = vperm.slane %v3408_v16, 5  ;;  %v3488_v52 = vperm.slane %v3411_v17, 5  ;;  %v3512_v61 = vld [vmem:[%s3269_s21 + $0x8] sm:$0xff] }
  0x70   : > { %5820 = vst [vmem:[#allocation21_spill] sm:$0xff] %v3427_v24  ;;  %v3505_v60 = vld [vmem:[%s3269_s21] sm:$0xff]  ;;  %v3518_v63 = vperm.slane %v3512_v61, 7  ;;  %vm619_vm4 = vcmp.lt.s32.totalorder %v3401_v15, 1  ;;  %vm578_vm5 = vcmp.lt.s32.totalorder %v3401_v15, 15  ;;  %vm537_vm6 = vcmp.lt.s32.totalorder %v3401_v15, 16 }
  0x71   : > { %5821 = vst [vmem:[#allocation22_spill] sm:$0xff] %v3447_v33  ;;  %v3515_v62 = vperm.slane %v3505_v60, 7  ;;  %vm496_vm7 = vcmp.lt.s32.totalorder %v3401_v15, 17  ;;  %vm1039_vm10 = vcmask 7168   ;;  %vm5708_vm11 = vcmask 23552   ;;  %s2961_s17 = scalar_lea.hbm %s5612_s8, 128 }
  0x72   : > { %734 = vrot.lane.b32.xlu2 %v3280_v0, %s3033_s10  ;;  %730 = vrot.lane.b32.xlu1 %v3286_v2, %s3033_s10  ;;  %5822 = vst [vmem:[#allocation23_spill] sm:$0xff] %v3451_v34  ;;  %vm1048_vm12 = vcmask 130048  }
  0x73   : > { %773 = vrot.lane.b32.xlu0 %v3283_v1, %s3032_s22  ;;  %5823 = vst [vmem:[#allocation24_spill] sm:$0xff] %v3485_v51 }
  0x74   : > { %5824 = vst [vmem:[#allocation25_spill] sm:$0xff] %v3488_v52 }
  0x7a   : > { %693 = vrot.lane.b32.xlu2 %v3280_v0, %s3034_s23  ;;  %691 = vrot.lane.b32.xlu1 %v3283_v1, %s3034_s23 }
  0x7b   : > { %689 = vrot.lane.b32.xlu0 %v3286_v2, %s3034_s23 }
  0x82   : > { %648 = vrot.lane.b32.xlu2 %v3286_v2, %s3035_s12  ;;  %769 = vrot.lane.b32.xlu1 %v3307_v3, %s3032_s22 }
  0x83   : > { %767 = vrot.lane.b32.xlu0 %v3310_v4, %s3032_s22 }
  0x8a   : > { %652 = vrot.lane.b32.xlu1 %v3280_v0, %s3035_s12  ;;  %726 = vrot.lane.b32.xlu2 %v3310_v4, %s3033_s10 }
  0x8b   : > { %650 = vrot.lane.b32.xlu0 %v3283_v1, %s3035_s12 }
  0x92   : > { %685 = vrot.lane.b32.xlu1 %v3310_v4, %s3034_s23  ;;  %687 = vrot.lane.b32.xlu2 %v3307_v3, %s3034_s23 }
  0x93   : > { %728 = vrot.lane.b32.xlu0 %v3307_v3, %s3033_s10 }
  0x9a   : > { %607 = vrot.lane.b32.xlu1 %v3286_v2, %s3036_s26  ;;  %609 = vrot.lane.b32.xlu2 %v3283_v1, %s3036_s26 }
  0x9b   : > { %605 = vrot.lane.b32.xlu0 %v3307_v3, %s3036_s26 }
  0xa2   : > { %646 = vrot.lane.b32.xlu1 %v3307_v3, %s3035_s12  ;;  %564 = vrot.lane.b32.xlu2 %v3307_v3, %s3037_s18 }
  0xa3   : > { %644 = vrot.lane.b32.xlu0 %v3310_v4, %s3035_s12 }
  0xaa   : > { %568 = vrot.lane.b32.xlu1 %v3283_v1, %s3037_s18  ;;  %523 = vrot.lane.b32.xlu2 %v3307_v3, %s3038_s19 }
  0xab   : > { %566 = vrot.lane.b32.xlu0 %v3286_v2, %s3037_s18 }
  0xb2   : > { %527 = vrot.lane.b32.xlu1 %v3283_v1, %s3038_s19  ;;  %603 = vrot.lane.b32.xlu2 %v3310_v4, %s3036_s26 }
  0xb3   : > { %525 = vrot.lane.b32.xlu0 %v3286_v2, %s3038_s19 }
  0xba   : > { %480 = vrot.lane.b32.xlu1 %v3307_v3, %s3039_s0  ;;  %482 = vrot.lane.b32.xlu2 %v3286_v2, %s3039_s0 }
  0xbb   : > { %617 = vrot.lane.b32.xlu0 %v3355_v5, %s3036_s26 }
  0xc2   : > { %779 = vrot.lane.b32.xlu1 %v3364_v6, %s3032_s22  ;;  %781 = vrot.lane.b32.xlu2 %v3355_v5, %s3032_s22 }
  0xc3   : > { %484 = vrot.lane.b32.xlu0 %v3283_v1, %s3039_s0 }
  0xc4   : > { %v733_v7 = vpop.permute.xlu2 %732 }
  0xca   : > { %576 = vrot.lane.b32.xlu1 %v3355_v5, %s3037_s18  ;;  %738 = vrot.lane.b32.xlu2 %v3364_v6, %s3033_s10 }
  0xcb   : > { %562 = vrot.lane.b32.xlu0 %v3310_v4, %s3037_s18 }
  0xcc   : > { %v3378_v8 = vpop.permute.xlu2 %734 }
  0xcd   : > { %v746_v28 = vsel %vm742_vm1, %v733_v7, %v3378_v8 }
  0xce   : > { %v762_v32 = vmul.f32 %v3427_v24, %v746_v28 }
  0xd2   : > { %521 = vrot.lane.b32.xlu1 %v3310_v4, %s3038_s19  ;;  %535 = vrot.lane.b32.xlu2 %v3355_v5, %s3038_s19 }
  0xd3   : > { %740 = vrot.lane.b32.xlu0 %v3355_v5, %s3033_s10 }
  0xd4   : > { %v3386_v9 = vpop.permute.xlu2 %693 }
  0xda   : > { %699 = vrot.lane.b32.xlu1 %v3355_v5, %s3034_s23  ;;  %478 = vrot.lane.b32.xlu2 %v3310_v4, %s3039_s0 }
  0xdb   : > { %697 = vrot.lane.b32.xlu0 %v3364_v6, %s3034_s23 }
  0xdc   : > { %v3394_v11 = vpop.permute.xlu1 %775  ;;  %v3396_v12 = vpop.permute.xlu2 %648 }
  0xdd   : > { %v772_v13 = vpop.permute.xlu0 %771 }
  0xe2   : > { %777 = vrot.lane.b32.xlu1 %v3399_v14, %s3032_s22  ;;  %656 = vrot.lane.b32.xlu2 %v3364_v6, %s3035_s12 }
  0xe3   : > { %492 = vrot.lane.b32.xlu0 %v3355_v5, %s3039_s0 }
  0xe4   : > { %v3419_v20 = vpop.permute.xlu1 %730  ;;  %v3421_v21 = vpop.permute.xlu2 %726 }
  0xe5   : > { %v774_v22 = vpop.permute.xlu0 %773  ;;  %v747_v27 = vsel %vm742_vm1, %v3419_v20, %v733_v7  ;;  %v3521_v7 = vperm.slane %v3505_v60, 6 }
  0xe6   : > { %v788_v25 = vsel %vm783_vm0, %v772_v13, %v774_v22  ;;  %v787_v26 = vsel %vm783_vm0, %v774_v22, %v3394_v11  ;;  %v761_v31 = vmul.f32 %v3424_v23, %v747_v27 }
  0xe7   : > { %v802_v29 = vmul.f32 %v2758_v18, %v788_v25  ;;  %v803_v30 = vmul.f32 %v2759_v19, %v787_v26  ;;  %v3532_v19 = vperm.slane %v3512_v61, 6 }
  0xe9   : > { %868 = vmatpush.msra.mxu2 %v802_v29  ;;  %891 = vmatpush.msra.mxu3 %v803_v30  ;;  %v3558_v30 = vperm.slane %v3408_v16, 3 }
  0xea   : > { %736 = vrot.lane.b32.xlu1 %v3399_v14, %s3033_s10  ;;  %695 = vrot.lane.b32.xlu2 %v3399_v14, %s3034_s23 }
  0xeb   : > { %869 = vmatpush.msra.mxu2 %v761_v31  ;;  %892 = vmatpush.msra.mxu3 %v762_v32  ;;  %5826 = vst [vmem:[#allocation27_spill] sm:$0xff] %v3558_v30 }
  0xec   : > { %658 = vrot.lane.b32.xlu0 %v3355_v5, %s3035_s12  ;;  %v692_v35 = vpop.permute.xlu1 %691  ;;  %v688_v36 = vpop.permute.xlu2 %687 }
  0xed   : > { %v690_v37 = vpop.permute.xlu0 %689  ;;  %v705_v38 = vsel %vm701_vm2, %v692_v35, %v3386_v9 }
  0xee   : > { %v706_v39 = vsel %vm701_vm2, %v690_v37, %v692_v35  ;;  %v721_v40 = vmul.f32 %v3447_v33, %v705_v38  ;;  %v707_v25 = vsel %vm701_vm2, %v688_v36, %v690_v37 }
  0xef   : > { %v720_v41 = vmul.f32 %v3451_v34, %v706_v39  ;;  %v719_v29 = vmul.f32 %v3532_v19, %v707_v25 }
  0xf0   : > { %893 = vmatpush.msra.mxu3 %v721_v40  ;;  %v3570_v40 = vperm.slane %v3512_v61, 5 }
  0xf1   : > { %870 = vmatpush.msra.mxu2 %v720_v41  ;;  %v3573_v41 = vperm.slane %v3505_v60, 5 }
  0xf2   : > { %615 = vrot.lane.b32.xlu1 %v3364_v6, %s3036_s26  ;;  %654 = vrot.lane.b32.xlu2 %v3399_v14, %s3035_s12 }
  0xf4   : > { %613 = vrot.lane.b32.xlu0 %v3399_v14, %s3036_s26  ;;  %v770_v44 = vpop.permute.xlu1 %769  ;;  %v3470_v45 = vpop.permute.xlu2 %609 }
  0xf5   : > { %v3472_v46 = vpop.permute.xlu0 %767  ;;  %v789_v47 = vsel %vm783_vm0, %v770_v44, %v772_v13 }
  0xf6   : > { %v790_v48 = vsel %vm783_vm0, %v3472_v46, %v770_v44  ;;  %v801_v49 = vmul.f32 %v2761_v42, %v789_v47 }
  0xf7   : > { %v800_v50 = vmul.f32 %v2760_v43, %v790_v48 }
  0xf8   : > { %845 = vmatpush.msra.mxu1 %v801_v49 }
  0xf9   : > { %822 = vmatpush.msra.mxu0 %v800_v50  ;;  %v3587_v50 = vperm.slane %v3512_v61, 3 }
  0xfa   : > { %574 = vrot.lane.b32.xlu1 %v3364_v6, %s3037_s18  ;;  %531 = vrot.lane.b32.xlu2 %v3399_v14, %s3038_s19 }
  0xfc   : > { %572 = vrot.lane.b32.xlu0 %v3399_v14, %s3037_s18  ;;  %v3492_v53 = vpop.permute.xlu1 %652  ;;  %v3494_v54 = vpop.permute.xlu2 %564 }
  0xfd   : > { %v651_v55 = vpop.permute.xlu0 %650 }
  0xfe   : > { %v665_v56 = vsel %vm660_vm3, %v3396_v12, %v651_v55  ;;  %v664_v57 = vsel %vm660_vm3, %v651_v55, %v3492_v53 }
  0xff   : > { %v679_v58 = vmul.f32 %v3485_v51, %v665_v56  ;;  %v680_v59 = vmul.f32 %v3488_v52, %v664_v57  ;;  %v3596_v57 = vperm.slane %v3408_v16, 2 }
 0x101   : > { %871 = vmatpush.msra.mxu2 %v679_v58  ;;  %894 = vmatpush.msra.mxu3 %v680_v59  ;;  %5827 = vst [vmem:[#allocation28_spill] sm:$0xff] %v3596_v57  ;;  %v3599_v58 = vperm.slane %v3411_v17, 2 }
 0x102   : > { %611 = vrot.lane.b32.xlu1 %v3280_v0, %s3036_s26  ;;  %488 = vrot.lane.b32.xlu2 %v3399_v14, %s3039_s0 }
 0x103   : > { %872 = vmatpush.msra.mxu2 %v3286_v2  ;;  %895 = vmatpush.msra.mxu3 %v3283_v1  ;;  %5828 = vst [vmem:[#allocation29_spill] sm:$0xff] %v3599_v58 }
 0x104   : > { %533 = vrot.lane.b32.xlu0 %v3364_v6, %s3038_s19  ;;  %v3527_v10 = vpop.permute.xlu1 %685  ;;  %v3529_v13 = vpop.permute.xlu2 %523 }
 0x105   : > { %v729_v18 = vpop.permute.xlu0 %728  ;;  %v708_v22 = vsel %vm701_vm2, %v3527_v10, %v688_v36 }
 0x106   : > { %v749_v2 = vsel %vm742_vm1, %v3421_v21, %v729_v18  ;;  %v748_v1 = vsel %vm742_vm1, %v729_v18, %v3419_v20  ;;  %v718_v28 = vmul.f32 %v3521_v7, %v708_v22  ;;  %v3554_v20 = vperm.slane %v3411_v17, 3 }
 0x107   : > { %v759_v26 = vmul.f32 %v3515_v62, %v749_v2  ;;  %v760_v27 = vmul.f32 %v3518_v63, %v748_v1 }
 0x108   : > { %5825 = vst [vmem:[#allocation26_spill] sm:$0xff] %v3554_v20 }
 0x109   : > { %823 = vmatpush.msra.mxu0 %v759_v26  ;;  %846 = vmatpush.msra.mxu1 %v760_v27  ;;  %v3617_v26 = vperm.slane %v3411_v17, 1 }
 0x10a   : > { %570 = vrot.lane.b32.xlu1 %v3280_v0, %s3037_s18  ;;  %529 = vrot.lane.b32.xlu2 %v3280_v0, %s3038_s19 }
 0x10b   : > { %847 = vmatpush.msra.mxu1 %v719_v29  ;;  %824 = vmatpush.msra.mxu0 %v718_v28  ;;  %5830 = vst [vmem:[#allocation31_spill] sm:$0xff] %v3617_v26 }
 0x10c   : > { %490 = vrot.lane.b32.xlu0 %v3364_v6, %s3039_s0  ;;  %v608_v31 = vpop.permute.xlu1 %607  ;;  %v604_v32 = vpop.permute.xlu2 %603 }
 0x10d   : > { %v606_v35 = vpop.permute.xlu0 %605  ;;  %v624_v36 = vsel %vm619_vm4, %v608_v31, %v3470_v45 }
 0x10e   : > { %v625_v37 = vsel %vm619_vm4, %v606_v35, %v608_v31  ;;  %v639_v38 = vmul.f32 %v3554_v20, %v624_v36  ;;  %v626_v56 = vsel %vm619_vm4, %v604_v32, %v606_v35 }
 0x10f   : > { %v638_v39 = vmul.f32 %v3558_v30, %v625_v37 }
 0x110   : > { %896 = vmatpush.msra.mxu3 %v639_v38  ;;  %v3633_v38 = vperm.slane %v3408_v16, 0 }
 0x111   : > { %873 = vmatpush.msra.mxu2 %v638_v39  ;;  %v3636_v39 = vperm.slane %v3505_v60, 3 }
 0x112   : > { %5831 = vst [vmem:[#allocation32_spill] sm:$0xff] %v3633_v38 }
 0x114   : > { %486 = vrot.lane.b32.xlu0 %v3280_v0, %s3039_s0  ;;  %v647_v42 = vpop.permute.xlu1 %646  ;;  %v483_v47 = vpop.permute.xlu2 %482 }
 0x115   : > { %v3577_v43 = vpop.permute.xlu0 %644  ;;  %v666_v44 = vsel %vm660_vm3, %v647_v42, %v3396_v12  ;;  %v637_v12 = vmul.f32 %v3587_v50, %v626_v56 }
 0x116   : > { %v667_v48 = vsel %vm660_vm3, %v3577_v43, %v647_v42  ;;  %v678_v49 = vmul.f32 %v3570_v40, %v666_v44 }
 0x117   : > { %v677_v55 = vmul.f32 %v3573_v41, %v667_v48 }
 0x118   : > { %848 = vmatpush.msra.mxu1 %v678_v49 }
 0x119   : > { %825 = vmatpush.msra.mxu0 %v677_v55 }
 0x11a   : > { %849 = vmatpush.msra.mxu1 %v3307_v3 }
 0x11b   : > { %826 = vmatpush.msra.mxu0 %v3310_v4  ;;  %v3614_v4 = vperm.slane %v3408_v16, 1  ;;  %v2763_v16 = vld [vmem:[%s3269_s21 + $0x70] ss:$0 sm:$0xff] }
 0x11c   : > { %v3602_v59 = vpop.permute.xlu1 %568  ;;  %850 = vmatpush.msra.mxu1 %v637_v12  ;;  %v782_v25 = vpop.permute.xlu2 %781  ;;  %v3649_v12 = vperm.slane %v3411_v17, 0 }
 0x11d   : > { %v567_v18 = vpop.permute.xlu0 %566  ;;  %5829 = vst [vmem:[#allocation30_spill] sm:$0xff] %v3614_v4 }
 0x11e   : > { %v584_v3 = vsel %vm578_vm5, %v3494_v54, %v567_v18  ;;  %v583_v22 = vsel %vm578_vm5, %v567_v18, %v3602_v59  ;;  %5832 = vst [vmem:[#allocation33_spill] sm:$0xff] %v3649_v12 }
 0x11f   : > { %v597_v2 = vmul.f32 %v3596_v57, %v584_v3  ;;  %v598_v1 = vmul.f32 %v3599_v58, %v583_v22  ;;  %v2762_v22 = vld [vmem:[%s3269_s21 + $0x78] ss:$0 sm:$0xff] }
 0x121   : > { %874 = vmatpush.msra.mxu2 %v597_v2  ;;  %897 = vmatpush.msra.mxu3 %v598_v1 }
 0x124   : > { %v3619_v27 = vpop.permute.xlu1 %527  ;;  %v3629_v37 = vpop.permute.xlu2 %738 }
 0x125   : > { %v526_v28 = vpop.permute.xlu0 %525 }
 0x126   : > { %v543_v29 = vsel %vm537_vm6, %v3529_v13, %v526_v28  ;;  %v542_v31 = vsel %vm537_vm6, %v526_v28, %v3619_v27 }
 0x127   : > { %v556_v35 = vmul.f32 %v3614_v4, %v543_v29  ;;  %v557_v36 = vmul.f32 %v3617_v26, %v542_v31 }
 0x129   : > { %875 = vmatpush.msra.mxu2 %v556_v35  ;;  %898 = vmatpush.msra.mxu3 %v557_v36  ;;  %v3669_v35 = vperm.slane %v3505_v60, 2 }
 0x12c   : > { %v481_v42 = vpop.permute.xlu1 %480  ;;  %v3651_v18 = vpop.permute.xlu2 %535 }
 0x12d   : > { %v3638_v44 = vpop.permute.xlu0 %617  ;;  %v502_v48 = vsel %vm496_vm7, %v481_v42, %v483_v47 }
 0x12e   : > { %v627_v49 = vsel %vm619_vm4, %v3638_v44, %v604_v32  ;;  %v515_v55 = vmul.f32 %v3633_v38, %v502_v48  ;;  %v791_v32 = vsel %vm783_vm0, %v782_v25, %v3472_v46  ;;  %v3672_v46 = vperm.slane %v3512_v61, 2 }
 0x12f   : > { %v636_v56 = vmul.f32 %v3636_v39, %v627_v49  ;;  %v807_v31 = vmul.f32 %v2762_v22, %v791_v32  ;;  %v3688_v22 = vld [vmem:[%s3269_s21 + $0x38] sm:$0xff]  ;;  %v3691_v32 = vperm.slane %v3512_v61, 1 }
 0x130   : > { %876 = vmatpush.msra.mxu2 %v515_v55 }
 0x131   : > { %827 = vmatpush.msra.mxu0 %v636_v56 }
 0x134   : > { %v3653_v3 = vpop.permute.xlu1 %779  ;;  %v479_v48 = vpop.permute.xlu2 %478 }
 0x135   : > { %v3656_v2 = vpop.permute.xlu0 %484  ;;  %v784_v1 = vsel %vm783_vm0, %v3653_v3, %v782_v25 }
 0x136   : > { %v501_v17 = vsel %vm496_vm7, %v483_v47, %v3656_v2  ;;  %v806_v28 = vmul.f32 %v2763_v16, %v784_v1  ;;  %v3685_v16 = vld [vmem:[%s3269_s21 + $0x30] sm:$0xff]  ;;  %v3694_v1 = vperm.slane %v3505_v60, 1 }
 0x137   : > { %v516_v29 = vmul.f32 %v3649_v12, %v501_v17  ;;  %v3697_v17 = vperm.slane %v3685_v16, 7 }
 0x138   : > { %960 = vmatpush.msrb.mxu2 %v806_v28  ;;  %5833 = vst [vmem:[#allocation34_spill] sm:$0xff] %v3694_v1 }
 0x139   : > { %899 = vmatpush.msra.mxu3 %v516_v29  ;;  %5834 = vst [vmem:[#allocation35_spill] sm:$0xff] %v3697_v17  ;;  %v3703_v29 = vperm.slane %v3512_v61, 0 }
 0x13b   : > { %983 = vmatpush.msrb.mxu3 %v807_v31  ;;  %5836 = vst [vmem:[#allocation37_spill] sm:$0xff] %v3703_v29 }
 0x13c   : > { %v3674_v25 = vpop.permute.xlu1 %576  ;;  %v3723_v26 = vpop.permute.xlu2 %656 }
 0x13d   : > { %v563_v36 = vpop.permute.xlu0 %562 }
 0x13e   : > { %v586_v47 = vsel %vm578_vm5, %v3674_v25, %v563_v36  ;;  %v585_v49 = vsel %vm578_vm5, %v563_v36, %v3494_v54  ;;  %v3700_v54 = vperm.slane %v3688_v22, 7 }
 0x13f   : > { %v595_v55 = vmul.f32 %v3669_v35, %v586_v47  ;;  %v596_v56 = vmul.f32 %v3672_v46, %v585_v49  ;;  %v503_v47 = vsel %vm496_vm7, %v479_v48, %v481_v42 }
 0x140   : > { %5835 = vst [vmem:[#allocation36_spill] sm:$0xff] %v3700_v54 }
 0x141   : > { %828 = vmatpush.msra.mxu0 %v595_v55  ;;  %851 = vmatpush.msra.mxu1 %v596_v56 }
 0x144   : > { %v522_v28 = vpop.permute.xlu1 %521 }
 0x145   : > { %v741_v31 = vpop.permute.xlu0 %740  ;;  %v544_v36 = vsel %vm537_vm6, %v522_v28, %v3529_v13  ;;  %v545_v49 = vsel %vm537_vm6, %v3651_v18, %v522_v28  ;;  %v514_v28 = vmul.f32 %v3703_v29, %v503_v47 }
 0x146   : > { %v555_v55 = vmul.f32 %v3691_v32, %v544_v36  ;;  %v743_v56 = vsel %vm742_vm1, %v3629_v37, %v741_v31  ;;  %v750_v61 = vsel %vm742_vm1, %v741_v31, %v3421_v21  ;;  %v554_v12 = vmul.f32 %v3694_v1, %v545_v49 }
 0x147   : > { %v765_v13 = vmul.f32 %v3697_v17, %v743_v56  ;;  %v766_v42 = vmul.f32 %v3700_v54, %v750_v61  ;;  %v3727_v36 = vperm.slane %v3688_v22, 6  ;;  %v3730_v21 = vperm.slane %v3685_v16, 6  ;;  %v696_v61 = vpop.permute.xlu2 %695  ;;  %v3771_v54 = vld [vmem:[%s3269_s21 + $0x28] sm:$0xff] }
 0x148   : > { %852 = vmatpush.msra.mxu1 %v555_v55  ;;  %829 = vmatpush.msra.mxu0 %v554_v12  ;;  %v704_v4 = vsel %vm701_vm2, %v3386_v9, %v696_v61 }
 0x149   : > { %961 = vmatpush.msrb.mxu2 %v765_v13  ;;  %984 = vmatpush.msrb.mxu3 %v766_v42  ;;  %5837 = vst [vmem:[#allocation38_spill] sm:$0xff] %v3727_v36  ;;  %v2764_v13 = vld [vmem:[%s3269_s21 + $0x68] ss:$0 sm:$0xff]  ;;  %v2765_v42 = vld [vmem:[%s3269_s21 + $0x60] ss:$0 sm:$0xff] }
 0x14a   : > { %853 = vmatpush.msra.mxu1 %v514_v28  ;;  %5838 = vst [vmem:[#allocation39_spill] sm:$0xff] %v3730_v21  ;;  %v3744_v28 = vld [vmem:[%s5606_s2] sm:$0xff] }
 0x14b   : > { %2590 = vmatmul.msk.f32.vlgmr.msra.gmra.mxu2 %vm808_vm8, %v3744_v28  ;;  %2592 = vmatmul.msk.f32.vlgmr.msra.gmra.mxu3 %vm808_vm8, %v3744_v28 }
 0x14c   : > { %v700_v31 = vpop.permute.xlu1 %699  ;;  %2588 = vmatmul.msk.f32.vlgmr.msra.gmra.mxu1 %vm808_vm8, %v3744_v28 }
 0x14d   : > { %v698_v49 = vpop.permute.xlu0 %697  ;;  %v709_v55 = vsel %vm701_vm2, %v700_v31, %v3527_v10  ;;  %v3747_v10 = vperm.slane %v3505_v60, 0 }
 0x14e   : > { %v702_v47 = vsel %vm701_vm2, %v698_v49, %v700_v31  ;;  %v725_v12 = vmul.f32 %v3727_v36, %v709_v55  ;;  %v3768_v36 = vld [vmem:[%s3269_s21 + $0x20] sm:$0xff] }
 0x14f   : > { %v724_v56 = vmul.f32 %v3730_v21, %v702_v47  ;;  %5839 = vst [vmem:[#allocation40_spill] sm:$0xff] %v3747_v10 }
 0x150   : > { %985 = vmatpush.msrb.mxu3 %v725_v12 }
 0x151   : > { %962 = vmatpush.msrb.mxu2 %v724_v56 }
 0x154   : > { %v778_v31 = vpop.permute.xlu1 %777 }
 0x155   : > { %v3755_v55 = vpop.permute.xlu0 %492  ;;  %v785_v47 = vsel %vm783_vm0, %v778_v31, %v3653_v3  ;;  %v786_v60 = vsel %vm783_vm0, %v3394_v11, %v778_v31  ;;  %v3774_v3 = vperm.slane %v3768_v36, 7  ;;  %v3777_v11 = vperm.slane %v3771_v54, 7 }
 0x156   : > { %v504_v12 = vsel %vm496_vm7, %v3755_v55, %v479_v48  ;;  %v805_v56 = vmul.f32 %v2764_v13, %v785_v47  ;;  %v804_v21 = vmul.f32 %v2765_v42, %v786_v60  ;;  %v3782_v48 = vld [vmem:[%s5606_s2 + $0x8] sm:$0xff]  ;;  %v3792_v42 = vperm.slane %v3688_v22, 5 }
 0x157   : > { %v513_v17 = vmul.f32 %v3747_v10, %v504_v12  ;;  %5840 = vst [vmem:[#allocation41_spill] sm:$0xff] %v3774_v3  ;;  %2591 = vmatmul.msk.f32.gmra.mxu2 %vm808_vm8, %v3782_v48  ;;  %v3795_v31 = vperm.slane %v3768_v36, 6  ;;  %2593 = vmatmul.msk.f32.gmra.mxu3 %vm808_vm8, %v3782_v48  ;;  %v3808_v12 = vperm.slane %v3771_v54, 6 }
 0x158   : > { %937 = vmatpush.msrb.mxu1 %v805_v56  ;;  %5841 = vst [vmem:[#allocation42_spill] sm:$0xff] %v3777_v11  ;;  %v3811_v56 = vperm.slane %v3768_v36, 5 }
 0x159   : > { %830 = vmatpush.msra.mxu0 %v513_v17  ;;  %v655_v17 = vpop.permute.xlu2 %654  ;;  %5843 = vst [vmem:[#allocation44_spill] sm:$0xff] %v3792_v42  ;;  %2589 = vmatmul.msk.f32.gmra.mxu1 %vm808_vm8, %v3782_v48 }
 0x15a   : > { %2586 = vmatmul.msk.f32.vlgmr.msra.gmra.mxu0 %vm808_vm8, %v3744_v28  ;;  %5844 = vst [vmem:[#allocation45_spill] sm:$0xff] %v3795_v31 }
 0x15b   : > { %914 = vmatpush.msrb.mxu0 %v804_v21  ;;  %v3789_v21 = vperm.slane %v3685_v16, 5  ;;  %5845 = vst [vmem:[#allocation46_spill] sm:$0xff] %v3808_v12 }
 0x15c   : > { %v737_v13 = vpop.permute.xlu1 %736  ;;  %5846 = vst [vmem:[#allocation47_spill] sm:$0xff] %v3811_v56 }
 0x15d   : > { %5842 = vst [vmem:[#allocation43_spill] sm:$0xff] %v3789_v21  ;;  %v745_v47 = vsel %vm742_vm1, %v3378_v8, %v737_v13  ;;  %v744_v60 = vsel %vm742_vm1, %v737_v13, %v3629_v37  ;;  %v703_v8 = vsel %vm701_vm2, %v696_v61, %v698_v49  ;;  %v662_v61 = vsel %vm660_vm3, %v655_v17, %v3723_v26 }
 0x15e   : > { %v659_v58 = vpop.permute.xlu0 %658  ;;  %v763_v38 = vmul.f32 %v3774_v3, %v745_v47  ;;  %v764_v20 = vmul.f32 %v3777_v11, %v744_v60  ;;  %v663_v47 = vsel %vm660_vm3, %v3492_v53, %v655_v17  ;;  %v3830_v60 = vperm.slane %v3771_v54, 5 }
 0x15f   : > { %v661_v37 = vsel %vm660_vm3, %v3723_v26, %v659_v58  ;;  %v668_v13 = vsel %vm660_vm3, %v659_v58, %v3577_v43  ;;  %v722_v11 = vmul.f32 %v3795_v31, %v704_v4  ;;  %v723_v43 = vmul.f32 %v3808_v12, %v703_v8 }
 0x160   : > { %5847 = vst [vmem:[#allocation48_spill] sm:$0xff] %v3830_v60  ;;  %915 = vmatpush.msrb.mxu0 %v763_v38  ;;  %938 = vmatpush.msrb.mxu1 %v764_v20  ;;  %v683_v9 = vmul.f32 %v3789_v21, %v661_v37  ;;  %v684_v49 = vmul.f32 %v3792_v42, %v668_v13  ;;  %v3840_v53 = vperm.slane %v3688_v22, 3  ;;  %v3847_v4 = vperm.slane %v3685_v16, 3 }
 0x161   : > { %v681_v20 = vmul.f32 %v3811_v56, %v663_v47  ;;  %v682_v58 = vmul.f32 %v3830_v60, %v662_v61  ;;  %v532_v8 = vpop.permute.xlu2 %531  ;;  %v3864_v13 = vperm.slane %v3685_v16, 2 }
 0x162   : > { %963 = vmatpush.msrb.mxu2 %v683_v9  ;;  %986 = vmatpush.msrb.mxu3 %v684_v49  ;;  %5848 = vst [vmem:[#allocation49_spill] sm:$0xff] %v3840_v53 }
 0x163   : > { %916 = vmatpush.msrb.mxu0 %v722_v11  ;;  %939 = vmatpush.msrb.mxu1 %v723_v43  ;;  %5849 = vst [vmem:[#allocation50_spill] sm:$0xff] %v3847_v4  ;;  %v3874_v43 = vperm.slane %v3768_v36, 3 }
 0x164   : > { %v616_v38 = vpop.permute.xlu1 %615  ;;  %964 = vmatpush.msrb.mxu2 %v3364_v6  ;;  %987 = vmatpush.msrb.mxu3 %v3355_v5  ;;  %5851 = vst [vmem:[#allocation52_spill] sm:$0xff] %v3864_v13 }
 0x165   : > { %917 = vmatpush.msrb.mxu0 %v681_v20  ;;  %940 = vmatpush.msrb.mxu1 %v682_v58  ;;  %v620_v26 = vsel %vm619_vm4, %v616_v38, %v3638_v44  ;;  %v3861_v44 = vperm.slane %v3688_v22, 2  ;;  %5852 = vst [vmem:[#allocation53_spill] sm:$0xff] %v3874_v43  ;;  %v3877_v20 = vperm.slane %v3771_v54, 3 }
 0x166   : > { %v614_v11 = vpop.permute.xlu0 %613  ;;  %v643_v17 = vmul.f32 %v3840_v53, %v620_v26  ;;  %2587 = vmatmul.msk.f32.gmra.mxu0 %vm808_vm8, %v3782_v48 }
 0x167   : > { %v621_v6 = vsel %vm619_vm4, %v614_v11, %v616_v38  ;;  %918 = vmatpush.msrb.mxu0 %v3280_v0  ;;  %941 = vmatpush.msrb.mxu1 %v3399_v14  ;;  %5850 = vst [vmem:[#allocation51_spill] sm:$0xff] %v3861_v44  ;;  %v3883_v38 = vperm.slane %v3688_v22, 1 }
 0x168   : > { %v642_v5 = vmul.f32 %v3847_v4, %v621_v6  ;;  %988 = vmatpush.msrb.mxu3 %v643_v17  ;;  %5853 = vst [vmem:[#allocation54_spill] sm:$0xff] %v3877_v20 }
 0x169   : > { %v489_v61 = vpop.permute.xlu2 %488  ;;  %5855 = vst [vmem:[#allocation56_spill] sm:$0xff] %v3883_v38 }
 0x16a   : > { %965 = vmatpush.msrb.mxu2 %v642_v5 }
 0x16c   : > { %v575_v37 = vpop.permute.xlu1 %574 }
 0x16d   : > { %v579_v47 = vsel %vm578_vm5, %v575_v37, %v3674_v25  ;;  %v3880_v25 = vperm.slane %v3685_v16, 1 }
 0x16e   : > { %v573_v9 = vpop.permute.xlu0 %572  ;;  %v602_v0 = vmul.f32 %v3861_v44, %v579_v47 }
 0x16f   : > { %v580_v14 = vsel %vm578_vm5, %v573_v9, %v575_v37  ;;  %5854 = vst [vmem:[#allocation55_spill] sm:$0xff] %v3880_v25 }
 0x170   : > { %v601_v49 = vmul.f32 %v3864_v13, %v580_v14  ;;  %989 = vmatpush.msrb.mxu3 %v602_v0 }
 0x172   : > { %966 = vmatpush.msrb.mxu2 %v601_v49  ;;  %v3903_v49 = vperm.slane %v3771_v54, 2 }
 0x174   : > { %v612_v58 = vpop.permute.xlu1 %611  ;;  %5857 = vst [vmem:[#allocation58_spill] sm:$0xff] %v3903_v49 }
 0x175   : > { %v623_v26 = vsel %vm619_vm4, %v3470_v45, %v612_v58  ;;  %v622_v17 = vsel %vm619_vm4, %v612_v58, %v614_v11  ;;  %v3900_v11 = vperm.slane %v3768_v36, 2  ;;  %v530_v58 = vpop.permute.xlu2 %529 }
 0x176   : > { %v534_v6 = vpop.permute.xlu0 %533  ;;  %v640_v5 = vmul.f32 %v3874_v43, %v623_v26  ;;  %v641_v37 = vmul.f32 %v3877_v20, %v622_v17  ;;  %v3906_v17 = vperm.slane %v3685_v16, 0 }
 0x177   : > { %v539_v47 = vsel %vm537_vm6, %v532_v8, %v534_v6  ;;  %v538_v0 = vsel %vm537_vm6, %v534_v6, %v3651_v18  ;;  %5856 = vst [vmem:[#allocation57_spill] sm:$0xff] %v3900_v11  ;;  %v3909_v18 = vperm.slane %v3688_v22, 0  ;;  %v541_v22 = vsel %vm537_vm6, %v3619_v27, %v530_v58 }
 0x178   : > { %919 = vmatpush.msrb.mxu0 %v640_v5  ;;  %942 = vmatpush.msrb.mxu1 %v641_v37  ;;  %v560_v14 = vmul.f32 %v3880_v25, %v539_v47  ;;  %v561_v45 = vmul.f32 %v3883_v38, %v538_v0  ;;  %5858 = vst [vmem:[#allocation59_spill] sm:$0xff] %v3906_v17  ;;  %v3917_v37 = vperm.slane %v3768_v36, 1  ;;  %v3920_v47 = vperm.slane %v3771_v54, 1 }
 0x179   : > { %5859 = vst [vmem:[#allocation60_spill] sm:$0xff] %v3909_v18 }
 0x17a   : > { %967 = vmatpush.msrb.mxu2 %v560_v14  ;;  %990 = vmatpush.msrb.mxu3 %v561_v45  ;;  %5860 = vst [vmem:[#allocation61_spill] sm:$0xff] %v3917_v37 }
 0x17b   : > { %5861 = vst [vmem:[#allocation62_spill] sm:$0xff] %v3920_v47 }
 0x17c   : > { %v571_v26 = vpop.permute.xlu1 %570 }
 0x17d   : > { %v582_v6 = vsel %vm578_vm5, %v3602_v59, %v571_v26  ;;  %v581_v5 = vsel %vm578_vm5, %v571_v26, %v573_v9  ;;  %v540_v59 = vsel %vm537_vm6, %v530_v58, %v532_v8  ;;  %v3946_v8 = vperm.slane %v3771_v54, 0 }
 0x17e   : > { %v491_v0 = vpop.permute.xlu0 %490  ;;  %v599_v16 = vmul.f32 %v3900_v11, %v582_v6  ;;  %v600_v14 = vmul.f32 %v3903_v49, %v581_v5  ;;  %v558_v5 = vmul.f32 %v3917_v37, %v541_v22  ;;  %v559_v27 = vmul.f32 %v3920_v47, %v540_v59 }
 0x17f   : > { %v498_v9 = vsel %vm496_vm7, %v489_v61, %v491_v0  ;;  %v497_v45 = vsel %vm496_vm7, %v491_v0, %v3755_v55  ;;  %v3943_v55 = vperm.slane %v3768_v36, 0  ;;  %5863 = vst [vmem:[#allocation64_spill] sm:$0xff] %v3946_v8 }
 0x180   : > { %920 = vmatpush.msrb.mxu0 %v599_v16  ;;  %943 = vmatpush.msrb.mxu1 %v600_v14  ;;  %v519_v26 = vmul.f32 %v3906_v17, %v498_v9  ;;  %v520_v6 = vmul.f32 %v3909_v18, %v497_v45 }
 0x181   : > { %5862 = vst [vmem:[#allocation63_spill] sm:$0xff] %v3943_v55 }
 0x182   : > { %968 = vmatpush.msrb.mxu2 %v519_v26  ;;  %991 = vmatpush.msrb.mxu3 %v520_v6 }
 0x183   : > { %921 = vmatpush.msrb.mxu0 %v558_v5  ;;  %944 = vmatpush.msrb.mxu1 %v559_v27 }
 0x184   : > { %2598 = vmatmul.msk.f32.vlgmr.msrb.gmra.mxu2 %vm808_vm8, %v3744_v28  ;;  %2600 = vmatmul.msk.f32.vlgmr.msrb.gmra.mxu3 %vm808_vm8, %v3744_v28 }
 0x186   : > { %v487_v58 = vpop.permute.xlu0 %486 }
 0x187   : > { %v500_v0 = vsel %vm496_vm7, %v3656_v2, %v487_v58  ;;  %v499_v16 = vsel %vm496_vm7, %v487_v58, %v489_v61 }
 0x188   : > { %v517_v14 = vmul.f32 %v3943_v55, %v500_v0  ;;  %v518_v22 = vmul.f32 %v3946_v8, %v499_v16  ;;  %v4063_v55 = vld [vmem:[#allocation10] sm:$0xff] }
 0x18a   : > { %922 = vmatpush.msrb.mxu0 %v517_v14  ;;  %945 = vmatpush.msrb.mxu1 %v518_v22 }
 0x18b   : > { %2594 = vmatmul.msk.f32.vlgmr.msrb.gmra.mxu0 %vm808_vm8, %v3744_v28  ;;  %2596 = vmatmul.msk.f32.vlgmr.msrb.gmra.mxu1 %vm808_vm8, %v3744_v28 }
 0x18c   : > { %2599 = vmatmul.msk.f32.gmra.mxu2 %vm808_vm8, %v3782_v48  ;;  %2601 = vmatmul.msk.f32.gmra.mxu3 %vm808_vm8, %v3782_v48 }
 0x193   : > { %2595 = vmatmul.msk.f32.gmra.mxu0 %vm808_vm8, %v3782_v48  ;;  %2597 = vmatmul.msk.f32.gmra.mxu1 %vm808_vm8, %v3782_v48 }
 0x1c9   : > { %v3967_v2 = vpop.f32.mrf.mxu1 }
 0x1ca   : > { %v5642_v28 = vmax.f32 %v3967_v2, 0.0 }
 0x1ce   : > { %v3969_v54 = vpop.f32.mrf.mxu2  ;;  %v3971_v36 = vpop.f32.mrf.mxu3 }
 0x1cf   : > { %v5641_v61 = vmax.f32 %v3969_v54, 0.0  ;;  %v5640_v59 = vmax.f32 %v3971_v36, 0.0 }
 0x1d1   : > { %v1021_v48 = vadd.f32 %v5640_v59, %v5641_v61 }
 0x1d3   : > { %1022 = vadd.xlane.f32.xlu1 %v1021_v48 }
 0x1d6   : > { %v3989_v5 = vpop.f32.mrf.mxu1 }
 0x1d7   : > { %v3976_v9 = vpop.f32.mrf.mxu0  ;;  %v5646_v16 = vmax.f32 %v3989_v5, 0.0 }
 0x1d8   : > { %v5643_v45 = vmax.f32 %v3976_v9, 0.0 }
 0x1da   : > { %v1015_v26 = vadd.f32 %v5642_v28, %v5643_v45  ;;  %v3987_v6 = vpop.f32.mrf.mxu2  ;;  %v3992_v58 = vpop.f32.mrf.mxu3 }
 0x1db   : > { %v5645_v27 = vmax.f32 %v3987_v6, 0.0  ;;  %v5644_v0 = vmax.f32 %v3992_v58, 0.0 }
 0x1dc   : > { %1016 = vadd.xlane.f32.xlu2 %v1015_v26 }
 0x1dd   : > { %v1024_v14 = vadd.f32 %v5644_v0, %v5645_v27 }
 0x1e3   : > { %v4000_v22 = vpop.f32.mrf.mxu0 }
 0x1e4   : > { %v5647_v48 = vmax.f32 %v4000_v22, 0.0  ;;  %1025 = vadd.xlane.f32.xlu2 %v1024_v14 }
 0x1e6   : > { %v1018_v26 = vadd.f32 %v5646_v16, %v5647_v48 }
 0x1e8   : > { %1019 = vadd.xlane.f32.xlu1 %v1018_v26 }
 0x207   : > { %v4007_v59 = vpop.f32.mrf.mxu2  ;;  %v4009_v61 = vpop.f32.mrf.mxu3 }
 0x208   : > { %v4011_v28 = vpop.f32.mrf.mxu0  ;;  %v4013_v45 = vpop.f32.mrf.mxu1  ;;  %v5659_v0 = vmax.f32 %v4007_v59, 0.0  ;;  %v5658_v27 = vmax.f32 %v4009_v61, 0.0 }
 0x209   : > { %v5672_v38 = vmax.f32 %v4013_v45, 0.0 }
 0x20a   : > { %v1033_v14 = vadd.f32 %v5658_v27, %v5659_v0  ;;  %v5673_v0 = vmax.f32 %v4011_v28, 0.0 }
 0x20c   : > { %1034 = vadd.xlane.f32.xlu1 %v1033_v14  ;;  %v1027_v44 = vadd.f32 %v5672_v38, %v5673_v0 }
 0x20f   : > { %v4021_v16 = vpop.f32.mrf.mxu2  ;;  %v4023_v26 = vpop.f32.mrf.mxu3 }
 0x210   : > { %v4025_v48 = vpop.f32.mrf.mxu0  ;;  %v4027_v17 = vpop.f32.mrf.mxu1  ;;  %v5669_v25 = vmax.f32 %v4021_v16, 0.0  ;;  %v5668_v13 = vmax.f32 %v4023_v26, 0.0 }
 0x211   : > { %v5671_v4 = vmax.f32 %v4025_v48, 0.0  ;;  %v5670_v18 = vmax.f32 %v4027_v17, 0.0  ;;  %v5875_v60 = vmax.f32 %v4027_v17, 0.0 }
 0x212   : > { %v1036_v14 = vadd.f32 %v5668_v13, %v5669_v25  ;;  %v473_v13 = vld [vmem:[%s5608_s4 + $0x8] sm:$0xff]  ;;  %v5686_v25 = vmov 0  }
 0x213   : > { %v1030_v27 = vadd.f32 %v5670_v18, %v5671_v4  ;;  %2720 = vset.pattern.permute.xlu1 %v5686_v25  ;;  %2719 = vset.pattern.permute.xlu0 %v5686_v25 }
 0x214   : > { %1037 = vadd.xlane.f32.xlu2 %v1036_v14  ;;  %v5682_v14 = vmov 1  }
 0x215   : > { %1031 = vadd.xlane.f32.xlu0 %v1030_v27  ;;  %v472_v27 = vld [vmem:[%s5608_s4] sm:$0xff]  ;;  %2721 = vset.pattern.permute.xlu2 %v5682_v14 }
 0x21d   : > { %1028 = vadd.xlane.f32.xlu0 %v1027_v44 }
 0x225   : > { %1230 = vperm.xlu1 %2720, %v473_v13  }
 0x22c   : > { %1250 = vperm.xlu2 %2721, %v472_v27  }
 0x22d   : > { %2722 = vset.pattern.permute.xlu1 %v5682_v14 }
 0x22e   : > { %1254 = vperm.xlu1 %2722, %v473_v13   ;;  %v4068_v13 = vld [vmem:[#allocation10 + $0x8] sm:$0xff] }
 0x231   : > { %1225 = vperm.xlu0 %2719, %v472_v27  }
 0x234   : > { %2723 = vset.pattern.permute.xlu2 %v5686_v25 }
 0x246   : > { %v1023_v53 = vpop.xlane.xlu1 %1022 }
 0x24f   : > { %v1017_v21 = vpop.xlane.xlu2 %1016 }
 0x250   : > { %v1040_v27 = vsel %vm1039_vm10, %v1017_v21, %v1023_v53 }
 0x257   : > { %v1026_v44 = vpop.xlane.xlu2 %1025 }
 0x25b   : > { %v1020_v18 = vpop.xlane.xlu1 %1019 }
 0x25c   : > { %v1041_v38 = vsel %vm1039_vm10, %v1020_v18, %v1026_v44  ;;  %v5864_v18 = vmov 0   ;;  %v5867_v44 = vmax.f32 %v3967_v2, 0.0 }
 0x27f   : > { %v1035_v42 = vpop.xlane.xlu1 %1034 }
 0x287   : > { %v1038_v4 = vpop.xlane.xlu2 %1037 }
 0x288   : > { %v1032_v0 = vpop.xlane.xlu0 %1031 }
 0x289   : > { %v1044_v47 = vsel %vm5709_vm9, %v1041_v38, %v1032_v0  ;;  %v5866_v0 = vmax.f32 %v3976_v9, 0.0  ;;  %v5869_v9 = vmax.f32 %v3971_v36, 0.0  ;;  %v5871_v36 = vmax.f32 %v4013_v45, 0.0 }
 0x28a   : > { %v1047_v8 = vsel %vm5708_vm11, %v1044_v47, %v1038_v4  ;;  %v5690_v4 = vmov 3  }
 0x28b   : > { %1069 = vmatpush.msra.mxu0 %v1047_v8  ;;  %2726 = vset.pattern.permute.xlu0 %v5690_v4 }
 0x28f   : > { %v4080_v47 = vpop.permute.xlu2 %1250 }
 0x290   : > { %v1029_v49 = vpop.xlane.xlu0 %1028 }
 0x291   : > { %v1043_v14 = vsel %vm5709_vm9, %v1040_v27, %v1029_v49 }
 0x292   : > { %v1046_v25 = vsel %vm5708_vm11, %v1043_v14, %v1035_v42  ;;  %v5865_v42 = vmov 1  }
 0x293   : > { %1070 = vmatpush.msra.mxu0 %v1046_v25  ;;  %v5688_v25 = vmov 2  }
 0x294   : > { %2602 = vmatmul.msk.f32.vlgmr.msra.gmra.mxu0 %vm1048_vm12, %v4063_v55 }
 0x29c   : > { %2603 = vmatmul.msk.f32.gmra.mxu0 %vm1048_vm12, %v4068_v13 }
 0x311   : > { %v1072_v21 = vpop.f32.mrf.mxu0 }
 0x312   : > { %v1078_v53 = vmul.f32 0.001953125, %v1072_v21 }
 0x314   : > { %1149 = vperm.xlu0 %2726, %v1078_v53   ;;  %1082 = vperm.xlu2 %2723, %v1078_v53  }
 0x319   : > { %v1075_v38 = vpop.f32.mrf.mxu0 }
 0x31a   : > { %v1079_v49 = vmul.f32 0.001953125, %v1075_v38 }
 0x31c   : > { %2727 = vset.pattern.permute.xlu0 %v5864_v18  ;;  %2724 = vset.pattern.permute.xlu2 %v5865_v42 }
 0x31d   : > { %1109 = vperm.xlu1 %2722, %v1079_v49   ;;  %1105 = vperm.xlu2 %2724, %v1078_v53  }
 0x31e   : > { %1087 = vperm.xlu0 %2727, %v1079_v49  }
 0x325   : > { %2728 = vset.pattern.permute.xlu1 %v5690_v4  ;;  %2725 = vset.pattern.permute.xlu2 %v5688_v25 }
 0x326   : > { %1153 = vperm.xlu1 %2728, %v1079_v49   ;;  %1127 = vperm.xlu2 %2725, %v1078_v53  }
 0x327   : > { %2734 = vset.pattern.permute.xlu0 %v5865_v42 }
 0x32e   : > { %1131 = vperm.xlu2 %2725, %v1079_v49   ;;  %2731 = vset.pattern.permute.xlu1 %v5688_v25  ;;  %v5868_v25 = vmax.f32 %v3969_v54, 0.0  ;;  %v5870_v54 = vmax.f32 %v4011_v28, 0.0  ;;  %v5873_v28 = vmax.f32 %v4009_v61, 0.0 }
 0x336   : > { %2729 = vset.pattern.permute.xlu2 %v5864_v18 }
 0x36e   : > { %v1083_v8 = vpop.permute.xlu2 %1082 }
 0x36f   : > { %v4084_v14 = vsub.f32 %v5866_v0, %v1083_v8  ;;  %v4088_v27 = vsub.f32 %v5867_v44, %v1083_v8  ;;  %v4106_v44 = vpop.permute.xlu1 %1230 }
 0x371   : > { %v1094_v21 = vmul.f32 %v4084_v14, %v4084_v14  ;;  %v1095_v53 = vmul.f32 %v4088_v27, %v4088_v27 }
 0x373   : > { %v1098_v38 = vadd.f32 %v1095_v53, %v1094_v21  ;;  %v4108_v21 = vpop.permute.xlu0 %1225 }
 0x375   : > { %1099 = vadd.xlane.f32.xlu1 %v1098_v38 }
 0x377   : > { %v1106_v49 = vpop.permute.xlu2 %1105  ;;  %v4122_v37 = vpop.permute.xlu1 %1254 }
 0x378   : > { %v4096_v4 = vsub.f32 %v5868_v25, %v1106_v49  ;;  %v4100_v0 = vsub.f32 %v5869_v9, %v1106_v49 }
 0x37a   : > { %v1116_v2 = vmul.f32 %v4096_v4, %v4096_v4  ;;  %v1117_v8 = vmul.f32 %v4100_v0, %v4100_v0 }
 0x37c   : > { %v1120_v20 = vadd.f32 %v1117_v8, %v1116_v2 }
 0x37e   : > { %1121 = vadd.xlane.f32.xlu1 %v1120_v20  ;;  %v5872_v20 = vmax.f32 %v4007_v59, 0.0 }
 0x380   : > { %v1128_v53 = vpop.permute.xlu2 %1127 }
 0x381   : > { %v4112_v25 = vsub.f32 %v5870_v54, %v1128_v53  ;;  %v4116_v38 = vsub.f32 %v5871_v36, %v1128_v53  ;;  %v5874_v53 = vmax.f32 %v4025_v48, 0.0 }
 0x383   : > { %v1138_v49 = vmul.f32 %v4112_v25, %v4112_v25  ;;  %v1139_v9 = vmul.f32 %v4116_v38, %v4116_v38 }
 0x385   : > { %v1142_v2 = vadd.f32 %v1139_v9, %v1138_v49 }
 0x386   : > { %v1150_v8 = vpop.permute.xlu0 %1149 }
 0x387   : > { %v4126_v11 = vsub.f32 %v5872_v20, %v1150_v8  ;;  %v4130_v54 = vsub.f32 %v5873_v28, %v1150_v8  ;;  %1143 = vadd.xlane.f32.xlu1 %v1142_v2  ;;  %v5877_v20 = vmax.f32 %v3992_v58, 0.0 }
 0x388   : > { %v1132_v45 = vpop.permute.xlu2 %1131 }
 0x389   : > { %v4134_v36 = vsub.f32 %v5874_v53, %v1132_v45  ;;  %v4138_v43 = vsub.f32 %v5875_v60, %v1132_v45  ;;  %v1160_v49 = vmul.f32 %v4126_v11, %v4126_v11  ;;  %v1161_v59 = vmul.f32 %v4130_v54, %v4130_v54 }
 0x38a   : > { %v5876_v60 = vmax.f32 %v3987_v6, 0.0  ;;  %v5878_v53 = vmax.f32 %v4000_v22, 0.0 }
 0x38b   : > { %v1164_v9 = vadd.f32 %v1161_v59, %v1160_v49  ;;  %v1140_v61 = vmul.f32 %v4134_v36, %v4134_v36  ;;  %v1141_v2 = vmul.f32 %v4138_v43, %v4138_v43  ;;  %v5879_v59 = vmax.f32 %v3989_v5, 0.0 }
 0x38c   : > { %v5880_v5 = vmax.f32 %v4021_v16, 0.0 }
 0x38d   : > { %1165 = vadd.xlane.f32.xlu2 %v1164_v9  ;;  %v1145_v48 = vadd.f32 %v1141_v2, %v1140_v61 }
 0x38f   : > { %v1110_v8 = vpop.permute.xlu1 %1109  ;;  %1146 = vadd.xlane.f32.xlu0 %v1145_v48 }
 0x390   : > { %v4150_v17 = vsub.f32 %v5876_v60, %v1110_v8  ;;  %v4154_v28 = vsub.f32 %v5877_v20, %v1110_v8  ;;  %v1088_v45 = vpop.permute.xlu0 %1087  ;;  %v5881_v60 = vmax.f32 %v4023_v26, 0.0 }
 0x391   : > { %v4158_v49 = vsub.f32 %v5878_v53, %v1088_v45  ;;  %v4162_v12 = vsub.f32 %v5879_v59, %v1088_v45 }
 0x392   : > { %v1118_v9 = vmul.f32 %v4150_v17, %v4150_v17  ;;  %v1119_v6 = vmul.f32 %v4154_v28, %v4154_v28 }
 0x393   : > { %v1096_v58 = vmul.f32 %v4158_v49, %v4158_v49  ;;  %v1097_v61 = vmul.f32 %v4162_v12, %v4162_v12 }
 0x394   : > { %v1123_v2 = vadd.f32 %v1119_v6, %v1118_v9 }
 0x395   : > { %v1101_v22 = vadd.f32 %v1097_v61, %v1096_v58 }
 0x396   : > { %1124 = vadd.xlane.f32.xlu2 %v1123_v2 }
 0x397   : > { %1102 = vadd.xlane.f32.xlu1 %v1101_v22 }
 0x398   : > { %v1154_v48 = vpop.permute.xlu1 %1153 }
 0x399   : > { %v4174_v8 = vsub.f32 %v5880_v5, %v1154_v48  ;;  %v4178_v20 = vsub.f32 %v5881_v60, %v1154_v48 }
 0x39b   : > { %v1162_v45 = vmul.f32 %v4174_v8, %v4174_v8  ;;  %v1163_v53 = vmul.f32 %v4178_v20, %v4178_v20 }
 0x39d   : > { %v1167_v59 = vadd.f32 %v1163_v53, %v1162_v45 }
 0x39f   : > { %1168 = vadd.xlane.f32.xlu2 %v1167_v59 }
 0x3e8   : > { %v1100_v9 = vpop.xlane.xlu1 %1099 }
 0x3f1   : > { %v1122_v6 = vpop.xlane.xlu1 %1121 }
 0x3f2   : > { %v1170_v60 = vsel %vm1039_vm10, %v1100_v9, %v1122_v6 }
 0x3fa   : > { %v1144_v61 = vpop.xlane.xlu1 %1143 }
 0x3fb   : > { %v1172_v31 = vsel %vm5709_vm9, %v1170_v60, %v1144_v61 }
 0x400   : > { %v1166_v58 = vpop.xlane.xlu2 %1165 }
 0x401   : > { %v1174_v45 = vsel %vm5708_vm11, %v1172_v31, %v1166_v58 }
 0x402   : > { %v1147_v5 = vpop.xlane.xlu0 %1146 }
 0x409   : > { %v1125_v2 = vpop.xlane.xlu2 %1124 }
 0x40a   : > { %v1103_v16 = vpop.xlane.xlu1 %1102 }
 0x40b   : > { %v1171_v22 = vsel %vm1039_vm10, %v1103_v16, %v1125_v2 }
 0x40c   : > { %v1173_v48 = vsel %vm5709_vm9, %v1171_v22, %v1147_v5 }
 0x412   : > { %v1169_v26 = vpop.xlane.xlu2 %1168 }
 0x413   : > { %v1175_v56 = vsel %vm5708_vm11, %v1173_v48, %v1169_v26 }
 0x414   : > { %1190 = vmatpush.msra.mxu1 %v1175_v56 }
 0x416   : > { %1191 = vmatpush.msra.mxu1 %v1174_v45 }
 0x417   : > { %2604 = vmatmul.msk.f32.vlgmr.msra.gmra.mxu1 %vm1048_vm12, %v4063_v55 }
 0x41f   : > { %2605 = vmatmul.msk.f32.gmra.mxu1 %vm1048_vm12, %v4068_v13 }
 0x494   : > { %v1193_v53 = vpop.f32.mrf.mxu1 }
 0x495   : > { %v1199_v59 = vmul.f32 0.001953125, %v1193_v53 }
 0x497   : > { %v1201_v2 = vadd.f32 1e-05, %v1199_v59 }
 0x499   : > { %2766 = vrsqrt.f32 %v1201_v2  ;;  %vm1209_vm14 = vweird.f32 %v1201_v2 }
 0x49c   : > { %v1196_v16 = vpop.f32.mrf.mxu1 }
 0x49d   : > { %v1200_v9 = vmul.f32 0.001953125, %v1196_v16 }
 0x49f   : > { %v2767_v6 = vpop.eup %2766  ;;  %v1202_v22 = vadd.f32 1e-05, %v1200_v9 }
 0x4a0   : > { %v1204_v5 = vmul.f32 %v2767_v6, %v1201_v2  ;;  %vm1210_vm13 = vweird.f32 %v2767_v6 }
 0x4a1   : > { %2768 = vrsqrt.f32 %v1202_v22  ;;  %vm1211_vm15 = vmor %vm1209_vm14, %vm1210_vm13  ;;  %vm1219_vm8 = vweird.f32 %v1202_v22 }
 0x4a2   : > { %v1205_v56 = vmul.f32 %v2767_v6, %v1204_v5  ;;  %v5882_v5 = vmov 3  }
 0x4a4   : > { %v1206_v61 = vmul.f32 0.5, %v1205_v56 }
 0x4a6   : > { %v1207_v31 = vsub.f32 1.5, %v1206_v61 }
 0x4a7   : > { %v2769_v58 = vpop.eup %2768 }
 0x4a8   : > { %v1208_v26 = vmul.f32 %v2767_v6, %v1207_v31  ;;  %v1214_v55 = vmul.f32 %v2769_v58, %v1202_v22  ;;  %vm1220_vm11 = vweird.f32 %v2769_v58 }
 0x4a9   : > { %vm1221_vm9 = vmor %vm1219_vm8, %vm1220_vm11 }
 0x4aa   : > { %v1215_v13 = vmul.f32 %v2769_v58, %v1214_v55  ;;  %v1212_v48 = vsel %vm1211_vm15, %v2767_v6, %v1208_v26 }
 0x4ab   : > { %v1233_v60 = vmul.f32 %v4108_v21, %v1212_v48  ;;  %v5883_v21 = vmov 2  }
 0x4ac   : > { %v1216_v45 = vmul.f32 0.5, %v1215_v13 }
 0x4ad   : > { %1278 = vperm.xlu1 %2731, %v1233_v60   ;;  %1237 = vperm.xlu2 %2729, %v1233_v60  }
 0x4ae   : > { %v1217_v53 = vsub.f32 1.5, %v1216_v45 }
 0x4b0   : > { %v1218_v59 = vmul.f32 %v2769_v58, %v1217_v53 }
 0x4b2   : > { %v1222_v16 = vsel %vm1221_vm9, %v2769_v58, %v1218_v59 }
 0x4b3   : > { %v1234_v9 = vmul.f32 %v4106_v44, %v1222_v16 }
 0x4b5   : > { %2732 = vset.pattern.permute.xlu1 %v5882_v5  ;;  %2730 = vset.pattern.permute.xlu2 %v5865_v42 }
 0x4b6   : > { %1266 = vperm.xlu0 %2734, %v1234_v9   ;;  %1294 = vperm.xlu1 %2732, %v1233_v60  }
 0x4b7   : > { %1262 = vperm.xlu2 %2730, %v1233_v60  }
 0x4be   : > { %2733 = vset.pattern.permute.xlu1 %v5864_v18  ;;  %2737 = vset.pattern.permute.xlu0 %v5864_v18 }
 0x4bf   : > { %2735 = vset.pattern.permute.xlu2 %v5883_v21  ;;  %1242 = vperm.xlu1 %2733, %v1234_v9  }
 0x4c0   : > { %1282 = vperm.xlu2 %2735, %v1234_v9  }
 0x4c7   : > { %2738 = vset.pattern.permute.xlu1 %v5865_v42 }
 0x4c8   : > { %2736 = vset.pattern.permute.xlu2 %v5882_v5 }
 0x4c9   : > { %1298 = vperm.xlu2 %2736, %v1234_v9  }
 0x4d1   : > { %2739 = vset.pattern.permute.xlu2 %v5883_v21 }
 0x507   : > { %v1238_v44 = vpop.permute.xlu2 %1237 }
 0x508   : > { %v1245_v2 = vmul.f32 %v1238_v44, %v4084_v14  ;;  %v1246_v6 = vmul.f32 %v1238_v44, %v4088_v27 }
 0x50a   : > { %v4207_v22 = vadd.f32 %v4080_v47, %v1245_v2  ;;  %v4210_v56 = vadd.f32 %v4080_v47, %v1246_v6 }
 0x50c   : > { %1315 = vrot.lane.b32.xlu2 %v4210_v56, %s3039_s0  ;;  %1311 = vrot.lane.b32.xlu0 %v4207_v22, %s3039_s0 }
 0x511   : > { %v1263_v61 = vpop.permute.xlu2 %1262 }
 0x512   : > { %v1269_v31 = vmul.f32 %v1263_v61, %v4096_v4  ;;  %v1270_v58 = vmul.f32 %v1263_v61, %v4100_v0 }
 0x514   : > { %v4219_v14 = vadd.f32 %v1269_v31, %v4080_v47  ;;  %v4222_v27 = vadd.f32 %v1270_v58, %v4080_v47 }
 0x516   : > { %5884 = vst [vmem:[#allocation65_spill] sm:$0xff] %v4219_v14  ;;  %1323 = vrot.lane.b32.xlu0 %v4222_v27, %s3039_s0  ;;  %1319 = vrot.lane.b32.xlu1 %v4219_v14, %s3039_s0 }
 0x517   : > { %5885 = vst [vmem:[#allocation66_spill] sm:$0xff] %v4222_v27 }
 0x51f   : > { %v1279_v26 = vpop.permute.xlu1 %1278 }
 0x520   : > { %v1285_v55 = vmul.f32 %v1279_v26, %v4112_v25  ;;  %v1286_v13 = vmul.f32 %v1279_v26, %v4116_v38 }
 0x522   : > { %v4231_v4 = vadd.f32 %v1285_v55, %v4080_v47  ;;  %v4234_v0 = vadd.f32 %v1286_v13, %v4080_v47 }
 0x524   : > { %5886 = vst [vmem:[#allocation67_spill] sm:$0xff] %v4231_v4  ;;  %1327 = vrot.lane.b32.xlu2 %v4231_v4, %s3039_s0  ;;  %1331 = vrot.lane.b32.xlu1 %v4234_v0, %s3039_s0 }
 0x525   : > { %5887 = vst [vmem:[#allocation68_spill] sm:$0xff] %v4234_v0 }
 0x528   : > { %v1295_v48 = vpop.permute.xlu1 %1294  ;;  %v4324_v59 = vpop.permute.xlu0 %1266 }
 0x529   : > { %v1301_v60 = vmul.f32 %v1295_v48, %v4126_v11  ;;  %v1302_v45 = vmul.f32 %v1295_v48, %v4130_v54  ;;  %v4290_v11 = vpop.permute.xlu2 %1282 }
 0x52b   : > { %v4243_v25 = vadd.f32 %v1301_v60, %v4080_v47  ;;  %v4246_v38 = vadd.f32 %v1302_v45, %v4080_v47 }
 0x52c   : > { %1375 = vrot.lane.b32.xlu1 %v4207_v22, %s3038_s19 }
 0x52d   : > { %5888 = vst [vmem:[#allocation69_spill] sm:$0xff] %v4243_v25  ;;  %1339 = vrot.lane.b32.xlu2 %v4246_v38, %s3039_s0  ;;  %1335 = vrot.lane.b32.xlu0 %v4243_v25, %s3039_s0 }
 0x52e   : > { %5889 = vst [vmem:[#allocation70_spill] sm:$0xff] %v4246_v38 }
 0x531   : > { %v4304_v47 = vpop.permute.xlu2 %1298  ;;  %v1243_v16 = vpop.permute.xlu1 %1242 }
 0x532   : > { %v1248_v31 = vmul.f32 %v1243_v16, %v4162_v12  ;;  %v1287_v12 = vmul.f32 %v4290_v11, %v4134_v36  ;;  %v1304_v36 = vmul.f32 %v4304_v47, %v4178_v20  ;;  %v1271_v20 = vmul.f32 %v4324_v59, %v4150_v17 }
 0x533   : > { %v1288_v17 = vmul.f32 %v4290_v11, %v4138_v43  ;;  %v1247_v43 = vmul.f32 %v1243_v16, %v4158_v49  ;;  %v1272_v16 = vmul.f32 %v4324_v59, %v4154_v28  ;;  %v1303_v28 = vmul.f32 %v4304_v47, %v4174_v8 }
 0x534   : > { %1387 = vrot.lane.b32.xlu1 %v4222_v27, %s3038_s19  ;;  %v4358_v55 = vadd.f32 %v4122_v37, %v1248_v31  ;;  %v4375_v45 = vadd.f32 %v1287_v12, %v4122_v37  ;;  %v4392_v12 = vadd.f32 %v1304_v36, %v4122_v37  ;;  %v4409_v36 = vadd.f32 %v1271_v20, %v4122_v37 }
 0x535   : > { %1383 = vrot.lane.b32.xlu2 %v4219_v14, %s3038_s19  ;;  %1379 = vrot.lane.b32.xlu0 %v4210_v56, %s3038_s19  ;;  %v4426_v20 = vadd.f32 %v1288_v17, %v4122_v37 }
 0x536   : > { %5900 = vst [vmem:[#allocation81_spill] sm:$0xff] %v4375_v45 }
 0x537   : > { %5903 = vst [vmem:[#allocation84_spill] sm:$0xff] %v4392_v12 }
 0x538   : > { %5906 = vst [vmem:[#allocation87_spill] sm:$0xff] %v4409_v36 }
 0x539   : > { %5907 = vst [vmem:[#allocation88_spill] sm:$0xff] %v4426_v20 }
 0x53c   : > { %1399 = vrot.lane.b32.xlu1 %v4243_v25, %s3038_s19 }
 0x53d   : > { %1395 = vrot.lane.b32.xlu2 %v4234_v0, %s3038_s19  ;;  %1391 = vrot.lane.b32.xlu0 %v4231_v4, %s3038_s19 }
 0x544   : > { %1443 = vrot.lane.b32.xlu1 %v4210_v56, %s3037_s18 }
 0x545   : > { %1439 = vrot.lane.b32.xlu2 %v4207_v22, %s3037_s18  ;;  %1403 = vrot.lane.b32.xlu0 %v4246_v38, %s3038_s19 }
 0x54c   : > { %1455 = vrot.lane.b32.xlu1 %v4231_v4, %s3037_s18 }
 0x54d   : > { %1451 = vrot.lane.b32.xlu2 %v4222_v27, %s3037_s18  ;;  %1447 = vrot.lane.b32.xlu0 %v4219_v14, %s3037_s18 }
 0x554   : > { %1763 = vrot.lane.b32.xlu1 %v4210_v56, %s3032_s22 }
 0x555   : > { %1699 = vrot.lane.b32.xlu2 %v4210_v56, %s3033_s10  ;;  %1459 = vrot.lane.b32.xlu0 %v4234_v0, %s3037_s18 }
 0x55c   : > { %1695 = vrot.lane.b32.xlu1 %v4207_v22, %s3033_s10 }
 0x55d   : > { %1571 = vrot.lane.b32.xlu2 %v4210_v56, %s3035_s12  ;;  %1759 = vrot.lane.b32.xlu0 %v4207_v22, %s3032_s22 }
 0x564   : > { %1635 = vrot.lane.b32.xlu1 %v4210_v56, %s3034_s23 }
 0x565   : > { %1531 = vrot.lane.b32.xlu2 %v4246_v38, %s3036_s26  ;;  %1631 = vrot.lane.b32.xlu0 %v4207_v22, %s3034_s23 }
 0x566   : > { %v4312_v54 = vpop.permute.xlu2 %1315 }
 0x567   : > { %5890 = vst [vmem:[#allocation71_spill] sm:$0xff] %v4312_v54 }
 0x56c   : > { %1567 = vrot.lane.b32.xlu1 %v4207_v22, %s3035_s12 }
 0x56d   : > { %1467 = vrot.lane.b32.xlu2 %v4246_v38, %s3037_s18  ;;  %1767 = vrot.lane.b32.xlu0 %v4219_v14, %s3032_s22 }
 0x574   : > { %1639 = vrot.lane.b32.xlu1 %v4219_v14, %s3034_s23 }
 0x575   : > { %1651 = vrot.lane.b32.xlu2 %v4234_v0, %s3034_s23  ;;  %1703 = vrot.lane.b32.xlu0 %v4219_v14, %s3033_s10 }
 0x57c   : > { %1771 = vrot.lane.b32.xlu1 %v4222_v27, %s3032_s22 }
 0x57d   : > { %1583 = vrot.lane.b32.xlu2 %v4231_v4, %s3035_s12  ;;  %1711 = vrot.lane.b32.xlu0 %v4231_v4, %s3033_s10 }
 0x57e   : > { %v4320_v53 = vpop.permute.xlu2 %1327  ;;  %v4334_v44 = vpop.permute.xlu0 %1311 }
 0x57f   : > { %5891 = vst [vmem:[#allocation72_spill] sm:$0xff] %v4320_v53 }
 0x580   : > { %5893 = vst [vmem:[#allocation74_spill] sm:$0xff] %v4334_v44 }
 0x584   : > { %1575 = vrot.lane.b32.xlu1 %v4219_v14, %s3035_s12 }
 0x585   : > { %1643 = vrot.lane.b32.xlu2 %v4222_v27, %s3034_s23  ;;  %1587 = vrot.lane.b32.xlu0 %v4234_v0, %s3035_s12 }
 0x587   : > { %v4330_v9 = vpop.permute.xlu2 %1339 }
 0x588   : > { %5892 = vst [vmem:[#allocation73_spill] sm:$0xff] %v4330_v9  ;;  %v4340_v2 = vpop.permute.xlu1 %1319  ;;  %v4353_v58 = vpop.permute.xlu0 %1323 }
 0x589   : > { %5894 = vst [vmem:[#allocation75_spill] sm:$0xff] %v4340_v2 }
 0x58a   : > { %5897 = vst [vmem:[#allocation78_spill] sm:$0xff] %v4353_v58 }
 0x58c   : > { %1503 = vrot.lane.b32.xlu1 %v4207_v22, %s3036_s26 }
 0x58d   : > { %1719 = vrot.lane.b32.xlu2 %v4243_v25, %s3033_s10  ;;  %1511 = vrot.lane.b32.xlu0 %v4219_v14, %s3036_s26 }
 0x58f   : > { %v4342_v6 = vpop.permute.xlu2 %1383 }
 0x590   : > { %5895 = vst [vmem:[#allocation76_spill] sm:$0xff] %v4342_v6 }
 0x594   : > { %1715 = vrot.lane.b32.xlu1 %v4234_v0, %s3033_s10 }
 0x595   : > { %1519 = vrot.lane.b32.xlu2 %v4231_v4, %s3036_s26  ;;  %1595 = vrot.lane.b32.xlu0 %v4246_v38, %s3035_s12 }
 0x596   : > { %v4350_v61 = vpop.permute.xlu1 %1331 }
 0x597   : > { %5896 = vst [vmem:[#allocation77_spill] sm:$0xff] %v4350_v61  ;;  %v4355_v26 = vpop.permute.xlu2 %1395 }
 0x598   : > { %5898 = vst [vmem:[#allocation79_spill] sm:$0xff] %v4355_v26 }
 0x59c   : > { %1647 = vrot.lane.b32.xlu1 %v4231_v4, %s3034_s23 }
 0x59d   : > { %1655 = vrot.lane.b32.xlu2 %v4243_v25, %s3034_s23  ;;  %1317 = vrot.lane.b32.xlu0 %v4358_v55, %s3039_s0 }
 0x59e   : > { %v4366_v13 = vpop.permute.xlu1 %1375 }
 0x59f   : > { %v4370_v48 = vpop.permute.xlu2 %1439  ;;  %v4372_v60 = vpop.permute.xlu0 %1335 }
 0x5a0   : > { %5899 = vst [vmem:[#allocation80_spill] sm:$0xff] %v4372_v60 }
 0x5a4   : > { %1507 = vrot.lane.b32.xlu1 %v4210_v56, %s3036_s26 }
 0x5a5   : > { %1775 = vrot.lane.b32.xlu2 %v4231_v4, %s3032_s22  ;;  %1329 = vrot.lane.b32.xlu0 %v4375_v45, %s3039_s0  ;;  %v4448_v4 = vadd.f32 %v4122_v37, %v1247_v43  ;;  %v4465_v43 = vadd.f32 %v1272_v16, %v4122_v37  ;;  %v4482_v16 = vadd.f32 %v1303_v28, %v4122_v37 }
 0x5a6   : > { %v4383_v31 = vpop.permute.xlu1 %1387 }
 0x5a7   : > { %5901 = vst [vmem:[#allocation82_spill] sm:$0xff] %v4383_v31  ;;  %v4387_v42 = vpop.permute.xlu2 %1451  ;;  %v4389_v21 = vpop.permute.xlu0 %1379 }
 0x5a8   : > { %5902 = vst [vmem:[#allocation83_spill] sm:$0xff] %v4387_v42 }
 0x5a9   : > { %5912 = vst [vmem:[#allocation93_spill] sm:$0xff] %v4465_v43 }
 0x5aa   : > { %5916 = vst [vmem:[#allocation97_spill] sm:$0xff] %v4482_v16 }
 0x5ac   : > { %1707 = vrot.lane.b32.xlu1 %v4222_v27, %s3033_s10 }
 0x5ad   : > { %1523 = vrot.lane.b32.xlu2 %v4234_v0, %s3036_s26  ;;  %1341 = vrot.lane.b32.xlu0 %v4392_v12, %s3039_s0 }
 0x5ae   : > { %v4400_v18 = vpop.permute.xlu1 %1399 }
 0x5af   : > { %5904 = vst [vmem:[#allocation85_spill] sm:$0xff] %v4400_v18  ;;  %v4404_v5 = vpop.permute.xlu2 %1699  ;;  %v4406_v60 = vpop.permute.xlu0 %1391 }
 0x5b0   : > { %5905 = vst [vmem:[#allocation86_spill] sm:$0xff] %v4406_v60 }
 0x5b4   : > { %1579 = vrot.lane.b32.xlu1 %v4222_v27, %s3035_s12 }
 0x5b5   : > { %1321 = vrot.lane.b32.xlu2 %v4409_v36, %s3039_s0  ;;  %1385 = vrot.lane.b32.xlu0 %v4409_v36, %s3038_s19 }
 0x5b6   : > { %v4417_v18 = vpop.permute.xlu1 %1443 }
 0x5b7   : > { %v4421_v26 = vpop.permute.xlu2 %1571  ;;  %v4423_v61 = vpop.permute.xlu0 %1403 }
 0x5bc   : > { %1515 = vrot.lane.b32.xlu1 %v4222_v27, %s3036_s26 }
 0x5bd   : > { %1333 = vrot.lane.b32.xlu2 %v4426_v20, %s3039_s0  ;;  %1397 = vrot.lane.b32.xlu0 %v4426_v20, %s3038_s19 }
 0x5be   : > { %v4434_v53 = vpop.permute.xlu1 %1455 }
 0x5bf   : > { %5908 = vst [vmem:[#allocation89_spill] sm:$0xff] %v4434_v53  ;;  %v4437_v11 = vpop.permute.xlu2 %1531  ;;  %v4439_v60 = vpop.permute.xlu0 %1447 }
 0x5c0   : > { %5909 = vst [vmem:[#allocation90_spill] sm:$0xff] %v4439_v60  ;;  %v4445_v17 = vsel %vm578_vm5, %v4439_v60, %v4387_v42 }
 0x5c1   : > { %5910 = vst [vmem:[#allocation91_spill] sm:$0xff] %v4445_v17 }
 0x5c4   : > { %1723 = vrot.lane.b32.xlu1 %v4246_v38, %s3033_s10 }
 0x5c5   : > { %1441 = vrot.lane.b32.xlu0 %v4448_v4, %s3037_s18  ;;  %1377 = vrot.lane.b32.xlu2 %v4448_v4, %s3038_s19 }
 0x5c6   : > { %v4456_v49 = vpop.permute.xlu1 %1763 }
 0x5c7   : > { %v4460_v53 = vpop.permute.xlu2 %1467  ;;  %v4462_v42 = vpop.permute.xlu0 %1459 }
 0x5c8   : > { %5911 = vst [vmem:[#allocation92_spill] sm:$0xff] %v4462_v42 }
 0x5cc   : > { %1659 = vrot.lane.b32.xlu1 %v4246_v38, %s3034_s23 }
 0x5cd   : > { %1453 = vrot.lane.b32.xlu0 %v4465_v43, %s3037_s18  ;;  %1389 = vrot.lane.b32.xlu2 %v4465_v43, %s3038_s19 }
 0x5ce   : > { %v4473_v58 = vpop.permute.xlu1 %1695 }
 0x5cf   : > { %5913 = vst [vmem:[#allocation94_spill] sm:$0xff] %v4473_v58  ;;  %v4477_v59 = vpop.permute.xlu2 %1651  ;;  %v4479_v42 = vpop.permute.xlu0 %1759  ;;  %v1739_v54 = vsel %vm742_vm1, %v4473_v58, %v4404_v5 }
 0x5d0   : > { %5914 = vst [vmem:[#allocation95_spill] sm:$0xff] %v4477_v59 }
 0x5d1   : > { %5915 = vst [vmem:[#allocation96_spill] sm:$0xff] %v4479_v42 }
 0x5d4   : > { %1591 = vrot.lane.b32.xlu1 %v4243_v25, %s3035_s12 }
 0x5d5   : > { %1701 = vrot.lane.b32.xlu0 %v4358_v55, %s3033_s10  ;;  %1401 = vrot.lane.b32.xlu2 %v4482_v16, %s3038_s19 }
 0x5d6   : > { %v4490_v31 = vpop.permute.xlu1 %1635 }
 0x5d7   : > { %v4492_v17 = vpop.permute.xlu2 %1583  ;;  %v4494_v8 = vpop.permute.xlu0 %1631 }
 0x5d8   : > { %5917 = vst [vmem:[#allocation98_spill] sm:$0xff] %v4492_v17 }
 0x5dc   : > { %1313 = vrot.lane.b32.xlu1 %v4448_v4, %s3039_s0 }
 0x5dd   : > { %1633 = vrot.lane.b32.xlu0 %v4448_v4, %s3034_s23  ;;  %1445 = vrot.lane.b32.xlu2 %v4358_v55, %s3037_s18 }
 0x5de   : > { %v4502_v37 = vpop.permute.xlu1 %1567 }
 0x5df   : > { %v1644_v47 = vpop.permute.xlu2 %1643  ;;  %v4504_v28 = vpop.permute.xlu0 %1767 }
 0x5e4   : > { %1325 = vrot.lane.b32.xlu1 %v4465_v43, %s3039_s0 }
 0x5e5   : > { %1641 = vrot.lane.b32.xlu0 %v4409_v36, %s3034_s23  ;;  %1457 = vrot.lane.b32.xlu2 %v4375_v45, %s3037_s18 }
 0x5e6   : > { %v4512_v27 = vpop.permute.xlu1 %1639 }
 0x5e7   : > { %v4517_v2 = vsel %vm701_vm2, %v4512_v27, %v1644_v47  ;;  %v4519_v6 = vpop.permute.xlu2 %1719  ;;  %v1704_v3 = vpop.permute.xlu0 %1703 }
 0x5e8   : > { %5918 = vst [vmem:[#allocation99_spill] sm:$0xff] %v4517_v2  ;;  %v4524_v57 = vsel %vm742_vm1, %v4404_v5, %v1704_v3 }
 0x5e9   : > { %5919 = vst [vmem:[#allocation100_spill] sm:$0xff] %v4519_v6 }
 0x5ec   : > { %1337 = vrot.lane.b32.xlu1 %v4482_v16, %s3039_s0 }
 0x5ed   : > { %1577 = vrot.lane.b32.xlu0 %v4409_v36, %s3035_s12  ;;  %1765 = vrot.lane.b32.xlu2 %v4358_v55, %s3032_s22 }
 0x5ee   : > { %v4532_v52 = vpop.permute.xlu1 %1771 }
 0x5ef   : > { %5920 = vst [vmem:[#allocation101_spill] sm:$0xff] %v4532_v52  ;;  %v4538_v6 = vsel %vm783_vm0, %v4504_v28, %v4532_v52  ;;  %v4540_v60 = vpop.permute.xlu2 %1519  ;;  %v1712_v17 = vpop.permute.xlu0 %1711 }
 0x5f0   : > { %5921 = vst [vmem:[#allocation102_spill] sm:$0xff] %v4540_v60 }
 0x5f4   : > { %1381 = vrot.lane.b32.xlu1 %v4358_v55, %s3038_s19 }
 0x5f5   : > { %1533 = vrot.lane.b32.xlu0 %v4392_v12, %s3036_s26  ;;  %1697 = vrot.lane.b32.xlu2 %v4448_v4, %s3033_s10 }
 0x5f6   : > { %v1576_v14 = vpop.permute.xlu1 %1575 }
 0x5f7   : > { %v4551_v30 = vsel %vm660_vm3, %v4421_v26, %v1576_v14  ;;  %v4553_v52 = vpop.permute.xlu2 %1655  ;;  %v4555_v33 = vpop.permute.xlu0 %1587 }
 0x5f8   : > { %5922 = vst [vmem:[#allocation103_spill] sm:$0xff] %v4553_v52 }
 0x5f9   : > { %5923 = vst [vmem:[#allocation104_spill] sm:$0xff] %v4555_v33 }
 0x5fc   : > { %1393 = vrot.lane.b32.xlu1 %v4375_v45, %s3038_s19 }
 0x5fd   : > { %1717 = vrot.lane.b32.xlu0 %v4426_v20, %s3033_s10  ;;  %1769 = vrot.lane.b32.xlu2 %v4409_v36, %s3032_s22 }
 0x5fe   : > { %v4563_v24 = vpop.permute.xlu1 %1503 }
 0x5ff   : > { %v4565_v51 = vpop.permute.xlu2 %1775  ;;  %v1512_v10 = vpop.permute.xlu0 %1511 }
 0x600   : > { %5924 = vst [vmem:[#allocation105_spill] sm:$0xff] %v4565_v51 }
 0x604   : > { %1405 = vrot.lane.b32.xlu1 %v4392_v12, %s3038_s19 }
 0x605   : > { %1649 = vrot.lane.b32.xlu0 %v4375_v45, %s3034_s23  ;;  %1705 = vrot.lane.b32.xlu2 %v4409_v36, %s3033_s10 }
 0x606   : > { %v4573_v52 = vpop.permute.xlu1 %1715 }
 0x607   : > { %5925 = vst [vmem:[#allocation106_spill] sm:$0xff] %v4573_v52  ;;  %v4578_v33 = vsel %vm742_vm1, %v1712_v17, %v4573_v52  ;;  %v4580_v9 = vpop.permute.xlu2 %1523  ;;  %v4582_v51 = vpop.permute.xlu0 %1595 }
 0x608   : > { %5926 = vst [vmem:[#allocation107_spill] sm:$0xff] %v4578_v33 }
 0x609   : > { %5927 = vst [vmem:[#allocation108_spill] sm:$0xff] %v4580_v9 }
 0x60a   : > { %5928 = vst [vmem:[#allocation109_spill] sm:$0xff] %v4582_v51 }
 0x60c   : > { %1449 = vrot.lane.b32.xlu1 %v4409_v36, %s3037_s18 }
 0x60d   : > { %1509 = vrot.lane.b32.xlu0 %v4358_v55, %s3036_s26  ;;  %1573 = vrot.lane.b32.xlu2 %v4358_v55, %s3035_s12 }
 0x60e   : > { %v1648_v2 = vpop.permute.xlu1 %1647 }
 0x60f   : > { %v4593_v29 = vsel %vm701_vm2, %v1648_v2, %v4477_v59  ;;  %v4597_v9 = vsel %vm701_vm2, %v1644_v47, %v1648_v2  ;;  %v4599_v52 = vpop.permute.xlu2 %1321  ;;  %v4601_v33 = vpop.permute.xlu0 %1317 }
 0x610   : > { %5929 = vst [vmem:[#allocation110_spill] sm:$0xff] %v4593_v29 }
 0x611   : > { %5930 = vst [vmem:[#allocation111_spill] sm:$0xff] %v4597_v9 }
 0x612   : > { %5931 = vst [vmem:[#allocation112_spill] sm:$0xff] %v4599_v52 }
 0x613   : > { %5932 = vst [vmem:[#allocation113_spill] sm:$0xff] %v4601_v33 }
 0x614   : > { %1761 = vrot.lane.b32.xlu1 %v4448_v4, %s3032_s22 }
 0x615   : > { %1709 = vrot.lane.b32.xlu0 %v4465_v43, %s3033_s10  ;;  %1773 = vrot.lane.b32.xlu2 %v4465_v43, %s3032_s22 }
 0x616   : > { %v1508_v34 = vpop.permute.xlu1 %1507 }
 0x617   : > { %v4611_v59 = vsel %vm619_vm4, %v1508_v34, %v1512_v10  ;;  %v4616_v2 = vsel %vm619_vm4, %v4563_v24, %v1508_v34  ;;  %v4618_v47 = vpop.permute.xlu2 %1333  ;;  %v4620_v29 = vpop.permute.xlu0 %1329 }
 0x618   : > { %5933 = vst [vmem:[#allocation114_spill] sm:$0xff] %v4611_v59 }
 0x619   : > { %5934 = vst [vmem:[#allocation115_spill] sm:$0xff] %v4618_v47 }
 0x61a   : > { %5935 = vst [vmem:[#allocation116_spill] sm:$0xff] %v4620_v29 }
 0x61c   : > { %1637 = vrot.lane.b32.xlu1 %v4358_v55, %s3034_s23 }
 0x61d   : > { %1589 = vrot.lane.b32.xlu0 %v4426_v20, %s3035_s12  ;;  %1505 = vrot.lane.b32.xlu2 %v4448_v4, %s3036_s26 }
 0x61e   : > { %v1708_v52 = vpop.permute.xlu1 %1707 }
 0x61f   : > { %v4630_v59 = vsel %vm742_vm1, %v1708_v52, %v1712_v17  ;;  %v4634_v34 = vsel %vm742_vm1, %v1704_v3, %v1708_v52  ;;  %v1342_v47 = vpop.permute.xlu0 %1341  ;;  %v4636_v9 = vpop.permute.xlu2 %1377 }
 0x620   : > { %5936 = vst [vmem:[#allocation117_spill] sm:$0xff] %v4630_v59 }
 0x624   : > { %1569 = vrot.lane.b32.xlu1 %v4448_v4, %s3035_s12 }
 0x625   : > { %1581 = vrot.lane.b32.xlu0 %v4465_v43, %s3035_s12  ;;  %1713 = vrot.lane.b32.xlu2 %v4375_v45, %s3033_s10 }
 0x626   : > { %v4644_v1 = vpop.permute.xlu1 %1579 }
 0x627   : > { %5937 = vst [vmem:[#allocation118_spill] sm:$0xff] %v4644_v1  ;;  %v4649_v17 = vsel %vm660_vm3, %v1576_v14, %v4644_v1  ;;  %v4651_v52 = vpop.permute.xlu0 %1385  ;;  %v4653_v3 = vpop.permute.xlu2 %1389 }
 0x628   : > { %5938 = vst [vmem:[#allocation119_spill] sm:$0xff] %v4649_v17 }
 0x629   : > { %5939 = vst [vmem:[#allocation120_spill] sm:$0xff] %v4651_v52 }
 0x62a   : > { %5940 = vst [vmem:[#allocation121_spill] sm:$0xff] %v4653_v3 }
 0x62c   : > { %1653 = vrot.lane.b32.xlu1 %v4426_v20, %s3034_s23 }
 0x62d   : > { %1521 = vrot.lane.b32.xlu0 %v4375_v45, %s3036_s26  ;;  %1469 = vrot.lane.b32.xlu2 %v4392_v12, %s3037_s18 }
 0x62e   : > { %v1516_v59 = vpop.permute.xlu1 %1515 }
 0x62f   : > { %v4664_v44 = vsel %vm619_vm4, %v1516_v59, %v4540_v60  ;;  %v4668_v14 = vsel %vm619_vm4, %v1512_v10, %v1516_v59  ;;  %v4670_v3 = vpop.permute.xlu0 %1397  ;;  %v4672_v1 = vpop.permute.xlu2 %1401 }
 0x630   : > { %5941 = vst [vmem:[#allocation122_spill] sm:$0xff] %v4664_v44 }
 0x631   : > { %5942 = vst [vmem:[#allocation123_spill] sm:$0xff] %v4668_v14 }
 0x632   : > { %5943 = vst [vmem:[#allocation124_spill] sm:$0xff] %v4670_v3 }
 0x633   : > { %5944 = vst [vmem:[#allocation125_spill] sm:$0xff] %v4672_v1 }
 0x634   : > { %1645 = vrot.lane.b32.xlu1 %v4465_v43, %s3034_s23 }
 0x635   : > { %1725 = vrot.lane.b32.xlu0 %v4392_v12, %s3033_s10  ;;  %1585 = vrot.lane.b32.xlu2 %v4375_v45, %s3035_s12 }
 0x636   : > { %v4680_v17 = vpop.permute.xlu1 %1723 }
 0x637   : > { %5945 = vst [vmem:[#allocation126_spill] sm:$0xff] %v4680_v17  ;;  %v4682_v60 = vpop.permute.xlu0 %1441  ;;  %v4684_v44 = vpop.permute.xlu2 %1445 }
 0x63c   : > { %1721 = vrot.lane.b32.xlu1 %v4482_v16, %s3033_s10 }
 0x63d   : > { %1657 = vrot.lane.b32.xlu0 %v4482_v16, %s3034_s23  ;;  %1517 = vrot.lane.b32.xlu2 %v4465_v43, %s3036_s26 }
 0x63e   : > { %v4692_v10 = vpop.permute.xlu1 %1659 }
 0x63f   : > { %5946 = vst [vmem:[#allocation127_spill] sm:$0xff] %v4692_v10  ;;  %v4694_v59 = vpop.permute.xlu0 %1453  ;;  %v4696_v1 = vpop.permute.xlu2 %1457 }
 0x640   : > { %5947 = vst [vmem:[#allocation128_spill] sm:$0xff] %v4694_v59 }
 0x641   : > { %5948 = vst [vmem:[#allocation129_spill] sm:$0xff] %v4696_v1 }
 0x644   : > { %1777 = vrot.lane.b32.xlu1 %v4375_v45, %s3032_s22 }
 0x645   : > { %1661 = vrot.lane.b32.xlu0 %v4392_v12, %s3034_s23  ;;  %1513 = vrot.lane.b32.xlu2 %v4409_v36, %s3036_s26 }
 0x646   : > { %v4704_v17 = vpop.permute.xlu1 %1591 }
 0x647   : > { %5949 = vst [vmem:[#allocation130_spill] sm:$0xff] %v4704_v17  ;;  %v4710_v10 = vsel %vm660_vm3, %v4704_v17, %v4582_v51  ;;  %v1702_v14 = vpop.permute.xlu0 %1701  ;;  %v1766_v43 = vpop.permute.xlu2 %1765 }
 0x648   : > { %5950 = vst [vmem:[#allocation131_spill] sm:$0xff] %v4710_v10 }
 0x64c   : > { %1525 = vrot.lane.b32.xlu1 %v4426_v20, %s3036_s26 }
 0x64d   : > { %1593 = vrot.lane.b32.xlu0 %v4482_v16, %s3035_s12  ;;  %1597 = vrot.lane.b32.xlu2 %v4392_v12, %s3035_s12 }
 0x64e   : > { %v1314_v1 = vpop.permute.xlu1 %1313 }
 0x64f   : > { %v4721_v45 = vsel %vm496_vm7, %v1314_v1, %v4601_v33  ;;  %v4725_v10 = vsel %vm496_vm7, %v1342_v47, %v1314_v1  ;;  %v4727_v51 = vpop.permute.xlu0 %1633  ;;  %v4729_v17 = vpop.permute.xlu2 %1697  ;;  %v1743_v1 = vmul.f32 %v1739_v54, %v3515_v62 }
 0x650   : > { %5951 = vst [vmem:[#allocation132_spill] sm:$0xff] %v4729_v17  ;;  %v1740_v36 = vsel %vm742_vm1, %v4729_v17, %v1702_v14 }
 0x651   : > { %v1751_v33 = vmul.f32 %v1740_v36, %v3515_v62 }
 0x653   : > { %1826 = vmatpush.msra.mxu2 %v1751_v33 }
 0x654   : > { %1461 = vrot.lane.b32.xlu1 %v4426_v20, %s3037_s18 }
 0x655   : > { %1779 = vrot.lane.b32.xlu0 %v4234_v0, %s3032_s22  ;;  %1527 = vrot.lane.b32.xlu2 %v4243_v25, %s3036_s26 }
 0x656   : > { %1827 = vmatpush.msra.mxu2 %v1743_v1  ;;  %v4746_v17 = vpop.permute.xlu1 %1325 }
 0x657   : > { %5952 = vst [vmem:[#allocation133_spill] sm:$0xff] %v4746_v17  ;;  %v4752_v5 = vsel %vm496_vm7, %v4746_v17, %v4620_v29  ;;  %v4754_v33 = vpop.permute.xlu0 %1641  ;;  %v1770_v36 = vpop.permute.xlu2 %1769 }
 0x658   : > { %5953 = vst [vmem:[#allocation134_spill] sm:$0xff] %v4752_v5 }
 0x65c   : > { %1781 = vrot.lane.b32.xlu1 %v4426_v20, %s3032_s22  ;;  %v1744_v20 = vmul.f32 %v4524_v57, %v3518_v63 }
 0x65d   : > { %1529 = vrot.lane.b32.xlu0 %v4482_v16, %s3036_s26  ;;  %1463 = vrot.lane.b32.xlu2 %v4243_v25, %s3037_s18 }
 0x65e   : > { %v4762_v62 = vpop.permute.xlu1 %1337 }
 0x65f   : > { %5954 = vst [vmem:[#allocation135_spill] sm:$0xff] %v4762_v62  ;;  %v4767_v54 = vsel %vm496_vm7, %v4762_v62, %v1342_v47  ;;  %v4769_v1 = vpop.permute.xlu0 %1577  ;;  %v1706_v29 = vpop.permute.xlu2 %1705 }
 0x660   : > { %5955 = vst [vmem:[#allocation136_spill] sm:$0xff] %v4767_v54  ;;  %v1738_v5 = vsel %vm742_vm1, %v1702_v14, %v1706_v29 }
 0x661   : > { %v1752_v0 = vmul.f32 %v1738_v5, %v3518_v63 }
 0x663   : > { %1866 = vmatpush.msrb.mxu0 %v1752_v0 }
 0x664   : > { %1785 = vrot.lane.b32.xlu1 %v4482_v16, %s3032_s22 }
 0x665   : > { %1465 = vrot.lane.b32.xlu0 %v4482_v16, %s3037_s18  ;;  %1783 = vrot.lane.b32.xlu2 %v4243_v25, %s3032_s22  ;;  %s2415_s18 = scalar_lea.sflag [#allocation4], %s3243_s29 }
 0x666   : > { %1867 = vmatpush.msrb.mxu0 %v1744_v20  ;;  %v4782_v47 = vpop.permute.xlu1 %1381 }
 0x667   : > { %v4788_v0 = vsel %vm537_vm6, %v4782_v47, %v4651_v52  ;;  %v4790_v14 = vpop.permute.xlu0 %1533  ;;  %v4792_v63 = vpop.permute.xlu2 %1573 }
 0x668   : > { %5956 = vst [vmem:[#allocation137_spill] sm:$0xff] %v4788_v0 }
 0x66c   : > { %1787 = vrot.lane.b32.xlu1 %v4246_v38, %s3032_s22 }
 0x66d   : > { %1789 = vrot.lane.b32.xlu0 %v4392_v12, %s3032_s22 }
 0x66e   : > { %v4798_v57 = vpop.permute.xlu1 %1393 }
 0x66f   : > { %5957 = vst [vmem:[#allocation138_spill] sm:$0xff] %v4798_v57  ;;  %v4804_v20 = vsel %vm537_vm6, %v4798_v57, %v4670_v3  ;;  %v4806_v5 = vpop.permute.xlu0 %1717  ;;  %v4808_v62 = vpop.permute.xlu2 %1773  ;;  %v1803_v57 = vsel %vm783_vm0, %v4479_v42, %v4456_v49 }
 0x670   : > { %5958 = vst [vmem:[#allocation139_spill] sm:$0xff] %v4804_v20 }
 0x671   : > { %5959 = vst [vmem:[#allocation140_spill] sm:$0xff] %v4806_v5 }
 0x676   : > { %v4810_v25 = vpop.permute.xlu1 %1405 }
 0x677   : > { %v4812_v54 = vpop.permute.xlu0 %1649  ;;  %v4814_v16 = vpop.permute.xlu2 %1505 }
 0x678   : > { %5960 = vst [vmem:[#allocation141_spill] sm:$0xff] %v4812_v54  ;;  %v1745_v54 = vmul.f32 %v4634_v34, %v3424_v23 }
 0x67e   : > { %v4816_v38 = vpop.permute.xlu1 %1449 }
 0x67f   : > { %5961 = vst [vmem:[#allocation142_spill] sm:$0xff] %v4816_v38  ;;  %v4822_v12 = vsel %vm578_vm5, %v4816_v38, %v4694_v59  ;;  %v4824_v3 = vpop.permute.xlu0 %1509  ;;  %v4832_v58 = vpop.permute.xlu2 %1713  ;;  %v1802_v59 = vsel %vm783_vm0, %v1766_v43, %v1770_v36 }
 0x680   : > { %5962 = vst [vmem:[#allocation143_spill] sm:$0xff] %v4822_v12  ;;  %v2774_v12 = vld [vmem:[%s3269_s21 + $0x40] ss:$0 sm:$0xff] }
 0x681   : > { %5964 = vst [vmem:[#allocation145_spill] sm:$0xff] %v4832_v58  ;;  %v1807_v38 = vmul.f32 %v2774_v12, %v1803_v57  ;;  %v2776_v57 = vld [vmem:[%s3269_s21 + $0x50] ss:$0 sm:$0xff] }
 0x686   : > { %v4826_v20 = vpop.permute.xlu1 %1761 }
 0x687   : > { %5963 = vst [vmem:[#allocation144_spill] sm:$0xff] %v4826_v20  ;;  %v1804_v17 = vsel %vm783_vm0, %v4826_v20, %v1766_v43  ;;  %v4837_v52 = vpop.permute.xlu0 %1709  ;;  %v1801_v20 = vsel %vm783_vm0, %v4456_v49, %v4504_v28  ;;  %v2775_v43 = vld [vmem:[%s3269_s21 + $0x48] ss:$0 sm:$0xff] }
 0x688   : > { %v1815_v0 = vmul.f32 %v2774_v12, %v1804_v17  ;;  %v1736_v5 = vsel %vm742_vm1, %v1706_v29, %v4837_v52  ;;  %v1816_v58 = vmul.f32 %v2775_v43, %v1802_v59  ;;  %v1800_v17 = vsel %vm783_vm0, %v1770_v36, %v4808_v62  ;;  %v4856_v29 = vld [vmem:[#allocation7 + $0x8] sm:$0xff] }
 0x689   : > { %v1753_v42 = vmul.f32 %v1736_v5, %v3424_v23  ;;  %v1808_v12 = vmul.f32 %v2775_v43, %v1801_v20  ;;  %v1817_v5 = vmul.f32 %v2776_v57, %v1800_v17  ;;  %v1675_v23 = vsel %vm701_vm2, %v4494_v8, %v4490_v31 }
 0x68a   : > { %1860 = vmatpush.msra.mxu3 %v1815_v0  ;;  %v1809_v36 = vmul.f32 %v2776_v57, %v4538_v6  ;;  %v1616_v6 = vmul.f32 %v4551_v30, %v3570_v40 }
 0x68b   : > { %1906 = vmatpush.msrb.mxu1 %v1753_v42  ;;  %v1673_v42 = vsel %vm701_vm2, %v4490_v31, %v4512_v27  ;;  %v1610_v27 = vsel %vm660_vm3, %v4792_v63, %v4769_v1  ;;  %v4884_v31 = vpop.permute.xlu2 %1469 }
 0x68c   : > { %1861 = vmatpush.msra.mxu3 %v1807_v38  ;;  %v1680_v0 = vmul.f32 %v1673_v42, %v3532_v19  ;;  %v1624_v20 = vmul.f32 %v1610_v27, %v3570_v40  ;;  %v1548_v40 = vsel %vm619_vm4, %v4814_v16, %v4824_v3  ;;  %v5965_v27 = vld [vmem:[#allocation71_spill] sm:$0xff] }
 0x68d   : > { %1907 = vmatpush.msrb.mxu1 %v1745_v54  ;;  %2606 = vmatmul.msk.f32.vlgmr.msra.gmra.mxu3 %vm1048_vm12, %v4856_v29  ;;  %v1679_v54 = vmul.f32 %v1675_v23, %v3521_v7  ;;  %v1560_v57 = vmul.f32 %v1548_v40, %v3587_v50 }
 0x68e   : > { %1900 = vmatpush.msrb.mxu3 %v1816_v58  ;;  %v1638_v49 = vpop.permute.xlu1 %1637 }
 0x68f   : > { %v1674_v38 = vsel %vm701_vm2, %v1638_v49, %v4754_v33  ;;  %v1676_v58 = vsel %vm701_vm2, %v4727_v51, %v1638_v49  ;;  %v4875_v28 = vpop.permute.xlu0 %1589 }
 0x690   : > { %1901 = vmatpush.msrb.mxu3 %v1808_v12  ;;  %v1687_v34 = vmul.f32 %v1676_v58, %v3521_v7  ;;  %v1688_v59 = vmul.f32 %v1674_v38, %v3532_v19  ;;  %v1611_v7 = vsel %vm660_vm3, %v4502_v37, %v4421_v26 }
 0x691   : > { %v1615_v26 = vmul.f32 %v1611_v7, %v3573_v41  ;;  %v5969_v7 = vld [vmem:[#allocation37_spill] sm:$0xff] }
 0x692   : > { %1940 = vmatpush.msra.mxu3 %v1817_v5  ;;  %1828 = vmatpush.msra.mxu2 %v1687_v34  ;;  %v1484_v5 = vsel %vm578_vm5, %v4682_v60, %v4684_v44 }
 0x693   : > { %1868 = vmatpush.msrb.mxu0 %v1688_v59  ;;  %v4912_v12 = vpop.permute.xlu2 %1585  ;;  %v1496_v23 = vmul.f32 %v1484_v5, %v3672_v46  ;;  %v1421_v59 = vsel %vm537_vm6, %v4423_v61, %v4366_v13 }
 0x694   : > { %1941 = vmatpush.msra.mxu3 %v1809_v36  ;;  %1829 = vmatpush.msra.mxu2 %v1679_v54  ;;  %v5966_v54 = vld [vmem:[#allocation74_spill] sm:$0xff] }
 0x695   : > { %1869 = vmatpush.msrb.mxu0 %v1680_v0  ;;  %2607 = vmatmul.msk.f32.vlgmr.msrb.gmra.mxu3 %vm1048_vm12, %v4856_v29  ;;  %v5967_v0 = vld [vmem:[#allocation34_spill] sm:$0xff] }
 0x696   : > { %v4891_v43 = vpop.permute.xlu1 %1569 }
 0x697   : > { %1870 = vmatpush.msrb.mxu0 %v1624_v20  ;;  %v1612_v19 = vsel %vm660_vm3, %v4891_v43, %v4792_v63  ;;  %v4903_v17 = vpop.permute.xlu0 %1581  ;;  %v1550_v63 = vsel %vm619_vm4, %v4790_v14, %v4814_v16 }
 0x698   : > { %v1623_v30 = vmul.f32 %v1612_v19, %v3573_v41  ;;  %v1559_v16 = vmul.f32 %v1550_v63, %v3636_v39  ;;  %v1423_v19 = vmul.f32 %v1421_v59, %v5967_v0  ;;  %v5972_v63 = vld [vmem:[#allocation40_spill] sm:$0xff] }
 0x699   : > { %1871 = vmatpush.msrb.mxu0 %v1616_v6  ;;  %v1367_v5 = vmul.f32 %v4725_v10, %v5972_v63  ;;  %v5975_v10 = vld [vmem:[#allocation119_spill] sm:$0xff] }
 0x69a   : > { %1830 = vmatpush.msra.mxu2 %v1623_v30  ;;  %v5970_v30 = vld [vmem:[#allocation99_spill] sm:$0xff] }
 0x69b   : > { %1872 = vmatpush.msrb.mxu0 %v4358_v55  ;;  %v1552_v55 = vmul.f32 %v4616_v2, %v3587_v50  ;;  %v1420_v2 = vsel %vm537_vm6, %v4636_v9, %v4782_v47  ;;  %v1422_v47 = vsel %vm537_vm6, %v4810_v25, %v4636_v9  ;;  %v4968_v58 = vpop.permute.xlu2 %1517 }
 0x69c   : > { %1831 = vmatpush.msra.mxu2 %v1615_v26  ;;  %v1432_v38 = vmul.f32 %v1420_v2, %v3691_v32  ;;  %v1431_v20 = vmul.f32 %v1422_v47, %v5967_v0  ;;  %v5971_v26 = vld [vmem:[#allocation73_spill] sm:$0xff]  ;;  %v5982_v0 = vld [vmem:[#allocation27_spill] sm:$0xff] }
 0x69d   : > { %1873 = vmatpush.msrb.mxu0 %v4210_v56  ;;  %v1549_v56 = vsel %vm619_vm4, %v4437_v11, %v4563_v24  ;;  %2608 = vmatmul.msk.f32.vlgmr.msra.gmra.mxu3 %vm1048_vm12, %v4856_v29  ;;  %v1486_v24 = vsel %vm578_vm5, %v4884_v31, %v4682_v60  ;;  %v1419_v60 = vsel %vm537_vm6, %v4366_v13, %v4389_v21  ;;  %v5976_v2 = vld [vmem:[#allocation21_spill] sm:$0xff] }
 0x69e   : > { %1832 = vmatpush.msra.mxu2 %v4448_v4  ;;  %v4925_v41 = vpop.permute.xlu1 %1653  ;;  %v1483_v4 = vsel %vm578_vm5, %v4370_v48, %v4417_v18  ;;  %v1551_v50 = vmul.f32 %v1549_v56, %v3636_v39  ;;  %v1495_v39 = vmul.f32 %v1486_v24, %v3669_v35  ;;  %v1424_v34 = vmul.f32 %v1419_v60, %v3691_v32  ;;  %v5968_v32 = vld [vmem:[#allocation23_spill] sm:$0xff]  ;;  %v5011_v24 = vld [vmem:[#allocation7] sm:$0xff] }
 0x69f   : > { %1874 = vmatpush.msrb.mxu0 %v1560_v57  ;;  %v4933_v49 = vpop.permute.xlu0 %1521  ;;  %v1488_v42 = vmul.f32 %v1483_v4, %v3672_v46  ;;  %v1368_v13 = vmul.f32 %v4721_v45, %v5969_v7  ;;  %v1681_v40 = vmul.f32 %v5970_v30, %v5968_v32  ;;  %v1357_v57 = vsel %vm496_vm7, %v5971_v26, %v5966_v54  ;;  %v5977_v60 = vld [vmem:[#allocation141_spill] sm:$0xff] }
 0x6a0   : > { %1833 = vmatpush.msra.mxu2 %v4207_v22  ;;  %v1485_v22 = vsel %vm578_vm5, %v4460_v53, %v4370_v48 }
 0x6a1   : > { %1875 = vmatpush.msrb.mxu0 %v1552_v55  ;;  %v1487_v46 = vmul.f32 %v1485_v22, %v3669_v35  ;;  %v1355_v35 = vsel %vm496_vm7, %v5966_v54, %v5965_v27  ;;  %v5974_v55 = vld [vmem:[#allocation24_spill] sm:$0xff]  ;;  %v5981_v54 = vld [vmem:[#allocation111_spill] sm:$0xff] }
 0x6a2   : > { %1834 = vmatpush.msra.mxu2 %v1559_v16  ;;  %v1360_v45 = vmul.f32 %v1355_v35, %v5969_v7  ;;  %v1606_v35 = vsel %vm660_vm3, %v4903_v17, %v4912_v12 }
 0x6a3   : > { %1876 = vmatpush.msrb.mxu0 %v1496_v23  ;;  %v1359_v23 = vmul.f32 %v1357_v57, %v5972_v63  ;;  %v5989_v57 = vld [vmem:[#allocation118_spill] sm:$0xff] }
 0x6a4   : > { %1835 = vmatpush.msra.mxu2 %v1551_v50  ;;  %v1617_v50 = vmul.f32 %v5975_v10, %v5974_v55 }
 0x6a5   : > { %1877 = vmatpush.msrb.mxu0 %v1488_v42  ;;  %v1514_v42 = vpop.permute.xlu2 %1513 }
 0x6a6   : > { %1836 = vmatpush.msra.mxu2 %v1495_v39  ;;  %v1646_v48 = vpop.permute.xlu1 %1645 }
 0x6a7   : > { %1878 = vmatpush.msrb.mxu0 %v1432_v38  ;;  %v1672_v36 = vsel %vm701_vm2, %v4754_v33, %v1646_v48  ;;  %v4979_v9 = vpop.permute.xlu0 %1725  ;;  %v1608_v33 = vsel %vm660_vm3, %v4769_v1, %v4903_v17  ;;  %v5973_v1 = vld [vmem:[#allocation145_spill] sm:$0xff]  ;;  %v1670_v39 = vsel %vm701_vm2, %v1646_v48, %v5977_v60  ;;  %v5987_v17 = vld [vmem:[#allocation114_spill] sm:$0xff] }
 0x6a8   : > { %v1689_v6 = vmul.f32 %v1672_v36, %v5968_v32  ;;  %1837 = vmatpush.msra.mxu2 %v1487_v46  ;;  %v1734_v56 = vsel %vm742_vm1, %v4837_v52, %v5973_v1  ;;  %v1625_v4 = vmul.f32 %v1608_v33, %v5974_v55  ;;  %v5978_v38 = vld [vmem:[#allocation117_spill] sm:$0xff]  ;;  %v1546_v46 = vsel %vm619_vm4, %v4824_v3, %v1514_v42  ;;  %v5980_v36 = vld [vmem:[#allocation87_spill] sm:$0xff]  ;;  %v5991_v55 = vld [vmem:[#allocation140_spill] sm:$0xff] }
 0x6a9   : > { %1879 = vmatpush.msrb.mxu0 %v1424_v34  ;;  %v1754_v22 = vmul.f32 %v1734_v56, %v5976_v2  ;;  %v1746_v47 = vmul.f32 %v5978_v38, %v5976_v2  ;;  %v5979_v34 = vld [vmem:[#allocation22_spill] sm:$0xff]  ;;  %v5983_v32 = vld [vmem:[#allocation65_spill] sm:$0xff]  ;;  %v1553_v30 = vmul.f32 %v5987_v17, %v5982_v0 }
 0x6aa   : > { %1838 = vmatpush.msra.mxu2 %v1431_v20  ;;  %1908 = vmatpush.msrb.mxu1 %v1689_v6  ;;  %v1690_v59 = vmul.f32 %v1670_v39, %v5979_v34  ;;  %v1682_v48 = vmul.f32 %v5981_v54, %v5979_v34  ;;  %v1561_v20 = vmul.f32 %v1546_v46, %v5982_v0  ;;  %v5984_v3 = vld [vmem:[#allocation105_spill] sm:$0xff]  ;;  %v5996_v54 = vld [vmem:[#allocation107_spill] sm:$0xff] }
 0x6ab   : > { %1880 = vmatpush.msrb.mxu0 %v1368_v13  ;;  %v5985_v6 = vld [vmem:[#allocation101_spill] sm:$0xff]  ;;  %v5986_v13 = vld [vmem:[#allocation142_spill] sm:$0xff] }
 0x6ac   : > { %1839 = vmatpush.msra.mxu2 %v1423_v19  ;;  %1909 = vmatpush.msrb.mxu1 %v1681_v40  ;;  %v1797_v7 = vsel %vm783_vm0, %v5985_v6, %v5984_v3  ;;  %v1482_v33 = vsel %vm578_vm5, %v4684_v44, %v5986_v13  ;;  %v5988_v40 = vld [vmem:[#allocation98_spill] sm:$0xff]  ;;  %v5994_v46 = vld [vmem:[#allocation41_spill] sm:$0xff] }
 0x6ad   : > { %1881 = vmatpush.msrb.mxu0 %v1360_v45  ;;  %v1605_v45 = vsel %vm660_vm3, %v5989_v57, %v5988_v40  ;;  %v5990_v44 = vld [vmem:[#allocation90_spill] sm:$0xff]  ;;  %v5998_v0 = vld [vmem:[#allocation137_spill] sm:$0xff]  ;;  %v6003_v57 = vld [vmem:[#allocation75_spill] sm:$0xff] }
 0x6ae   : > { %1840 = vmatpush.msra.mxu2 %v1367_v5  ;;  %1910 = vmatpush.msrb.mxu1 %v1625_v4  ;;  %v5008_v16 = vpop.permute.xlu1 %1721  ;;  %v1481_v56 = vsel %vm578_vm5, %v4417_v18, %v5990_v44  ;;  %v1732_v4 = vsel %vm742_vm1, %v5973_v1, %v5991_v55  ;;  %v5995_v1 = vld [vmem:[#allocation76_spill] sm:$0xff]  ;;  %v6000_v6 = vld [vmem:[#allocation113_spill] sm:$0xff]  ;;  %v6004_v44 = vld [vmem:[#allocation26_spill] sm:$0xff] }
 0x6af   : > { %v5016_v52 = vpop.permute.xlu0 %1657  ;;  %1882 = vmatmul.f32.vlgmr.msrb.gmra.mxu0 %v5011_v24  ;;  %v1755_v34 = vmul.f32 %v1732_v4, %v5994_v46  ;;  %v6002_v17 = vld [vmem:[#allocation45_spill] sm:$0xff]  ;;  %v6005_v4 = vld [vmem:[#allocation66_spill] sm:$0xff] }
 0x6b0   : > { %1841 = vmatpush.msra.mxu2 %v1359_v23  ;;  %1911 = vmatpush.msrb.mxu1 %v1617_v50  ;;  %v5992_v23 = vld [vmem:[#allocation25_spill] sm:$0xff]  ;;  %v2777_v50 = vld [vmem:[%s3269_s21 + $0x58] ss:$0 sm:$0xff] }
 0x6b1   : > { %1842 = vmatmul.f32.vlgmr.msra.gmra.mxu2 %v5011_v24  ;;  %v1626_v10 = vmul.f32 %v1606_v35, %v5992_v23  ;;  %v1810_v38 = vmul.f32 %v2777_v50, %v1797_v7  ;;  %v5997_v35 = vld [vmem:[#allocation30_spill] sm:$0xff] }
 0x6b2   : > { %1946 = vmatpush.msrb.mxu2 %v1754_v22  ;;  %1912 = vmatpush.msrb.mxu1 %v5980_v36  ;;  %v5993_v22 = vld [vmem:[#allocation28_spill] sm:$0xff]  ;;  %v1668_v36 = vsel %vm701_vm2, %v5977_v60, %v4925_v41  ;;  %v6001_v60 = vld [vmem:[#allocation93_spill] sm:$0xff] }
 0x6b3   : > { %v1497_v39 = vmul.f32 %v1482_v33, %v5993_v22  ;;  %v1489_v18 = vmul.f32 %v1481_v56, %v5993_v22  ;;  %v1730_v22 = vsel %vm742_vm1, %v5991_v55, %v5008_v16 }
 0x6b4   : > { %1947 = vmatpush.msrb.mxu2 %v1746_v47  ;;  %1913 = vmatpush.msrb.mxu1 %v5983_v32  ;;  %v1618_v47 = vmul.f32 %v1605_v45, %v5992_v23  ;;  %v1544_v32 = vsel %vm619_vm4, %v1514_v42, %v4968_v58  ;;  %v1353_v45 = vsel %vm496_vm7, %v5965_v27, %v6003_v57  ;;  %v6006_v23 = vld [vmem:[#allocation110_spill] sm:$0xff]  ;;  %v6008_v27 = vld [vmem:[#allocation104_spill] sm:$0xff] }
 0x6b5   : > { %v1562_v56 = vmul.f32 %v1544_v32, %v6004_v44  ;;  %v6016_v32 = vld [vmem:[#allocation121_spill] sm:$0xff] }
 0x6b6   : > { %1948 = vmatpush.msrb.mxu2 %v1690_v59  ;;  %v5046_v19 = vpop.permute.xlu1 %1777  ;;  %1914 = vmatpush.msrb.mxu1 %v1561_v20  ;;  %v1417_v59 = vsel %vm537_vm6, %v4389_v21, %v5995_v1  ;;  %v1433_v20 = vmul.f32 %v5998_v0, %v5997_v35  ;;  %v5999_v21 = vld [vmem:[#allocation112_spill] sm:$0xff] }
 0x6b7   : > { %v1798_v63 = vsel %vm783_vm0, %v4808_v62, %v5046_v19  ;;  %v5058_v5 = vpop.permute.xlu0 %1661  ;;  %v5071_v62 = vpop.permute.xlu2 %1597  ;;  %v1354_v7 = vsel %vm496_vm7, %v6000_v6, %v5999_v21  ;;  %v1425_v33 = vmul.f32 %v1417_v59, %v5997_v35  ;;  %v6015_v35 = vld [vmem:[#allocation42_spill] sm:$0xff]  ;;  %v6017_v6 = vld [vmem:[#allocation120_spill] sm:$0xff] }
 0x6b8   : > { %1949 = vmatpush.msrb.mxu2 %v1682_v48  ;;  %v1818_v2 = vmul.f32 %v2777_v50, %v1798_v63  ;;  %1915 = vmatpush.msrb.mxu1 %v1553_v30  ;;  %v1747_v48 = vmul.f32 %v5996_v54, %v5994_v46  ;;  %v1691_v30 = vmul.f32 %v1668_v36, %v6002_v17  ;;  %v6007_v50 = vld [vmem:[#allocation32_spill] sm:$0xff]  ;;  %v6013_v54 = vld [vmem:[#allocation29_spill] sm:$0xff] }
 0x6b9   : > { %v1604_v63 = vsel %vm660_vm3, %v4912_v12, %v4875_v28  ;;  %v1603_v12 = vsel %vm660_vm3, %v5988_v40, %v6008_v27  ;;  %v1361_v55 = vmul.f32 %v1353_v45, %v6007_v50  ;;  %v1756_v0 = vmul.f32 %v1730_v22, %v6015_v35  ;;  %v6023_v22 = vld [vmem:[#allocation46_spill] sm:$0xff] }
 0x6ba   : > { %1950 = vmatpush.msrb.mxu2 %v1626_v10  ;;  %1980 = vmatpush.msrb.mxu3 %v1818_v2  ;;  %v1683_v10 = vmul.f32 %v6006_v23, %v6002_v17  ;;  %v1369_v2 = vmul.f32 %v1354_v7, %v6007_v50  ;;  %v1416_v7 = vsel %vm537_vm6, %v6017_v6, %v6016_v32 }
 0x6bb   : > { %1916 = vmatpush.msrb.mxu1 %v1497_v39  ;;  %v6009_v39 = vld [vmem:[#allocation123_spill] sm:$0xff] }
 0x6bc   : > { %1951 = vmatpush.msrb.mxu2 %v1618_v47  ;;  %1981 = vmatpush.msrb.mxu3 %v1810_v38  ;;  %v1554_v38 = vmul.f32 %v6009_v39, %v6004_v44  ;;  %v6010_v47 = vld [vmem:[#allocation100_spill] sm:$0xff] }
 0x6bd   : > { %1917 = vmatpush.msrb.mxu1 %v1489_v18  ;;  %2609 = vmatmul.msk.f32.vlgmr.msrb.gmra.mxu3 %vm1048_vm12, %v4856_v29  ;;  %v6011_v18 = vld [vmem:[#allocation106_spill] sm:$0xff] }
 0x6be   : > { %1986 = vmatpush.msra.mxu3 %v1755_v34  ;;  %1952 = vmatpush.msrb.mxu2 %v6001_v60  ;;  %v5096_v13 = vpop.permute.xlu1 %1525  ;;  %v1729_v46 = vsel %vm742_vm1, %v6011_v18, %v6010_v47  ;;  %v6012_v34 = vld [vmem:[#allocation47_spill] sm:$0xff]  ;;  %v1666_v60 = vsel %vm701_vm2, %v4925_v41, %v5016_v52  ;;  %v6025_v18 = vld [vmem:[#allocation81_spill] sm:$0xff] }
 0x6bf   : > { %1918 = vmatpush.msrb.mxu1 %v1433_v20  ;;  %v5102_v42 = vpop.permute.xlu0 %1593  ;;  %v1627_v59 = vmul.f32 %v1604_v63, %v6012_v34  ;;  %v5132_v36 = vpop.permute.xlu2 %1527  ;;  %v1619_v20 = vmul.f32 %v1603_v12, %v6012_v34  ;;  %v6019_v63 = vld [vmem:[#allocation82_spill] sm:$0xff]  ;;  %v1692_v12 = vmul.f32 %v1666_v60, %v6023_v22 }
 0x6c0   : > { %1987 = vmatpush.msra.mxu3 %v1747_v48  ;;  %1953 = vmatpush.msrb.mxu2 %v6005_v4  ;;  %v6014_v48 = vld [vmem:[#allocation143_spill] sm:$0xff]  ;;  %v1415_v44 = vsel %vm537_vm6, %v5995_v1, %v6019_v63  ;;  %v6024_v1 = vld [vmem:[#allocation133_spill] sm:$0xff]  ;;  %v6026_v34 = vld [vmem:[#allocation78_spill] sm:$0xff] }
 0x6c1   : > { %1919 = vmatpush.msrb.mxu1 %v1425_v33  ;;  %v1498_v40 = vmul.f32 %v6014_v48, %v6013_v54  ;;  %v6018_v33 = vld [vmem:[#allocation91_spill] sm:$0xff]  ;;  %v1352_v39 = vsel %vm496_vm7, %v5999_v21, %v6024_v1 }
 0x6c2   : > { %1988 = vmatpush.msra.mxu3 %v1691_v30  ;;  %1954 = vmatpush.msrb.mxu2 %v1562_v56  ;;  %v1490_v17 = vmul.f32 %v6018_v33, %v6013_v54  ;;  %v1748_v30 = vmul.f32 %v1729_v46, %v6015_v35  ;;  %v6020_v56 = vld [vmem:[#allocation103_spill] sm:$0xff]  ;;  %v6028_v54 = vld [vmem:[#allocation53_spill] sm:$0xff]  ;;  %v6031_v35 = vld [vmem:[#allocation128_spill] sm:$0xff] }
 0x6c3   : > { %1920 = vmatpush.msrb.mxu1 %v1369_v2  ;;  %v6021_v4 = vld [vmem:[#allocation95_spill] sm:$0xff]  ;;  %v1542_v2 = vsel %vm619_vm4, %v4968_v58, %v4933_v49 }
 0x6c4   : > { %1989 = vmatpush.msra.mxu3 %v1683_v10  ;;  %1955 = vmatpush.msrb.mxu2 %v1554_v38  ;;  %v1665_v41 = vsel %vm701_vm2, %v6021_v4, %v6020_v56  ;;  %v6022_v10 = vld [vmem:[#allocation31_spill] sm:$0xff]  ;;  %v1602_v38 = vsel %vm660_vm3, %v4875_v28, %v5102_v42  ;;  %v1563_v28 = vmul.f32 %v1542_v2, %v6028_v54 }
 0x6c5   : > { %1921 = vmatpush.msrb.mxu1 %v1361_v55  ;;  %v1434_v50 = vmul.f32 %v1416_v7, %v6022_v10  ;;  %v1684_v46 = vmul.f32 %v1665_v41, %v6023_v22  ;;  %v1426_v58 = vmul.f32 %v1415_v44, %v6022_v10  ;;  %v6027_v55 = vld [vmem:[#allocation130_spill] sm:$0xff]  ;;  %v6029_v48 = vld [vmem:[#allocation67_spill] sm:$0xff]  ;;  %v6033_v7 = vld [vmem:[#allocation48_spill] sm:$0xff] }
 0x6c6   : > { %1990 = vmatpush.msra.mxu3 %v1627_v59  ;;  %1956 = vmatpush.msrb.mxu2 %v1498_v40  ;;  %v5150_v45 = vpop.permute.xlu1 %1461  ;;  %v1351_v59 = vsel %vm496_vm7, %v6003_v57, %v6026_v34  ;;  %v1601_v21 = vsel %vm660_vm3, %v6008_v27, %v6027_v55  ;;  %v6030_v40 = vld [vmem:[#allocation129_spill] sm:$0xff]  ;;  %v1628_v60 = vmul.f32 %v1602_v38, %v6033_v7  ;;  %v6034_v57 = vld [vmem:[#allocation122_spill] sm:$0xff]  ;;  %v6037_v4 = vld [vmem:[#allocation83_spill] sm:$0xff] }
 0x6c7   : > { %2026 = vmatpush.msra.mxu1 %v1756_v0  ;;  %v5160_v23 = vpop.permute.xlu0 %1779  ;;  %v1478_v0 = vsel %vm578_vm5, %v6031_v35, %v6030_v40  ;;  %v1555_v33 = vmul.f32 %v6034_v57, %v6028_v54  ;;  %v6036_v44 = vld [vmem:[#allocation89_spill] sm:$0xff]  ;;  %v1620_v10 = vmul.f32 %v1601_v21, %v6033_v7  ;;  %v6038_v22 = vld [vmem:[#allocation94_spill] sm:$0xff]  ;;  %v6042_v55 = vld [vmem:[#allocation36_spill] sm:$0xff]  ;;  %v1540_v54 = vsel %vm619_vm4, %v4933_v49, %v5096_v13 }
 0x6c8   : > { %1991 = vmatpush.msra.mxu3 %v1619_v20  ;;  %1922 = vmatmul.f32.vlgmr.msrb.gmra.mxu1 %v5011_v24  ;;  %v6032_v20 = vld [vmem:[#allocation33_spill] sm:$0xff]  ;;  %v1477_v41 = vsel %vm578_vm5, %v6037_v4, %v6036_v44 }
 0x6c9   : > { %1957 = vmatpush.msrb.mxu2 %v1490_v17  ;;  %2027 = vmatpush.msra.mxu1 %v1748_v30  ;;  %v1370_v6 = vmul.f32 %v1352_v39, %v6032_v20  ;;  %v6035_v17 = vld [vmem:[#allocation132_spill] sm:$0xff]  ;;  %v5202_v30 = vpop.permute.xlu2 %1463  ;;  %v1362_v2 = vmul.f32 %v1351_v59, %v6032_v20  ;;  %v6040_v39 = vld [vmem:[#allocation57_spill] sm:$0xff]  ;;  %v1678_v59 = vsel %vm701_vm2, %v5058_v5, %v4727_v51  ;;  %v6046_v20 = vld [vmem:[#allocation102_spill] sm:$0xff] }
 0x6ca   : > { %1992 = vmatpush.msra.mxu3 %v6025_v18  ;;  %v1742_v27 = vsel %vm742_vm1, %v4979_v9, %v6035_v17  ;;  %v1499_v38 = vmul.f32 %v1478_v0, %v6040_v39  ;;  %v6044_v0 = vld [vmem:[#allocation88_spill] sm:$0xff] }
 0x6cb   : > { %1958 = vmatpush.msrb.mxu2 %v1434_v50  ;;  %2028 = vmatpush.msra.mxu1 %v1692_v12  ;;  %v6039_v12 = vld [vmem:[#allocation126_spill] sm:$0xff]  ;;  %v1758_v21 = vmul.f32 %v1742_v27, %v6042_v55  ;;  %v6045_v51 = vld [vmem:[#allocation108_spill] sm:$0xff] }
 0x6cc   : > { %1993 = vmatpush.msra.mxu3 %v6029_v48  ;;  %v1741_v1 = vsel %vm742_vm1, %v6039_v12, %v6038_v22  ;;  %v1539_v49 = vsel %vm619_vm4, %v6046_v20, %v6045_v51  ;;  %v6050_v27 = vld [vmem:[#allocation54_spill] sm:$0xff] }
 0x6cd   : > { %1959 = vmatpush.msrb.mxu2 %v1426_v58  ;;  %2029 = vmatpush.msra.mxu1 %v1684_v46  ;;  %v6041_v46 = vld [vmem:[#allocation138_spill] sm:$0xff]  ;;  %v1750_v35 = vmul.f32 %v1741_v1, %v6042_v55  ;;  %v1564_v4 = vmul.f32 %v1540_v54, %v6050_v27  ;;  %v6055_v55 = vld [vmem:[#allocation109_spill] sm:$0xff] }
 0x6ce   : > { %1994 = vmatpush.msra.mxu3 %v1563_v28  ;;  %v1782_v50 = vpop.permute.xlu1 %1781  ;;  %v1414_v58 = vsel %vm537_vm6, %v6016_v32, %v6041_v46  ;;  %v1491_v28 = vmul.f32 %v1477_v41, %v6040_v39  ;;  %v6043_v32 = vld [vmem:[#allocation86_spill] sm:$0xff]  ;;  %v6051_v41 = vld [vmem:[#allocation68_spill] sm:$0xff] }
 0x6cf   : > { %1960 = vmatpush.msrb.mxu2 %v1370_v6  ;;  %2030 = vmatpush.msra.mxu1 %v1628_v60  ;;  %v5215_v18 = vpop.permute.xlu0 %1529  ;;  %v1413_v48 = vsel %vm537_vm6, %v6019_v63, %v6043_v32  ;;  %v6047_v6 = vld [vmem:[#allocation127_spill] sm:$0xff]  ;;  %v6048_v60 = vld [vmem:[#allocation61_spill] sm:$0xff]  ;;  %v1614_v63 = vsel %vm660_vm3, %v5071_v62, %v4891_v43  ;;  %v1476_v43 = vsel %vm578_vm5, %v6030_v40, %v5150_v45  ;;  %v6054_v39 = vld [vmem:[#allocation92_spill] sm:$0xff] }
 0x6d0   : > { %1995 = vmatpush.msra.mxu3 %v1555_v33  ;;  %v1677_v7 = vsel %vm701_vm2, %v6047_v6, %v4494_v8  ;;  %v1435_v57 = vmul.f32 %v1414_v58, %v6048_v60  ;;  %v6049_v33 = vld [vmem:[#allocation38_spill] sm:$0xff]  ;;  %v1427_v1 = vmul.f32 %v1413_v48, %v6048_v60  ;;  %v6056_v40 = vld [vmem:[#allocation63_spill] sm:$0xff] }
 0x6d1   : > { %1961 = vmatpush.msrb.mxu2 %v1362_v2  ;;  %2031 = vmatpush.msra.mxu1 %v1620_v10  ;;  %v1694_v17 = vmul.f32 %v1678_v59, %v6049_v33  ;;  %v6052_v10 = vld [vmem:[#allocation72_spill] sm:$0xff]  ;;  %v6053_v2 = vld [vmem:[#allocation77_spill] sm:$0xff]  ;;  %v1686_v46 = vmul.f32 %v1677_v7, %v6049_v33  ;;  %v6057_v59 = vld [vmem:[#allocation134_spill] sm:$0xff] }
 0x6d2   : > { %1962 = vmatmul.f32.vlgmr.msrb.gmra.mxu2 %v5011_v24  ;;  %1996 = vmatpush.msra.mxu3 %v1499_v38  ;;  %v1349_v8 = vsel %vm496_vm7, %v6026_v34, %v6052_v10  ;;  %v1347_v22 = vsel %vm496_vm7, %v6052_v10, %v6053_v2  ;;  %v1475_v38 = vsel %vm578_vm5, %v6036_v44, %v6054_v39  ;;  %v6059_v20 = vld [vmem:[#allocation58_spill] sm:$0xff]  ;;  %v2778_v7 = vld [vmem:[%s3269_s21 + $0x68] ss:$0 sm:$0xff] }
 0x6d3   : > { %2106 = vmatpush.msra.mxu2 %v1758_v21  ;;  %2032 = vmatpush.msra.mxu1 %v6044_v0  ;;  %v1556_v34 = vmul.f32 %v1539_v49, %v6050_v27  ;;  %v1613_v21 = vsel %vm660_vm3, %v6055_v55, %v4502_v37  ;;  %v1371_v54 = vmul.f32 %v6057_v59, %v6056_v40  ;;  %v6061_v27 = vld [vmem:[#allocation64_spill] sm:$0xff]  ;;  %v6066_v55 = vld [vmem:[#allocation35_spill] sm:$0xff] }
 0x6d4   : > { %1997 = vmatpush.msra.mxu3 %v1491_v28  ;;  %v6058_v28 = vld [vmem:[#allocation44_spill] sm:$0xff]  ;;  %v1500_v49 = vmul.f32 %v1476_v43, %v6059_v20 }
 0x6d5   : > { %2107 = vmatpush.msra.mxu2 %v1750_v35  ;;  %2033 = vmatpush.msra.mxu1 %v6051_v41  ;;  %v1630_v48 = vmul.f32 %v1614_v63, %v6058_v28  ;;  %v5280_v35 = vpop.permute.xlu2 %1783  ;;  %v6060_v63 = vld [vmem:[#allocation79_spill] sm:$0xff]  ;;  %v1492_v41 = vmul.f32 %v1475_v38, %v6059_v20  ;;  %v1622_v10 = vmul.f32 %v1613_v21, %v6058_v28  ;;  %v6067_v59 = vld [vmem:[#allocation84_spill] sm:$0xff] }
 0x6d6   : > { %1998 = vmatpush.msra.mxu3 %v1435_v57  ;;  %v1786_v58 = vpop.permute.xlu1 %1785  ;;  %v1793_v37 = vsel %vm783_vm0, %v5160_v23, %v5280_v35  ;;  %v1363_v57 = vmul.f32 %v1349_v8, %v6056_v40  ;;  %v1411_v33 = vsel %vm537_vm6, %v6043_v32, %v6060_v63  ;;  %v1728_v8 = vsel %vm742_vm1, %v5008_v16, %v4979_v9  ;;  %v6062_v32 = vld [vmem:[#allocation115_spill] sm:$0xff]  ;;  %v6064_v16 = vld [vmem:[#allocation62_spill] sm:$0xff] }
 0x6d7   : > { %2108 = vmatpush.msra.mxu2 %v1694_v17  ;;  %2034 = vmatpush.msra.mxu1 %v1564_v4  ;;  %v1794_v44 = vsel %vm783_vm0, %v1782_v50, %v1786_v58  ;;  %v5284_v0 = vpop.permute.xlu0 %1465  ;;  %v1796_v17 = vsel %vm783_vm0, %v5046_v19, %v1782_v50  ;;  %v1364_v4 = vmul.f32 %v1347_v22, %v6061_v27  ;;  %v6065_v22 = vld [vmem:[#allocation139_spill] sm:$0xff] }
 0x6d8   : > { %1999 = vmatpush.msra.mxu3 %v1427_v1  ;;  %v1820_v60 = vmul.f32 %v2778_v7, %v1794_v44  ;;  %v6063_v1 = vld [vmem:[#allocation116_spill] sm:$0xff]  ;;  %v1795_v19 = vsel %vm783_vm0, %v5984_v3, %v5160_v23  ;;  %v1812_v50 = vmul.f32 %v2778_v7, %v1793_v37  ;;  %v1727_v9 = vsel %vm742_vm1, %v6010_v47, %v6039_v12  ;;  %v6069_v44 = vld [vmem:[#allocation70_spill] sm:$0xff]  ;;  %v6070_v37 = vld [vmem:[#allocation39_spill] sm:$0xff] }
 0x6d9   : > { %2109 = vmatpush.msra.mxu2 %v1686_v46  ;;  %2035 = vmatpush.msra.mxu1 %v1556_v34  ;;  %v1348_v43 = vsel %vm496_vm7, %v6063_v1, %v6062_v32  ;;  %v1436_v38 = vmul.f32 %v6065_v22, %v6064_v16  ;;  %v2779_v34 = vld [vmem:[%s3269_s21 + $0x60] ss:$0 sm:$0xff]  ;;  %v1757_v21 = vmul.f32 %v1728_v8, %v6066_v55  ;;  %vm6091_vm1 = vcmask 23552  }
 0x6da   : > { %2000 = vmatpush.msra.mxu3 %v1371_v54  ;;  %2060 = vmatpush.msra.mxu0 %v1820_v60  ;;  %v1819_v46 = vmul.f32 %v2779_v34, %v1796_v17  ;;  %v1535_v3 = vsel %vm619_vm4, %v5132_v36, %v4437_v11  ;;  %v1536_v23 = vsel %vm619_vm4, %v5215_v18, %v4790_v14  ;;  %v2781_v17 = vld [vmem:[%s3269_s21 + $0x78] ss:$0 sm:$0xff]  ;;  %v6073_v8 = vld [vmem:[#allocation43_spill] sm:$0xff]  ;;  %vm6099_vm9 = vmmov %vm6091_vm1 }
 0x6db   : > { %2110 = vmatpush.msra.mxu2 %v1630_v48  ;;  %2036 = vmatpush.msra.mxu1 %v1500_v49  ;;  %v1428_v47 = vmul.f32 %v1411_v33, %v6064_v16  ;;  %v1664_v12 = vsel %vm701_vm2, %v5016_v52, %v5058_v5  ;;  %v1811_v40 = vmul.f32 %v2779_v34, %v1795_v19  ;;  %v6068_v48 = vld [vmem:[#allocation49_spill] sm:$0xff] }
 0x6dc   : > { %2001 = vmatpush.msra.mxu3 %v1363_v57  ;;  %2061 = vmatpush.msra.mxu0 %v1812_v50  ;;  %v1372_v11 = vmul.f32 %v1348_v43, %v6061_v27  ;;  %v1749_v54 = vmul.f32 %v1727_v9, %v6066_v55  ;;  %v1663_v14 = vsel %vm701_vm2, %v6020_v56, %v6047_v6  ;;  %v6071_v6 = vld [vmem:[#allocation144_spill] sm:$0xff]  ;;  %v2780_v33 = vld [vmem:[%s3269_s21 + $0x70] ss:$0 sm:$0xff]  ;;  %v6074_v43 = vld [vmem:[#allocation51_spill] sm:$0xff] }
 0x6dd   : > { %2111 = vmatpush.msra.mxu2 %v1622_v10  ;;  %2037 = vmatpush.msra.mxu1 %v1492_v41  ;;  %v1558_v52 = vmul.f32 %v1535_v3, %v6068_v48  ;;  %v1566_v5 = vmul.f32 %v1536_v23, %v6068_v48  ;;  %v1693_v7 = vmul.f32 %v1664_v12, %v6070_v37  ;;  %v6072_v41 = vld [vmem:[#allocation96_spill] sm:$0xff]  ;;  %v6079_v3 = vld [vmem:[#allocation97_spill] sm:$0xff] }
 0x6de   : > { %2002 = vmatmul.f32.vlgmr.msra.gmra.mxu3 %v5011_v24  ;;  %2066 = vmatpush.msrb.mxu0 %v1757_v21  ;;  %v1788_v20 = vpop.permute.xlu1 %1787  ;;  %v1600_v56 = vsel %vm660_vm3, %v5102_v42, %v5071_v62  ;;  %v1472_v57 = vsel %vm578_vm5, %v5284_v0, %v4884_v31  ;;  %v1685_v62 = vmul.f32 %v1663_v14, %v6070_v37  ;;  %v6081_v12 = vld [vmem:[#allocation60_spill] sm:$0xff]  ;;  %vm6097_vm3 = vmmov %vm6091_vm1 }
 0x6df   : > { %2020 = vmatpush.msrb.mxu3 %v1819_v46  ;;  %2112 = vmatpush.msra.mxu2 %v6067_v59  ;;  %v1790_v28 = vpop.permute.xlu0 %1789  ;;  %v1791_v42 = vsel %vm783_vm0, %v5280_v35, %v1788_v20  ;;  %v1805_v10 = vsel %vm783_vm0, %v1788_v20, %v6072_v41  ;;  %v1471_v31 = vsel %vm578_vm5, %v5202_v30, %v4460_v53  ;;  %v6075_v35 = vld [vmem:[#allocation125_spill] sm:$0xff]  ;;  %v6076_v53 = vld [vmem:[#allocation131_spill] sm:$0xff]  ;;  %v6085_v14 = vld [vmem:[#allocation52_spill] sm:$0xff] }
 0x6e0   : > { %2038 = vmatpush.msra.mxu1 %v1436_v38  ;;  %v1792_v49 = vsel %vm783_vm0, %v1786_v58, %v1790_v28  ;;  %v1806_v60 = vsel %vm783_vm0, %v1790_v28, %v6071_v6  ;;  %2067 = vmatpush.msrb.mxu0 %v1749_v54  ;;  %v1629_v1 = vmul.f32 %v1600_v56, %v6073_v8  ;;  %v450_v41 = vld [vmem:[%s3258_s24 + $0x10] sm:$0xff]  ;;  %vm6090_vm0 = vcmask 15360  }
 0x6e1   : > { %2021 = vmatpush.msrb.mxu3 %v1811_v40  ;;  %2113 = vmatpush.msra.mxu2 %v6069_v44  ;;  %v1821_v58 = vmul.f32 %v2780_v33, %v1792_v49  ;;  %v1822_v27 = vmul.f32 %v2781_v17, %v1806_v60  ;;  %v1502_v19 = vmul.f32 %v1472_v57, %v6074_v43  ;;  %v6082_v40 = vld [vmem:[#allocation136_spill] sm:$0xff]  ;;  %v6089_v49 = vld [vmem:[#allocation59_spill] sm:$0xff]  ;;  %v449_v60 = vld [vmem:[%s3258_s24 + $0x8] sm:$0xff] }
 0x6e2   : > { %2039 = vmatpush.msra.mxu1 %v1428_v47  ;;  %2611 = vmatmul.msk.f32.vlgmr.msra.gmra.mxu0 %vm1048_vm12, %v4856_v29  ;;  %v1408_v50 = vsel %vm537_vm6, %v6075_v35, %v4810_v25  ;;  %v1813_v9 = vmul.f32 %v2780_v33, %v1791_v42  ;;  %v1814_v16 = vmul.f32 %v2781_v17, %v1805_v10  ;;  %v6078_v25 = vld [vmem:[#allocation56_spill] sm:$0xff]  ;;  %v448_v57 = vld [vmem:[%s3258_s24] sm:$0xff]  ;;  %vm6096_vm2 = vmmov %vm6090_vm0 }
 0x6e3   : > { %2114 = vmatpush.msra.mxu2 %v1566_v5  ;;  %2068 = vmatpush.msrb.mxu0 %v1693_v7  ;;  %v1621_v22 = vmul.f32 %v6076_v53, %v6073_v8  ;;  %v1494_v38 = vmul.f32 %v1471_v31, %v6074_v43  ;;  %v1438_v46 = vmul.f32 %v1408_v50, %v6078_v25  ;;  %v6088_v5 = vld [vmem:[#allocation135_spill] sm:$0xff]  ;;  %v451_v31 = vld [vmem:[%s3258_s24 + $0x18] sm:$0xff]  ;;  %vm6100_vm11 = vmmov %vm6090_vm0 }
 0x6e4   : > { %2040 = vmatpush.msra.mxu1 %v1372_v11  ;;  %2140 = vmatpush.msra.mxu3 %v1822_v27  ;;  %v1538_v55 = vsel %vm619_vm4, %v5096_v13, %v5215_v18  ;;  %v1537_v47 = vsel %vm619_vm4, %v6045_v51, %v5132_v36  ;;  %v1374_v13 = vmul.f32 %v6082_v40, %v6081_v12  ;;  %v6083_v18 = vld [vmem:[#allocation50_spill] sm:$0xff]  ;;  %v6084_v11 = vld [vmem:[#allocation69_spill] sm:$0xff] }
 0x6e5   : > { %2115 = vmatpush.msra.mxu2 %v1558_v52  ;;  %2069 = vmatpush.msrb.mxu0 %v1685_v62  ;;  %v1565_v59 = vmul.f32 %v1538_v55, %v6083_v18  ;;  %v1474_v54 = vsel %vm578_vm5, %v5150_v45, %v5284_v0  ;;  %v1557_v36 = vmul.f32 %v1537_v47, %v6083_v18  ;;  %v6086_v45 = vld [vmem:[#allocation124_spill] sm:$0xff] }
 0x6e6   : > { %2041 = vmatpush.msra.mxu1 %v1364_v4  ;;  %2610 = vmatmul.msk.f32.vlgmr.msrb.gmra.mxu3 %vm1048_vm12, %v4856_v29  ;;  %v6077_v4 = vld [vmem:[#allocation85_spill] sm:$0xff]  ;;  %v1473_v51 = vsel %vm578_vm5, %v6054_v39, %v5202_v30  ;;  %v1501_v28 = vmul.f32 %v1474_v54, %v6085_v14  ;;  %v1410_v0 = vsel %vm537_vm6, %v6086_v45, %v6075_v35  ;;  %v6087_v39 = vld [vmem:[#allocation55_spill] sm:$0xff] }
 0x6e7   : > { %2116 = vmatpush.msra.mxu2 %v1502_v19  ;;  %2070 = vmatpush.msrb.mxu0 %v1629_v1  ;;  %v1407_v34 = vsel %vm537_vm6, %v6077_v4, %v4423_v61  ;;  %v6080_v61 = vld [vmem:[#allocation80_spill] sm:$0xff]  ;;  %v1493_v48 = vmul.f32 %v1473_v51, %v6085_v14  ;;  %v1409_v30 = vsel %vm537_vm6, %v6060_v63, %v6077_v4 }
 0x6e8   : > { %2100 = vmatpush.msrb.mxu1 %v1821_v58  ;;  %2141 = vmatpush.msra.mxu3 %v1814_v16  ;;  %v1430_v21 = vmul.f32 %v1407_v34, %v6078_v25  ;;  %v1343_v23 = vsel %vm496_vm7, %v6080_v61, %v5971_v26  ;;  %v1437_v52 = vmul.f32 %v1410_v0, %v6087_v39  ;;  %v453_v16 = vld [vmem:[%s3258_s24 + $0x28] sm:$0xff]  ;;  %v6092_v0 = vmov 3  }
 0x6e9   : > { %2117 = vmatpush.msra.mxu2 %v1494_v38  ;;  %2071 = vmatpush.msrb.mxu0 %v1621_v22  ;;  %v1366_v26 = vmul.f32 %v1343_v23, %v6081_v12  ;;  %v1346_v44 = vsel %vm496_vm7, %v6062_v32, %v6088_v5  ;;  %v1345_v20 = vsel %vm496_vm7, %v6053_v2, %v6080_v61  ;;  %v452_v22 = vld [vmem:[%s3258_s24 + $0x20] sm:$0xff]  ;;  %v455_v23 = vld [vmem:[%s3258_s24 + $0x38] sm:$0xff]  ;;  %v454_v12 = vld [vmem:[%s3258_s24 + $0x30] sm:$0xff] }
 0x6ea   : > { %2101 = vmatpush.msrb.mxu1 %v1813_v9  ;;  %v1373_v63 = vmul.f32 %v1346_v44, %v6089_v49  ;;  %v1365_v37 = vmul.f32 %v1345_v20, %v6089_v49  ;;  %vm6098_vm7 = vmmov %vm6090_vm0 }
 0x6eb   : > { %2042 = vmatmul.f32.vlgmr.msra.gmra.mxu1 %v5011_v24  ;;  %2118 = vmatpush.msra.mxu2 %v1438_v46 }
 0x6ec   : > { %2072 = vmatpush.msrb.mxu0 %v6079_v3 }
 0x6ed   : > { %2119 = vmatpush.msra.mxu2 %v1430_v21 }
 0x6ee   : > { %2073 = vmatpush.msrb.mxu0 %v6084_v11  ;;  %2613 = vmatmul.msk.f32.vlgmr.msra.gmra.mxu3 %vm1048_vm12, %v4856_v29 }
 0x6ef   : > { %2120 = vmatpush.msra.mxu2 %v1374_v13 }
 0x6f0   : > { %2074 = vmatpush.msrb.mxu0 %v1565_v59 }
 0x6f1   : > { %2121 = vmatpush.msra.mxu2 %v1366_v26 }
 0x6f2   : > { %2075 = vmatpush.msrb.mxu0 %v1557_v36  ;;  %2122 = vmatmul.f32.vlgmr.msra.gmra.mxu2 %v5011_v24 }
 0x6f3   : > { %2612 = vmatmul.msk.f32.vlgmr.msrb.gmra.mxu1 %vm1048_vm12, %v4856_v29  ;;  %v1429_v29 = vmul.f32 %v1409_v30, %v6087_v39  ;;  %v6094_v30 = vmov 2   ;;  %vm6101_vm12 = vmmov %vm6091_vm1 }
 0x6f4   : > { %2076 = vmatpush.msrb.mxu0 %v1501_v28 }
 0x6f6   : > { %2077 = vmatpush.msrb.mxu0 %v1493_v48  ;;  %v6093_v48 = vmov 0  }
 0x6f8   : > { %2078 = vmatpush.msrb.mxu0 %v1437_v52 }
 0x6fa   : > { %2079 = vmatpush.msrb.mxu0 %v1429_v29 }
 0x6fc   : > { %2080 = vmatpush.msrb.mxu0 %v1373_v63 }
 0x6fe   : > { %2081 = vmatpush.msrb.mxu0 %v1365_v37 }
 0x6ff   : > { %2082 = vmatmul.f32.vlgmr.msrb.gmra.mxu0 %v5011_v24 }
 0x710   : > { %v1863_v7 = vpop.f32.mrf.mxu3 }
 0x718   : > { %v1903_v56 = vpop.f32.mrf.mxu3 }
 0x720   : > { %v1943_v24 = vpop.f32.mrf.mxu3 }
 0x72c   : > { %v1883_v32 = vpop.f32.mrf.mxu0 }
 0x72d   : > { %v1904_v6 = vadd.f32 %v1903_v56, %v1883_v32 }
 0x72f   : > { %v5451_v2 = vadd.f32 %v1904_v6, %v449_v60 }
 0x734   : > { %v1843_v33 = vpop.f32.mrf.mxu2 }
 0x735   : > { %v1864_v15 = vadd.f32 %v1863_v7, %v1843_v33 }
 0x737   : > { %v5453_v58 = vadd.f32 %v1864_v15, %v448_v57  ;;  %v5491_v57 = vld [vmem:[%s5608_s4] sm:$0xff] }
 0x739   : > { %v2154_v17 = vadd.f32 %v5451_v2, %v5453_v58 }
 0x73b   : > { %2155 = vadd.xlane.f32.xlu2 %v2154_v17 }
 0x740   : > { %v1983_v62 = vpop.f32.mrf.mxu3 }
 0x745   : > { %v1923_v27 = vpop.f32.mrf.mxu1 }
 0x746   : > { %v1944_v42 = vadd.f32 %v1943_v24, %v1923_v27 }
 0x748   : > { %v2148_v1 = vadd.f32 %v1944_v42, %v450_v41 }
 0x755   : > { %v1963_v10 = vpop.f32.mrf.mxu2 }
 0x756   : > { %v1984_v8 = vadd.f32 %v1983_v62, %v1963_v10  ;;  %v6095_v62 = vmov 1  }
 0x758   : > { %v2149_v43 = vadd.f32 %v1984_v8, %v451_v31 }
 0x75a   : > { %v2157_v19 = vadd.f32 %v2149_v43, %v2148_v1 }
 0x75c   : > { %2158 = vadd.xlane.f32.xlu0 %v2157_v19 }
 0x75f   : > { %v2063_v50 = vpop.f32.mrf.mxu0 }
 0x761   : > { %v2003_v35 = vpop.f32.mrf.mxu3 }
 0x768   : > { %v2043_v9 = vpop.f32.mrf.mxu1 }
 0x769   : > { %v2064_v53 = vadd.f32 %v2063_v50, %v2043_v9  ;;  %v2023_v38 = vpop.f32.mrf.mxu3 }
 0x76a   : > { %v2024_v4 = vadd.f32 %v2023_v38, %v2003_v35 }
 0x76b   : > { %v2151_v34 = vadd.f32 %v2064_v53, %v453_v16 }
 0x76c   : > { %v2150_v25 = vadd.f32 %v2024_v4, %v452_v22 }
 0x76e   : > { %v2160_v46 = vadd.f32 %v2151_v34, %v2150_v25 }
 0x770   : > { %2161 = vadd.xlane.f32.xlu1 %v2160_v46  ;;  %v2103_v61 = vpop.f32.mrf.mxu1 }
 0x771   : > { %v2143_v21 = vpop.f32.mrf.mxu3 }
 0x775   : > { %v2123_v55 = vpop.f32.mrf.mxu2 }
 0x776   : > { %v2144_v3 = vadd.f32 %v2143_v21, %v2123_v55 }
 0x778   : > { %v2153_v13 = vadd.f32 %v2144_v3, %v455_v23 }
 0x77c   : > { %v2083_v47 = vpop.f32.mrf.mxu0 }
 0x77d   : > { %v2104_v40 = vadd.f32 %v2103_v61, %v2083_v47 }
 0x77f   : > { %v2152_v18 = vadd.f32 %v2104_v40, %v454_v12 }
 0x781   : > { %v2163_v59 = vadd.f32 %v2153_v13, %v2152_v18 }
 0x783   : > { %2164 = vadd.xlane.f32.xlu2 %v2163_v59  ;;  %v2784_v59 = vld [vmem:[%s3250_s20 + $0x8] sm:$0xff] }
 0x7ae   : > { %v2156_v11 = vpop.xlane.xlu2 %2155 }
 0x7cf   : > { %v2159_v54 = vpop.xlane.xlu0 %2158 }
 0x7d0   : > { %v2166_v36 = vsel %vm1039_vm10, %v2156_v11, %v2159_v54 }
 0x7e3   : > { %v2162_v26 = vpop.xlane.xlu1 %2161 }
 0x7e4   : > { %v2167_v51 = vsel %vm6090_vm0, %v2166_v36, %v2162_v26 }
 0x7f6   : > { %v2165_v14 = vpop.xlane.xlu2 %2164 }
 0x7f7   : > { %v2168_v28 = vsel %vm6091_vm1, %v2167_v51, %v2165_v14 }
 0x7f8   : > { %v2169_v45 = vmul.f32 0.00390625, %v2168_v28 }
 0x7fa   : > { %2194 = vperm.xlu2 %2739, %v2169_v45   ;;  %2183 = vperm.xlu1 %2738, %v2169_v45  }
 0x7fb   : > { %2172 = vperm.xlu0 %2737, %v2169_v45  }
 0x802   : > { %2740 = vset.pattern.permute.xlu1 %v6092_v0  ;;  %2743 = vset.pattern.permute.xlu2 %v6093_v48 }
 0x803   : > { %2205 = vperm.xlu1 %2740, %v2169_v45   ;;  %2742 = vset.pattern.permute.xlu0 %v6092_v0 }
 0x80b   : > { %2741 = vset.pattern.permute.xlu1 %v6094_v30 }
 0x854   : > { %v2195_v39 = vpop.permute.xlu2 %2194 }
 0x855   : > { %v5470_v52 = vsub.f32 %v2150_v25, %v2195_v39  ;;  %v5472_v5 = vsub.f32 %v2151_v34, %v2195_v39 }
 0x857   : > { %v2199_v44 = vmul.f32 %v5470_v52, %v5470_v52  ;;  %v2200_v29 = vmul.f32 %v5472_v5, %v5472_v5 }
 0x859   : > { %v2201_v20 = vadd.f32 %v2200_v29, %v2199_v44  ;;  %v2785_v44 = vld [vmem:[%s3250_s20 + $0x20] sm:$0xff] }
 0x85b   : > { %2202 = vadd.xlane.f32.xlu0 %v2201_v20  ;;  %v2786_v20 = vld [vmem:[%s3250_s20 + $0x28] sm:$0xff] }
 0x86c   : > { %v2184_v49 = vpop.permute.xlu1 %2183 }
 0x86d   : > { %v5478_v63 = vsub.f32 %v2148_v1, %v2184_v49  ;;  %v5480_v37 = vsub.f32 %v2149_v43, %v2184_v49  ;;  %v2173_v7 = vpop.permute.xlu0 %2172 }
 0x86e   : > { %v2175_v32 = vsub.f32 %v5453_v58, %v2173_v7  ;;  %v2176_v56 = vsub.f32 %v5451_v2, %v2173_v7 }
 0x86f   : > { %v2188_v6 = vmul.f32 %v5478_v63, %v5478_v63  ;;  %v2189_v60 = vmul.f32 %v5480_v37, %v5480_v37  ;;  %2243 = vperm.xlu0 %2742, %v5491_v57  }
 0x870   : > { %v2177_v33 = vmul.f32 %v2175_v32, %v2175_v32  ;;  %v2178_v15 = vmul.f32 %v2176_v56, %v2176_v56 }
 0x871   : > { %v2190_v17 = vadd.f32 %v2189_v60, %v2188_v6 }
 0x872   : > { %v2179_v24 = vadd.f32 %v2178_v15, %v2177_v33  ;;  %v2787_v15 = vld [vmem:[%s3250_s20 + $0x10] sm:$0xff] }
 0x873   : > { %2191 = vadd.xlane.f32.xlu1 %v2190_v17 }
 0x874   : > { %2180 = vadd.xlane.f32.xlu2 %v2179_v24  ;;  %v2788_v24 = vld [vmem:[%s3250_s20 + $0x18] sm:$0xff] }
 0x875   : > { %v2206_v2 = vpop.permute.xlu1 %2205 }
 0x876   : > { %v5494_v58 = vsub.f32 %v2152_v18, %v2206_v2  ;;  %v5496_v27 = vsub.f32 %v2153_v13, %v2206_v2  ;;  %v2783_v13 = vld [vmem:[%s3250_s20] sm:$0xff] }
 0x877   : > { %2748 = vset.pattern.permute.xlu0 %v6095_v62 }
 0x878   : > { %v2210_v42 = vmul.f32 %v5494_v58, %v5494_v58  ;;  %v2211_v41 = vmul.f32 %v5496_v27, %v5496_v27 }
 0x87a   : > { %v2212_v10 = vadd.f32 %v2211_v41, %v2210_v42 }
 0x87c   : > { %2213 = vadd.xlane.f32.xlu2 %v2212_v10 }
 0x88c   : > { %2231 = vperm.xlu1 %2741, %v5491_v57  }
 0x894   : > { %2744 = vset.pattern.permute.xlu1 %v6095_v62 }
 0x8ce   : > { %v2203_v43 = vpop.xlane.xlu0 %2202 }
 0x8e1   : > { %v2244_v61 = vpop.permute.xlu0 %2243 }
 0x8e6   : > { %v2192_v8 = vpop.xlane.xlu1 %2191 }
 0x8e7   : > { %v2181_v31 = vpop.xlane.xlu2 %2180 }
 0x8e8   : > { %v2215_v1 = vsel %vm1039_vm10, %v2181_v31, %v2192_v8 }
 0x8e9   : > { %v2216_v35 = vsel %vm6096_vm2, %v2215_v1, %v2203_v43 }
 0x8ef   : > { %v2214_v19 = vpop.xlane.xlu2 %2213 }
 0x8f0   : > { %v2217_v50 = vsel %vm6097_vm3, %v2216_v35, %v2214_v19  ;;  %v2790_v35 = vld [vmem:[%s3250_s20 + $0x38] sm:$0xff] }
 0x8f1   : > { %v2218_v9 = vmul.f32 0.00390625, %v2217_v50 }
 0x8f3   : > { %v2219_v16 = vadd.f32 1e-05, %v2218_v9 }
 0x8f5   : > { %2770 = vrsqrt.f32 %v2219_v16  ;;  %vm2226_vm5 = vweird.f32 %v2219_v16 }
 0x8fb   : > { %v2771_v53 = vpop.eup %2770 }
 0x8fc   : > { %v2221_v22 = vmul.f32 %v2771_v53, %v2219_v16  ;;  %vm2227_vm4 = vweird.f32 %v2771_v53 }
 0x8fd   : > { %vm2228_vm6 = vmor %vm2226_vm5, %vm2227_vm4 }
 0x8fe   : > { %v2222_v38 = vmul.f32 %v2771_v53, %v2221_v22  ;;  %v2232_v25 = vpop.permute.xlu1 %2231 }
 0x900   : > { %v2223_v4 = vmul.f32 0.5, %v2222_v38 }
 0x902   : > { %v2224_v34 = vsub.f32 1.5, %v2223_v4 }
 0x904   : > { %v2225_v46 = vmul.f32 %v2771_v53, %v2224_v34 }
 0x906   : > { %v2229_v55 = vsel %vm2228_vm6, %v2771_v53, %v2225_v46 }
 0x907   : > { %v2234_v21 = vmul.f32 %v2232_v25, %v2229_v55 }
 0x909   : > { %2249 = vperm.xlu1 %2744, %v2234_v21   ;;  %2237 = vperm.xlu2 %2743, %v2234_v21  }
 0x911   : > { %2746 = vset.pattern.permute.xlu1 %v6092_v0  ;;  %2745 = vset.pattern.permute.xlu2 %v6094_v30 }
 0x912   : > { %2265 = vperm.xlu1 %2746, %v2234_v21   ;;  %2257 = vperm.xlu2 %2745, %v2234_v21  }
 0x91a   : > { %2749 = vset.pattern.permute.xlu1 %v6094_v30  ;;  %2747 = vset.pattern.permute.xlu2 %v6093_v48 }
 0x963   : > { %v2238_v3 = vpop.permute.xlu2 %2237 }
 0x964   : > { %v2240_v23 = vmul.f32 %v2238_v3, %v2175_v32  ;;  %v2241_v47 = vmul.f32 %v2238_v3, %v2176_v56 }
 0x966   : > { %v2246_v12 = vadd.f32 %v2244_v61, %v2240_v23  ;;  %v2247_v40 = vadd.f32 %v2244_v61, %v2241_v47 }
 0x968   : > { %v2272_v18 = vadd.f32 %v2783_v13, %v2246_v12  ;;  %v2273_v11 = vadd.f32 %v2784_v59, %v2247_v40 }
 0x96a   : > { %v2280_v54 = vmax.f32 %v2272_v18, 0.0  ;;  %v2281_v26 = vmax.f32 %v2273_v11, 0.0 }
 0x96c   : > { %v2258_v36 = vpop.permute.xlu2 %2257  ;;  %v2288_v51 = vadd.f32 %v2281_v26, %v2280_v54 }
 0x96d   : > { %v2260_v14 = vmul.f32 %v2258_v36, %v5470_v52  ;;  %v2261_v28 = vmul.f32 %v2258_v36, %v5472_v5 }
 0x96e   : > { %2289 = vadd.xlane.f32.xlu2 %v2288_v51 }
 0x96f   : > { %v2262_v45 = vadd.f32 %v2260_v14, %v2244_v61  ;;  %v2263_v39 = vadd.f32 %v2261_v28, %v2244_v61 }
 0x971   : > { %v2276_v29 = vadd.f32 %v2785_v44, %v2262_v45  ;;  %v2277_v49 = vadd.f32 %v2786_v20, %v2263_v39  ;;  %v3044_v44 = vmov 4  }
 0x973   : > { %v2284_v7 = vmax.f32 %v2276_v29, 0.0  ;;  %v2285_v32 = vmax.f32 %v2277_v49, 0.0 }
 0x975   : > { %v2294_v56 = vadd.f32 %v2285_v32, %v2284_v7 }
 0x977   : > { %2295 = vadd.xlane.f32.xlu0 %v2294_v56 }
 0x97b   : > { %v2250_v6 = vpop.permute.xlu1 %2249 }
 0x97c   : > { %v2252_v60 = vmul.f32 %v2250_v6, %v5478_v63  ;;  %v2253_v52 = vmul.f32 %v2250_v6, %v5480_v37  ;;  %v2789_v37 = vld [vmem:[%s3250_s20 + $0x30] sm:$0xff]  ;;  %s435_s20 = scalar_lea.vmem [#allocation11], %s3246_s6  ;;  %s2622_s6 = sshll.u32 %s3112_s7, 6 }
 0x97d   : > { %s2426_s23 = scalar_lea.hbm %s5612_s8, %s2622_s6  ;;  %s2428_s12 = sshll.u32 %s435_s20, 4  ;;  %s2429_s12 = int_to_ptr.vmem [resolvable:$true] %s2428_s12 }
 0x97e   : > { %v2254_v5 = vadd.f32 %v2252_v60, %v2244_v61  ;;  %v2255_v33 = vadd.f32 %v2253_v52, %v2244_v61  ;;  %s2430_s26 = sshll.u32 %s2426_s23, 4  ;;  %s2431_s26 = int_to_ptr.hbm [resolvable:$true] %s2430_s26 }
 0x97f   : > { %s2955_s7 = sshra.s32 %s2431_s26, 4  ;;  %s2956_s7 = int_to_ptr.hbm [resolvable:$true] %s2955_s7 }
 0x980   : > { %v2274_v17 = vadd.f32 %v2787_v15, %v2254_v5  ;;  %v2275_v2 = vadd.f32 %v2788_v24, %v2255_v33  ;;  %s2957_s19 = scalar_lea.hbm %s2956_s7, 64  ;;  %p2962_p10 = scmp.lt.s32.totalorder %s2956_s7, %s5612_s8 }
 0x981   : > { %p2958_p4 = scmp.ne.s32.totalorder %s2956_s7, %s2957_s19  ;;  %p2963_p12 = scmp.lt.s32.totalorder %s2961_s17, %s2957_s19 }
 0x982   : > { %v2282_v42 = vmax.f32 %v2274_v17, 0.0  ;;  %v2283_v41 = vmax.f32 %v2275_v2, 0.0 }
 0x983   : > { %p2959_p7 = pnand %p2958_p4, %p3160_p5  ;;  %p2964_p13 = por %p2963_p12, %p2962_p10 }
 0x984   : > { %v2266_v10 = vpop.permute.xlu1 %2265  ;;  %v2291_v31 = vadd.f32 %v2283_v41, %v2282_v42 }
 0x985   : > { %v2268_v8 = vmul.f32 %v2266_v10, %v5494_v58  ;;  %v2269_v1 = vmul.f32 %v2266_v10, %v5496_v27  ;;  %p2960_p9 = pneg %p2959_p7 }
 0x986   : > { %2292 = vadd.xlane.f32.xlu1 %v2291_v31 }
 0x987   : > { %v2270_v63 = vadd.f32 %v2268_v8, %v2244_v61  ;;  %v2271_v43 = vadd.f32 %v2269_v1, %v2244_v61  ;;  %p2965_p0 = pnand %p2964_p13, %p2960_p9 }
 0x989   : > { %v2278_v19 = vadd.f32 %v2789_v37, %v2270_v63  ;;  %v2279_v50 = vadd.f32 %v2790_v35, %v2271_v43 }
 0x98b   : > { %v2286_v9 = vmax.f32 %v2278_v19, 0.0  ;;  %v2287_v16 = vmax.f32 %v2279_v50, 0.0 }
 0x98d   : > { %v2297_v53 = vadd.f32 %v2287_v16, %v2286_v9 }
 0x98f   : > { %2298 = vadd.xlane.f32.xlu2 %v2297_v53 }
 0x9e1   : > { %v2290_v22 = vpop.xlane.xlu2 %2289 }
 0x9ea   : > { %v2296_v34 = vpop.xlane.xlu0 %2295 }
 0x9f9   : > { %v2293_v38 = vpop.xlane.xlu1 %2292 }
 0x9fa   : > { %v2300_v4 = vsel %vm1039_vm10, %v2290_v22, %v2293_v38 }
 0x9fb   : > { %v2301_v58 = vsel %vm6098_vm7, %v2300_v4, %v2296_v34 }
 0xa02   : > { %v2299_v25 = vpop.xlane.xlu2 %2298 }
 0xa03   : > { %v2302_v27 = vsel %vm6099_vm9, %v2301_v58, %v2299_v25 }
 0xa04   : > { %v2303_v46 = vmul.f32 0.00390625, %v2302_v27 }
 0xa06   : > { %2328 = vperm.xlu1 %2749, %v2303_v46   ;;  %2317 = vperm.xlu0 %2748, %v2303_v46  }
 0xa07   : > { %2306 = vperm.xlu2 %2747, %v2303_v46  }
 0xa0e   : > { %2750 = vset.pattern.permute.xlu1 %v6092_v0  ;;  %2757 = vset.pattern.permute.xlu0 %v6092_v0 }
 0xa61   : > { %v2307_v55 = vpop.permute.xlu2 %2306 }
 0xa62   : > { %v5531_v21 = vsub.f32 %v2280_v54, %v2307_v55  ;;  %v5533_v3 = vsub.f32 %v2281_v26, %v2307_v55 }
 0xa64   : > { %v2311_v61 = vmul.f32 %v5531_v21, %v5531_v21  ;;  %v2312_v23 = vmul.f32 %v5533_v3, %v5533_v3 }
 0xa66   : > { %v2313_v47 = vadd.f32 %v2312_v23, %v2311_v61 }
 0xa68   : > { %2314 = vadd.xlane.f32.xlu1 %v2313_v47 }
 0xa78   : > { %v2329_v12 = vpop.permute.xlu1 %2328  ;;  %v2318_v40 = vpop.permute.xlu0 %2317 }
 0xa79   : > { %v5539_v13 = vsub.f32 %v2284_v7, %v2329_v12  ;;  %v5541_v18 = vsub.f32 %v2285_v32, %v2329_v12  ;;  %v5543_v59 = vsub.f32 %v2282_v42, %v2318_v40  ;;  %v5545_v11 = vsub.f32 %v2283_v41, %v2318_v40 }
 0xa7a   : > { %v3045_v42 = vmov 5  }
 0xa7b   : > { %v2333_v54 = vmul.f32 %v5539_v13, %v5539_v13  ;;  %v2334_v26 = vmul.f32 %v5541_v18, %v5541_v18  ;;  %v2322_v36 = vmul.f32 %v5543_v59, %v5543_v59  ;;  %v2323_v51 = vmul.f32 %v5545_v11, %v5545_v11  ;;  %2753 = vset.pattern.permute.xlu2 %v3045_v42 }
 0xa7d   : > { %v2335_v14 = vadd.f32 %v2334_v26, %v2333_v54  ;;  %v2324_v28 = vadd.f32 %v2323_v51, %v2322_v36 }
 0xa7f   : > { %2336 = vadd.xlane.f32.xlu2 %v2335_v14  ;;  %2325 = vadd.xlane.f32.xlu1 %v2324_v28 }
 0xa97   : > { %2377 = vperm.xlu2 %2753, %v5491_v57  }
 0xa98   : > { %2339 = vperm.xlu1 %2750, %v2303_v46  }
 0xaa0   : > { %2751 = vset.pattern.permute.xlu1 %v3044_v44 }
 0xaa1   : > { %2365 = vperm.xlu1 %2751, %v5491_v57  }
 0xaa9   : > { %2752 = vset.pattern.permute.xlu1 %v6093_v48 }
 0xadb   : > { %v2315_v45 = vpop.xlane.xlu1 %2314 }
 0xaf2   : > { %v2326_v39 = vpop.xlane.xlu1 %2325  ;;  %v2337_v60 = vpop.xlane.xlu2 %2336 }
 0xaf3   : > { %v2349_v29 = vsel %vm1039_vm10, %v2315_v45, %v2326_v39 }
 0xaf4   : > { %v2350_v52 = vsel %vm6100_vm11, %v2349_v29, %v2337_v60 }
 0xafa   : > { %v2378_v43 = vpop.permute.xlu2 %2377 }
 0xb0a   : > { %v2340_v20 = vpop.permute.xlu1 %2339 }
 0xb0b   : > { %v2342_v49 = vsub.f32 %v2286_v9, %v2340_v20  ;;  %v2343_v7 = vsub.f32 %v2287_v16, %v2340_v20 }
 0xb0d   : > { %v2344_v32 = vmul.f32 %v2342_v49, %v2342_v49  ;;  %v2345_v56 = vmul.f32 %v2343_v7, %v2343_v7 }
 0xb0f   : > { %v2346_v6 = vadd.f32 %v2345_v56, %v2344_v32 }
 0xb11   : > { %2347 = vadd.xlane.f32.xlu0 %v2346_v6 }
 0xb13   : > { %v2366_v31 = vpop.permute.xlu1 %2365 }
 0xb84   : > { %v2348_v5 = vpop.xlane.xlu0 %2347 }
 0xb85   : > { %v2351_v33 = vsel %vm6101_vm12, %v2350_v52, %v2348_v5 }
 0xb86   : > { %v2352_v15 = vmul.f32 0.00390625, %v2351_v33 }
 0xb88   : > { %v2353_v17 = vadd.f32 1e-05, %v2352_v15 }
 0xb8a   : > { %2772 = vrsqrt.f32 %v2353_v17  ;;  %vm2360_vm13 = vweird.f32 %v2353_v17 }
 0xb90   : > { %v2773_v24 = vpop.eup %2772 }
 0xb91   : > { %v2355_v2 = vmul.f32 %v2773_v24, %v2353_v17  ;;  %vm2361_vm10 = vweird.f32 %v2773_v24 }
 0xb92   : > { %vm2362_vm14 = vmor %vm2360_vm13, %vm2361_vm10 }
 0xb93   : > { %v2356_v48 = vmul.f32 %v2773_v24, %v2355_v2 }
 0xb95   : > { %v2357_v41 = vmul.f32 0.5, %v2356_v48 }
 0xb97   : > { %v2358_v10 = vsub.f32 1.5, %v2357_v41 }
 0xb99   : > { %v2359_v8 = vmul.f32 %v2773_v24, %v2358_v10 }
 0xb9b   : > { %v2363_v1 = vsel %vm2362_vm14, %v2773_v24, %v2359_v8 }
 0xb9c   : > { %v2368_v63 = vmul.f32 %v2366_v31, %v2363_v1 }
 0xb9e   : > { %2371 = vperm.xlu1 %2752, %v2368_v63  }
 0xba6   : > { %2754 = vset.pattern.permute.xlu1 %v6095_v62 }
 0xba7   : > { %2383 = vperm.xlu1 %2754, %v2368_v63  }
 0xbaf   : > { %2755 = vset.pattern.permute.xlu1 %v6094_v30 }
 0xbb0   : > { %2391 = vperm.xlu1 %2755, %v2368_v63  }
 0xbb8   : > { %2756 = vset.pattern.permute.xlu1 %v6092_v0 }
 0xbb9   : > { %2399 = vperm.xlu1 %2756, %v2368_v63  }
 0xc10   : > { %v2372_v57 = vpop.permute.xlu1 %2371 }
 0xc11   : > { %v2374_v37 = vmul.f32 %v2372_v57, %v5531_v21  ;;  %v2375_v19 = vmul.f32 %v2372_v57, %v5533_v3 }
 0xc13   : > { %v2380_v35 = vadd.f32 %v2378_v43, %v2374_v37  ;;  %v2381_v50 = vadd.f32 %v2378_v43, %v2375_v19 }
 0xc15   : > { %2406 = vst [vmem:[%s435_s20] sm:$0xff] %v2380_v35 }
 0xc16   : > { %2407 = vst [vmem:[%s435_s20 + $0x8] sm:$0xff] %v2381_v50 }
 0xc19   : > { %v2384_v62 = vpop.permute.xlu1 %2383 }
 0xc1a   : > { %v2386_v9 = vmul.f32 %v2384_v62, %v5543_v59  ;;  %v2387_v30 = vmul.f32 %v2384_v62, %v5545_v11 }
 0xc1c   : > { %v2388_v16 = vadd.f32 %v2386_v9, %v2378_v43  ;;  %v2389_v0 = vadd.f32 %v2387_v30, %v2378_v43 }
 0xc1e   : > { %2408 = vst [vmem:[%s435_s20 + $0x10] sm:$0xff] %v2388_v16 }
 0xc1f   : > { %2409 = vst [vmem:[%s435_s20 + $0x18] sm:$0xff] %v2389_v0 }
 0xc22   : > { %v2392_v53 = vpop.permute.xlu1 %2391 }
 0xc23   : > { %v2394_v22 = vmul.f32 %v2392_v53, %v5539_v13  ;;  %v2395_v38 = vmul.f32 %v2392_v53, %v5541_v18 }
 0xc25   : > { %v2396_v4 = vadd.f32 %v2394_v22, %v2378_v43  ;;  %v2397_v34 = vadd.f32 %v2395_v38, %v2378_v43 }
 0xc27   : > { %2410 = vst [vmem:[%s435_s20 + $0x20] sm:$0xff] %v2396_v4 }
 0xc28   : > { %2411 = vst [vmem:[%s435_s20 + $0x28] sm:$0xff] %v2397_v34 }
 0xc2b   : > { %v2400_v25 = vpop.permute.xlu1 %2399 }
 0xc2c   : > { %v2402_v58 = vmul.f32 %v2400_v25, %v2342_v49  ;;  %v2403_v27 = vmul.f32 %v2400_v25, %v2343_v7 }
 0xc2e   : > { %v2404_v46 = vadd.f32 %v2402_v58, %v2378_v43  ;;  %v2405_v55 = vadd.f32 %v2403_v27, %v2378_v43 }
 0xc30   : > { %2412 = vst [vmem:[%s435_s20 + $0x30] sm:$0xff] %v2404_v46 }
 0xc31   : > { %2413 = vst [vmem:[%s435_s20 + $0x38] sm:$0xff] %v2405_v55 }
 0xc32   : > { %2968 = shalt.err (!%p2965_p0)
}
 0xc33   : > { %2637 = dma.vmem_to_hbm [thread:$0]  (%p3160_p5), %s2429_s12, 1024, %s2431_s26, %s2415_s18  }
 0xc34 PF: > { %s2442_s29 = sand.u32 1, %s3011_s27   ;;  %p6102_p3 = scmp.ge.s32.totalorder %s3023_s30, 2 }
 0xc35   : > { %s2443_s16 = scalar_lea.sflag [#allocation4], %s2442_s29 }
 0xc36   : > { %p2657_p1 = pnand %p6102_p3, %p3126_p6 }
 0xc38   : > { %p2658_p8 = pneg %p2657_p1 }
 0xc3a   : > { %3006 = dma.done.wait (%p2658_p8), %s2443_s16, 1024  }
 0xc3b   : > { %3008 = vsyncadd (%p2658_p8), %s2443_s16, 4294966272  ;;  %s6103_s30 = sld [smem:[#allocation19_spill]]  ;;  %s6106_s27 = smov %s3015_s28 }
 0xc3c   : > { %s6104_s14 = sld [smem:[#allocation18_spill]] }
 0xc3d   : > { %s6105_s29 = sld [smem:[#allocation20_spill]] }
 0xc41   : > { %p27_p2 = scmp.ge.s32.totalorder %s6103_s30, 4  }
 0xc42   : > { %s6107_s28 = smov %s6104_s14 }
 0xc43   :  { %29 = sbr.rel (!%p27_p2) target bundleno = 13 (0xd), region = 131 }
 0xc48   :  { %2449 = vsyncpa [#allocation3], 1 }
 0xc49   :  { %2451 = vsyncpa [#allocation3 + $0x1], 1 }
 0xc4a   :  { %2452 = vsyncpa [#allocation6], 1 }
 0xc4b   :  { %2454 = vsyncpa [#allocation6 + $0x1], 1 }
 0xc4c   :  { %2455 = vsyncpa [#allocation9], 1 }
 0xc4d   :  { %2457 = vsyncpa [#allocation9 + $0x1], 1 }
 0xc4e   :  { %2458 = vsyncpa [#allocation4], 1 }
 0xc4f   :  { %2460 = vsyncpa [#allocation4 + $0x1], 1 }

</bundles_post_ra>
